<compile_context>
chip_gen: v7x
topology: tpu7x:2x2x1
jax: 0.10.0
libtpu: 0.0.40
codegen_flags: <defaults>
</compile_context>

<pallas_src>
import functools
import math

import jax
import jax.numpy as jnp
from jax import lax
from jax.experimental import pallas as pl
from jax.experimental.pallas import tpu as pltpu


# ------------------------------- helpers -----------------------------------

def _round_up(x, m):
    return ((x + m - 1) // m) * m


def _pad2(a, shape):
    pads = [(0, t - s) for s, t in zip(a.shape, shape)]
    if all(p == (0, 0) for p in pads):
        return a
    return jnp.pad(a, pads)


def _pick_tile(dim, target, align):
    """Largest tile <= target, multiple of `align`, ideally dividing dim."""
    if dim <= target:
        return dim
    t = (target // align) * align
    while t >= align:
        if dim % t == 0:
            return t
        t -= align
    return target  # fall back: caller pads up to a multiple of `target`


def _pick_batch_block(B, target=8):
    """Largest divisor of B that is <= target (batched per-sample kernels)."""
    for bb in range(min(B, target), 0, -1):
        if B % bb == 0:
            return bb
    return 1


def _vmem_limit(footprint_bytes):
    # footprint + margin for compiler internal scratch; >= 32 MiB floor, <= 60 MiB
    # (valid on v7x's 64 MiB part, far below v5e/v6e physical 128 MiB).
    return int(min(max(footprint_bytes + (12 << 20), 32 << 20), 60 << 20))


# --------------------------- fused dense kernel -----------------------------
# y = act(x @ W + b) [+ residual] [-> LayerNorm]   — tiled, bf16 matmul, f32 accumulate.

def _make_dense_kernel(act, has_res, has_ln):
    def kernel(*refs):
        x_ref, w_ref, b_ref = refs[0], refs[1], refs[2]
        idx = 3
        res_ref = g_ref = bt_ref = None
        if has_res:
            res_ref = refs[idx]; idx += 1
        if has_ln:
            g_ref, bt_ref = refs[idx], refs[idx + 1]; idx += 2
        o_ref, acc_ref = refs[idx], refs[idx + 1]

        k = pl.program_id(2)

        @pl.when(k == 0)
        def _():
            acc_ref[...] = jnp.zeros_like(acc_ref)

        acc_ref[...] += jnp.dot(x_ref[...], w_ref[...],
                                preferred_element_type=jnp.float32)

        @pl.when(k == pl.num_programs(2) - 1)
        def _():
            y = acc_ref[...] + b_ref[...]
            if act == "relu":
                y = jnp.maximum(y, 0.0)
            elif act == "tanh":
                y = jnp.tanh(y)
            if has_res:
                y = y + res_ref[...].astype(jnp.float32)
            if has_ln:
                mu = jnp.mean(y, axis=-1, keepdims=True)
                var = jnp.mean(y * y, axis=-1, keepdims=True) - mu * mu   # single pass
                y = (y - mu) * lax.rsqrt(var + 1e-5) * g_ref[...] + bt_ref[...]
            o_ref[...] = y.astype(o_ref.dtype)

    return kernel


def dense(x, w, b, *, act="none", residual=None, ln=None,
          out_dtype=jnp.float32, tm=512, tn=512, tk=512):
    """Tiled y = act(x @ W + b) [+ residual] [-> LayerNorm]."""
    M, K = x.shape
    N = w.shape[1]
    has_ln = ln is not None
    has_res = residual is not None

    x = x.astype(jnp.bfloat16)
    w = w.astype(jnp.bfloat16)

    tm_e = _pick_tile(M, tm, 8)
    tk_e = _pick_tile(K, tk, 128)
    tn_e = N if has_ln else _pick_tile(N, tn, 128)   # LN needs full rows in one block

    Mp, Kp, Np = _round_up(M, tm_e), _round_up(K, tk_e), _round_up(N, tn_e)
    xp = _pad2(x, (Mp, Kp))
    wp = _pad2(w, (Kp, Np))
    bp = _pad2(b.reshape(1, N).astype(jnp.float32), (1, Np))

    inputs = [xp, wp, bp]
    in_specs = [
        pl.BlockSpec((tm_e, tk_e), lambda i, j, k: (i, k)),
        pl.BlockSpec((tk_e, tn_e), lambda i, j, k: (k, j)),
        pl.BlockSpec((1, tn_e), lambda i, j, k: (0, j)),   # resident across k
    ]
    if has_res:
        inputs.append(_pad2(residual.astype(jnp.bfloat16), (Mp, Np)))
        in_specs.append(pl.BlockSpec((tm_e, tn_e), lambda i, j, k: (i, j)))
    if has_ln:
        g, beta = ln
        inputs += [g.reshape(1, N).astype(jnp.float32),
                   beta.reshape(1, N).astype(jnp.float32)]
        in_specs += [pl.BlockSpec((1, tn_e), lambda i, j, k: (0, j)),
                     pl.BlockSpec((1, tn_e), lambda i, j, k: (0, j))]

    out_isz = jnp.dtype(out_dtype).itemsize
    footprint = (2 * tm_e * tk_e * 2 + 2 * tk_e * tn_e * 2 + 2 * tn_e * 4
                 + (2 * tm_e * tn_e * 2 if has_res else 0)
                 + (4 * tn_e * 4 if has_ln else 0)
                 + 2 * tm_e * tn_e * out_isz
                 + tm_e * tn_e * 4)

    grid = (Mp // tm_e, Np // tn_e, Kp // tk_e)
    out = pl.pallas_call(
        _make_dense_kernel(act, has_res, has_ln),
        grid=grid,
        in_specs=in_specs,
        out_specs=pl.BlockSpec((tm_e, tn_e), lambda i, j, k: (i, j)),
        out_shape=jax.ShapeDtypeStruct((Mp, Np), out_dtype),
        scratch_shapes=[pltpu.VMEM((tm_e, tn_e), jnp.float32)],
        compiler_params=pltpu.CompilerParams(
            dimension_semantics=("parallel", "parallel", "arbitrary"),
            vmem_limit_bytes=_vmem_limit(footprint)),
    )(*inputs)

    if Mp != M or Np != N:
        out = out[:M, :N]
    return out


# -------------------------- fused FFN (W1 relu W2 + res + LN) ----------------
# Keeps W1/W2 fully resident in VMEM; the (tm, FF) intermediate never hits HBM.

def _ffn_kernel(x_ref, w1_ref, b1_ref, w2_ref, b2_ref, g_ref, bt_ref,
                o_ref, acc_ref, *, n_chunks, chunk):
    x = x_ref[...]                               # (tm, D) bf16
    acc_ref[...] = jnp.zeros_like(acc_ref)
    for c in range(n_chunks):                    # static unroll; chunky MXU matmuls
        lo, hi = c * chunk, (c + 1) * chunk
        h = jnp.dot(x, w1_ref[:, lo:hi], preferred_element_type=jnp.float32)
        h = jnp.maximum(h + b1_ref[:, lo:hi], 0.0)
        acc_ref[...] += jnp.dot(h.astype(jnp.bfloat16), w2_ref[lo:hi, :],
                                preferred_element_type=jnp.float32)
    y = acc_ref[...] + b2_ref[...] + x.astype(jnp.float32)   # residual = layer input
    mu = jnp.mean(y, axis=-1, keepdims=True)
    var = jnp.mean(y * y, axis=-1, keepdims=True) - mu * mu
    y = (y - mu) * lax.rsqrt(var + 1e-5) * g_ref[...] + bt_ref[...]
    o_ref[...] = y.astype(o_ref.dtype)


def ffn(x, w1, b1, w2, b2, *, ln, out_dtype=jnp.bfloat16, tm=512, fc=512):
    M, D = x.shape
    F = w1.shape[1]
    g, beta = ln

    x = x.astype(jnp.bfloat16)
    w1 = w1.astype(jnp.bfloat16)
    w2 = w2.astype(jnp.bfloat16)

    tm_e = _pick_tile(M, tm, 8)
    Mp = _round_up(M, tm_e)
    xp = _pad2(x, (Mp, D))

    fc_e = _pick_tile(F, fc, 128)
    if F % fc_e != 0:
        fc_e = F
    n_chunks = F // fc_e

    footprint = (2 * tm_e * D * 2                 # x tiles (double-buffered)
                 + 2 * D * F * 2 + 2 * F * D * 2  # resident W1, W2
                 + 2 * F * 4 + 6 * D * 4          # biases + LN params
                 + 2 * tm_e * D * jnp.dtype(out_dtype).itemsize
                 + tm_e * D * 4                   # f32 accumulator
                 + 2 * tm_e * fc_e * 4)           # intermediate h chunk headroom

    out = pl.pallas_call(
        functools.partial(_ffn_kernel, n_chunks=n_chunks, chunk=fc_e),
        grid=(Mp // tm_e,),
        in_specs=[
            pl.BlockSpec((tm_e, D), lambda i: (i, 0)),
            pl.BlockSpec((D, F), lambda i: (0, 0)),
            pl.BlockSpec((1, F), lambda i: (0, 0)),
            pl.BlockSpec((F, D), lambda i: (0, 0)),
            pl.BlockSpec((1, D), lambda i: (0, 0)),
            pl.BlockSpec((1, D), lambda i: (0, 0)),
            pl.BlockSpec((1, D), lambda i: (0, 0)),
        ],
        out_specs=pl.BlockSpec((tm_e, D), lambda i: (i, 0)),
        out_shape=jax.ShapeDtypeStruct((Mp, D), out_dtype),
        scratch_shapes=[pltpu.VMEM((tm_e, D), jnp.float32)],
        compiler_params=pltpu.CompilerParams(
            dimension_semantics=("parallel",),
            vmem_limit_bytes=_vmem_limit(footprint)),
    )(xp, w1, b1.reshape(1, F).astype(jnp.float32), w2,
      b2.reshape(1, D).astype(jnp.float32),
      g.reshape(1, D).astype(jnp.float32), beta.reshape(1, D).astype(jnp.float32))

    if Mp != M:
        out = out[:M]
    return out


# ------------------------ ESIM cross attention ------------------------------

def _masked_softmax(x, mask_row):
    # x: (Bb, R, C) f32 logits, mask_row: (Bb, 1, C) f32 — ESIM masked_softmax semantics
    # (logits are multiplied by the mask, not -inf-masked, matching the reference).
    z = x * mask_row
    m = jnp.max(z, axis=-1, keepdims=True)
    e = jnp.exp(z - m)
    p = e / jnp.sum(e, axis=-1, keepdims=True)
    p = p * mask_row
    return p / (jnp.sum(p, axis=-1, keepdims=True) + 1e-13)


def _cross_attn_kernel(p_ref, h_ref, pm_ref, hm_ref, ap_ref, ah_ref):
    p = p_ref[...]          # (Bb, Lp, H) bf16
    h = h_ref[...]          # (Bb, Lh, H) bf16
    pm = pm_ref[...]        # (Bb, 1, Lp) f32
    hm = hm_ref[...]        # (Bb, 1, Lh) f32

    sim = jnp.einsum('bpd,bhd->bph', p, h,
                     preferred_element_type=jnp.float32)     # (Bb, Lp, Lh)
    simT = jnp.transpose(sim, (0, 2, 1))                      # reuse, XLU

    a = _masked_softmax(sim, hm)      # attention over hypothesis tokens
    bm = _masked_softmax(simT, pm)    # attention over premise tokens

    pm_col = jnp.transpose(pm, (0, 2, 1))   # (Bb, Lp, 1) built in-kernel
    hm_col = jnp.transpose(hm, (0, 2, 1))   # (Bb, Lh, 1)
    ap = jnp.einsum('bph,bhd->bpd', a.astype(h.dtype), h,
                    preferred_element_type=jnp.float32) * pm_col
    ah = jnp.einsum('bhp,bpd->bhd', bm.astype(p.dtype), p,
                    preferred_element_type=jnp.float32) * hm_col
    ap_ref[...] = ap.astype(ap_ref.dtype)
    ah_ref[...] = ah.astype(ah_ref.dtype)


def esim_cross_attention(prem, hyp, p_mask_row, h_mask_row):
    B, Lp, H = prem.shape
    Lh = hyp.shape[1]
    bb = _pick_batch_block(B, 8)       # amortize per-step overhead across samples
    in_specs = [
        pl.BlockSpec((bb, Lp, H), lambda b: (b, 0, 0)),
        pl.BlockSpec((bb, Lh, H), lambda b: (b, 0, 0)),
        pl.BlockSpec((bb, 1, Lp), lambda b: (b, 0, 0)),
        pl.BlockSpec((bb, 1, Lh), lambda b: (b, 0, 0)),
    ]
    out_specs = (
        pl.BlockSpec((bb, Lp, H), lambda b: (b, 0, 0)),
        pl.BlockSpec((bb, Lh, H), lambda b: (b, 0, 0)),
    )
    return pl.pallas_call(
        _cross_attn_kernel,
        grid=(B // bb,),
        in_specs=in_specs,
        out_specs=out_specs,
        out_shape=(jax.ShapeDtypeStruct((B, Lp, H), jnp.bfloat16),
                   jax.ShapeDtypeStruct((B, Lh, H), jnp.bfloat16)),
        compiler_params=pltpu.CompilerParams(dimension_semantics=("parallel",)),
    )(prem, hyp, p_mask_row, h_mask_row)


# ------------------------ multi-head self attention --------------------------
# Head split done by XLA (reshape/transpose) so the kernel sees contiguous (L, hd)
# q/k/v blocks; several heads are processed per grid step with batched einsums.
# The 1/sqrt(hd) scale is folded into the QKV projection weights.

def _mha_kernel(q_ref, k_ref, v_ref, o_ref):
    q = q_ref[...]                      # (Hb, L, hd) bf16, pre-scaled
    k = k_ref[...]
    v = v_ref[...]
    s = jnp.einsum('bqd,bkd->bqk', q, k, preferred_element_type=jnp.float32)
    m = jnp.max(s, axis=-1, keepdims=True)
    e = jnp.exp(s - m)
    p = e / jnp.sum(e, axis=-1, keepdims=True)
    o = jnp.einsum('bqk,bkd->bqd', p.astype(v.dtype), v,
                   preferred_element_type=jnp.float32)
    o_ref[...] = o.astype(o_ref.dtype)


def mha(qkv_flat, B, L, D, nhead):
    hd = D // nhead
    # (B*L, 3D) -> (3, B*nhead, L, hd): cheap XLA layout work instead of in-kernel
    # lane-unaligned slicing + concatenation.
    qkv = qkv_flat.reshape(B, L, 3, nhead, hd)
    qkv = jnp.transpose(qkv, (2, 0, 3, 1, 4)).reshape(3, B * nhead, L, hd)
    q, k, v = qkv[0], qkv[1], qkv[2]

    BH = B * nhead
    hb = _pick_batch_block(BH, 8)

    out = pl.pallas_call(
        _mha_kernel,
        grid=(BH // hb,),
        in_specs=[pl.BlockSpec((hb, L, hd), lambda i: (i, 0, 0))] * 3,
        out_specs=pl.BlockSpec((hb, L, hd), lambda i: (i, 0, 0)),
        out_shape=jax.ShapeDtypeStruct((BH, L, hd), jnp.bfloat16),
        compiler_params=pltpu.CompilerParams(dimension_semantics=("parallel",)),
    )(q, k, v)

    out = out.reshape(B, nhead, L, hd).transpose(0, 2, 1, 3).reshape(B * L, D)
    return out


# ------------------------------- pooling ------------------------------------

def _pool_kernel(v_ref, m_ref, avg_ref, max_ref):
    v = v_ref[...].astype(jnp.float32)   # (Bb, L, H)
    m = m_ref[...]                       # (Bb, 1, L) f32, lane-dense
    mc = jnp.transpose(m, (0, 2, 1))     # (Bb, L, 1) built in-kernel
    denom = jnp.sum(m, axis=-1, keepdims=True)                     # (Bb, 1, 1)
    avg_ref[...] = (jnp.sum(v * mc, axis=1, keepdims=True) / denom).astype(avg_ref.dtype)
    mx = jnp.max(v * mc + (1.0 - mc) * (-1e7), axis=1, keepdims=True)
    max_ref[...] = mx.astype(max_ref.dtype)


def masked_pool(v, mask_row):
    B, L, H = v.shape
    bb = _pick_batch_block(B, 8)
    out_spec = pl.BlockSpec((bb, 1, H), lambda b: (b, 0, 0))
    avg, mx = pl.pallas_call(
        _pool_kernel,
        grid=(B // bb,),
        in_specs=[pl.BlockSpec((bb, L, H), lambda b: (b, 0, 0)),
                  pl.BlockSpec((bb, 1, L), lambda b: (b, 0, 0))],
        out_specs=(out_spec, out_spec),
        out_shape=(jax.ShapeDtypeStruct((B, 1, H), jnp.float32),
                   jax.ShapeDtypeStruct((B, 1, H), jnp.float32)),
        compiler_params=pltpu.CompilerParams(dimension_semantics=("parallel",)),
    )(v, mask_row)
    return avg[:, 0, :], mx[:, 0, :]


# ------------------------------ model (glue) -------------------------------

def positional_encoding(max_len, d_model):
    position = jnp.arange(max_len, dtype=jnp.float32)[:, None]
    div_term = jnp.exp(jnp.arange(0, d_model, 2, dtype=jnp.float32)
                       * (-math.log(10000.0) / d_model))
    ang = position * div_term
    pe = jnp.stack([jnp.sin(ang), jnp.cos(ang)], axis=-1).reshape(max_len, d_model)
    return pe


def encoder_layer(x, p, nhead):
    # PyTorch TransformerEncoderLayer, post-norm, relu activation, eval mode.
    B, L, D = x.shape
    xf = x.reshape(B * L, D)

    qkv = dense(xf, p["w_qkv"], p["b_qkv"], out_dtype=jnp.bfloat16)      # fused Q|K|V
    attn = mha(qkv, B, L, D, nhead)                                       # (B*L, D)

    # out-projection fused with residual-add + LayerNorm1
    x1 = dense(attn, p["wo"], p["bo"],
               residual=xf, ln=(p["ln1_g"], p["ln1_b"]), out_dtype=jnp.bfloat16)
    # fused FFN: relu(x1 W1 + b1) W2 + b2 + residual -> LayerNorm2, single kernel
    x2 = ffn(x1, p["w1"], p["b1"], p["w2"], p["b2"],
             ln=(p["ln2_g"], p["ln2_b"]), out_dtype=jnp.bfloat16)
    return x2.reshape(B, L, D)


def composition(x, params, nhead):
    # pos_encoder + transformer_encoder (lengths unused, matching the source).
    L = x.shape[1]
    x = (x.astype(jnp.float32) + params["pe"][:L][None, :, :]).astype(jnp.bfloat16)
    for lp in params["layers"]:
        x = encoder_layer(x, lp, nhead)
    return x


def transformer_esim_forward(params, premises, hypotheses, *, nhead):
    premises = premises[:, :min(128, premises.shape[1]), :]
    hypotheses = hypotheses[:, :min(128, hypotheses.shape[1]), :]
    B, Lp, H = premises.shape
    Lh = hypotheses.shape[1]

    p_mask = (jnp.sum(premises, axis=-1) != 0).astype(jnp.float32)     # 1 - (sum==0)
    h_mask = (jnp.sum(hypotheses, axis=-1) != 0).astype(jnp.float32)
    pm_row = p_mask.reshape(B, 1, Lp)
    hm_row = h_mask.reshape(B, 1, Lh)

    att_p, att_h = esim_cross_attention(premises.astype(jnp.bfloat16),
                                        hypotheses.astype(jnp.bfloat16),
                                        pm_row, hm_row)

    if Lp == Lh:
        # batch the two composition passes into one (2B, L, D) pass
        both = composition(jnp.concatenate([att_p, att_h], axis=0), params, nhead)
        v_ai, v_bj = both[:B], both[B:]
    else:
        v_ai = composition(att_p, params, nhead)
        v_bj = composition(att_h, params, nhead)

    a_avg, a_max = masked_pool(v_ai, pm_row)
    b_avg, b_max = masked_pool(v_bj, hm_row)
    v = jnp.concatenate([a_avg, a_max, b_avg, b_max], axis=1)           # (B, 4H) f32

    # Tiny classifier head: sub-(8,128) blocks -> plain XLA is cheaper than pallas_call.
    adv_logits = jnp.tanh(v @ params["comb_w"] + params["comb_b"])
    logits = adv_logits @ params["cls_w"] + params["cls_b"]
    probabilities = jax.nn.softmax(logits, axis=-1)
    return logits, probabilities, adv_logits


def init_params(key, hidden, ff, nlayers, nclasses, nhead, max_len=128):
    def lin(k, i, o, scale=0.05):
        kw, kb = jax.random.split(k)
        return (scale * jax.random.normal(kw, (i, o), jnp.float32),
                scale * jax.random.normal(kb, (o,), jnp.float32))

    hd = hidden // nhead
    qscale = 1.0 / math.sqrt(hd)        # attention scale folded into the Q projection

    keys = jax.random.split(key, nlayers + 2)
    layers = []
    for l in range(nlayers):
        ks = jax.random.split(keys[l], 6)
        wq, bq = lin(ks[0], hidden, hidden)
        wk, bk = lin(ks[1], hidden, hidden)
        wv, bv = lin(ks[2], hidden, hidden)
        wo, bo = lin(ks[3], hidden, hidden)
        w1, b1 = lin(ks[4], hidden, ff)
        w2, b2 = lin(ks[5], ff, hidden)
        layers.append(dict(
            # fused QKV weight (D, 3D); Q third pre-scaled by 1/sqrt(hd)
            w_qkv=jnp.concatenate([wq * qscale, wk, wv], axis=1).astype(jnp.bfloat16),
            b_qkv=jnp.concatenate([bq * qscale, bk, bv], axis=0),
            wo=wo.astype(jnp.bfloat16), bo=bo,
            ln1_g=jnp.ones((hidden,), jnp.float32), ln1_b=jnp.zeros((hidden,), jnp.float32),
            w1=w1.astype(jnp.bfloat16), b1=b1,
            w2=w2.astype(jnp.bfloat16), b2=b2,
            ln2_g=jnp.ones((hidden,), jnp.float32), ln2_b=jnp.zeros((hidden,), jnp.float32)))
    comb_w, comb_b = lin(keys[nlayers], 4 * hidden, hidden)
    cls_w, cls_b = lin(keys[nlayers + 1], hidden, nclasses)
    return dict(layers=layers,
                comb_w=comb_w, comb_b=comb_b,   # classifier head stays f32 / XLA
                cls_w=cls_w, cls_b=cls_b,
                pe=positional_encoding(max_len, hidden))


if __name__ == "__main__":
    # Small shapes (original: hidden=d_model=384, nhead=8, ff=2048, 6 layers).
    B, Lp, Lh, H = 2, 16, 16, 32
    NHEAD, FF, NLAYERS, NCLASSES = 4, 64, 2, 3

    key = jax.random.PRNGKey(0)
    kp, kh, kparam = jax.random.split(key, 3)
    premises = jax.random.normal(kp, (B, Lp, H), jnp.float32)
    hypotheses = jax.random.normal(kh, (B, Lh, H), jnp.float32)
    # zero-pad some trailing tokens so the padding masks are non-trivial
    p_keep = (jnp.arange(Lp)[None, :, None] < jnp.array([Lp, 11])[:, None, None]).astype(jnp.float32)
    h_keep = (jnp.arange(Lh)[None, :, None] < jnp.array([Lh, 9])[:, None, None]).astype(jnp.float32)
    premises = premises * p_keep
    hypotheses = hypotheses * h_keep

    params = init_params(kparam, H, FF, NLAYERS, NCLASSES, NHEAD)

    fwd = jax.jit(functools.partial(transformer_esim_forward, nhead=NHEAD))
    logits, probs, adv_logits = fwd(params, premises, hypotheses)
    jax.block_until_ready((logits, probs, adv_logits))
    assert logits.shape == (B, NCLASSES) and probs.shape == (B, NCLASSES)
    assert adv_logits.shape == (B, H)
    print("KERNEL_OK")
</pallas_src>

<mosaic_0001>
module attributes {stable_mosaic.version = 11 : i64} {
  func.func @_cross_attn_kernel(%arg0: i32, %arg1: memref<2x16x32xbf16, #tpu.memory_space<vmem>>, %arg2: memref<2x16x32xbf16, #tpu.memory_space<vmem>>, %arg3: memref<2x1x16xf32, #tpu.memory_space<vmem>>, %arg4: memref<2x1x16xf32, #tpu.memory_space<vmem>>, %arg5: memref<2x16x32xbf16, #tpu.memory_space<vmem>>, %arg6: memref<2x16x32xbf16, #tpu.memory_space<vmem>>) attributes {dimension_semantics = [#tpu.dimension_semantics<parallel>], iteration_bounds = array<i64: 1>, scalar_prefetch = 0 : i64, scratch_operands = 0 : i64, tpu.core_type = #tpu.core_type<tc>, window_params = [{transform_indices = @transform_0, window_bounds = array<i64: 2, 16, 32>}, {transform_indices = @transform_1, window_bounds = array<i64: 2, 16, 32>}, {transform_indices = @transform_2, window_bounds = array<i64: 2, 1, 16>}, {transform_indices = @transform_3, window_bounds = array<i64: 2, 1, 16>}, {transform_indices = @transform_4, window_bounds = array<i64: 2, 16, 32>}, {transform_indices = @transform_5, window_bounds = array<i64: 2, 16, 32>}]} {
    %c0 = arith.constant 0 : index
    %c0_0 = arith.constant 0 : index
    %c0_1 = arith.constant 0 : index
    %0 = vector.load %arg1[%c0, %c0_0, %c0_1] : memref<2x16x32xbf16, #tpu.memory_space<vmem>>, vector<2x16x32xbf16>
    %c0_2 = arith.constant 0 : index
    %c0_3 = arith.constant 0 : index
    %c0_4 = arith.constant 0 : index
    %1 = vector.load %arg2[%c0_2, %c0_3, %c0_4] : memref<2x16x32xbf16, #tpu.memory_space<vmem>>, vector<2x16x32xbf16>
    %c0_5 = arith.constant 0 : index
    %c0_6 = arith.constant 0 : index
    %c0_7 = arith.constant 0 : index
    %2 = vector.load %arg3[%c0_5, %c0_6, %c0_7] : memref<2x1x16xf32, #tpu.memory_space<vmem>>, vector<2x1x16xf32>
    %c0_8 = arith.constant 0 : index
    %c0_9 = arith.constant 0 : index
    %c0_10 = arith.constant 0 : index
    %3 = vector.load %arg4[%c0_8, %c0_9, %c0_10] : memref<2x1x16xf32, #tpu.memory_space<vmem>>, vector<2x1x16xf32>
    "tpu.trace_start"() <{level = 10 : i32, message = "bpd,bhd->bph"}> : () -> ()
    %cst = arith.constant dense<0.000000e+00> : vector<2x16x16xf32>
    %4 = tpu.matmul %0, %1, %cst {dimension_numbers = #tpu.dot_dimension_numbers<[2], [2], [1], [1], [0, 0, 0, 1, 1, 1], [0], [0]>} : vector<2x16x32xbf16>, vector<2x16x32xbf16>, vector<2x16x16xf32> -> vector<2x16x16xf32>
    "tpu.trace_stop"() : () -> ()
    %5 = tpu.transpose %4, [0, 2, 1] : vector<2x16x16xf32> -> vector<2x16x16xf32>
    %6 = vector.broadcast %3 : vector<2x1x16xf32> to vector<2x16x16xf32>
    %7 = arith.mulf %4, %6 : vector<2x16x16xf32>
    %cst_11 = arith.constant dense<0xFF800000> : vector<2x16xf32>
    %8 = vector.multi_reduction <maximumf>, %7, %cst_11 [2] : vector<2x16x16xf32> to vector<2x16xf32>
    %9 = vector.shape_cast %8 : vector<2x16xf32> to vector<2x16x1xf32>
    %10 = vector.broadcast %9 : vector<2x16x1xf32> to vector<2x16x16xf32>
    %11 = arith.subf %7, %10 : vector<2x16x16xf32>
    %12 = math.exp %11 : vector<2x16x16xf32>
    %cst_12 = arith.constant dense<0.000000e+00> : vector<2x16xf32>
    %13 = vector.multi_reduction <add>, %12, %cst_12 [2] : vector<2x16x16xf32> to vector<2x16xf32>
    %14 = vector.shape_cast %13 : vector<2x16xf32> to vector<2x16x1xf32>
    %15 = vector.broadcast %14 : vector<2x16x1xf32> to vector<2x16x16xf32>
    %16 = arith.divf %12, %15 : vector<2x16x16xf32>
    %17 = vector.broadcast %3 : vector<2x1x16xf32> to vector<2x16x16xf32>
    %18 = arith.mulf %16, %17 : vector<2x16x16xf32>
    %cst_13 = arith.constant dense<0.000000e+00> : vector<2x16xf32>
    %19 = vector.multi_reduction <add>, %18, %cst_13 [2] : vector<2x16x16xf32> to vector<2x16xf32>
    %20 = vector.shape_cast %19 : vector<2x16xf32> to vector<2x16x1xf32>
    %cst_14 = arith.constant 9.99999982E-14 : f32
    %21 = vector.broadcast %cst_14 : f32 to vector<2x16x1xf32>
    %22 = arith.addf %20, %21 : vector<2x16x1xf32>
    %23 = vector.broadcast %22 : vector<2x16x1xf32> to vector<2x16x16xf32>
    %24 = arith.divf %18, %23 : vector<2x16x16xf32>
    %25 = vector.broadcast %2 : vector<2x1x16xf32> to vector<2x16x16xf32>
    %26 = arith.mulf %5, %25 : vector<2x16x16xf32>
    %cst_15 = arith.constant dense<0xFF800000> : vector<2x16xf32>
    %27 = vector.multi_reduction <maximumf>, %26, %cst_15 [2] : vector<2x16x16xf32> to vector<2x16xf32>
    %28 = vector.shape_cast %27 : vector<2x16xf32> to vector<2x16x1xf32>
    %29 = vector.broadcast %28 : vector<2x16x1xf32> to vector<2x16x16xf32>
    %30 = arith.subf %26, %29 : vector<2x16x16xf32>
    %31 = math.exp %30 : vector<2x16x16xf32>
    %cst_16 = arith.constant dense<0.000000e+00> : vector<2x16xf32>
    %32 = vector.multi_reduction <add>, %31, %cst_16 [2] : vector<2x16x16xf32> to vector<2x16xf32>
    %33 = vector.shape_cast %32 : vector<2x16xf32> to vector<2x16x1xf32>
    %34 = vector.broadcast %33 : vector<2x16x1xf32> to vector<2x16x16xf32>
    %35 = arith.divf %31, %34 : vector<2x16x16xf32>
    %36 = vector.broadcast %2 : vector<2x1x16xf32> to vector<2x16x16xf32>
    %37 = arith.mulf %35, %36 : vector<2x16x16xf32>
    %cst_17 = arith.constant dense<0.000000e+00> : vector<2x16xf32>
    %38 = vector.multi_reduction <add>, %37, %cst_17 [2] : vector<2x16x16xf32> to vector<2x16xf32>
    %39 = vector.shape_cast %38 : vector<2x16xf32> to vector<2x16x1xf32>
    %cst_18 = arith.constant 9.99999982E-14 : f32
    %40 = vector.broadcast %cst_18 : f32 to vector<2x16x1xf32>
    %41 = arith.addf %39, %40 : vector<2x16x1xf32>
    %42 = vector.broadcast %41 : vector<2x16x1xf32> to vector<2x16x16xf32>
    %43 = arith.divf %37, %42 : vector<2x16x16xf32>
    %44 = tpu.transpose %2, [0, 2, 1] : vector<2x1x16xf32> -> vector<2x16x1xf32>
    %45 = tpu.transpose %3, [0, 2, 1] : vector<2x1x16xf32> -> vector<2x16x1xf32>
    %46 = arith.truncf %24 : vector<2x16x16xf32> to vector<2x16x16xbf16>
    "tpu.trace_start"() <{level = 10 : i32, message = "bph,bhd->bpd"}> : () -> ()
    %cst_19 = arith.constant dense<0.000000e+00> : vector<2x16x32xf32>
    %47 = tpu.matmul %46, %1, %cst_19 {dimension_numbers = #tpu.dot_dimension_numbers<[2], [1], [1], [2], [0, 0, 0, 1, 1, 2], [0], [0]>} : vector<2x16x16xbf16>, vector<2x16x32xbf16>, vector<2x16x32xf32> -> vector<2x16x32xf32>
    "tpu.trace_stop"() : () -> ()
    %48 = vector.broadcast %44 : vector<2x16x1xf32> to vector<2x16x32xf32>
    %49 = arith.mulf %47, %48 : vector<2x16x32xf32>
    %50 = arith.truncf %43 : vector<2x16x16xf32> to vector<2x16x16xbf16>
    "tpu.trace_start"() <{level = 10 : i32, message = "bhp,bpd->bhd"}> : () -> ()
    %cst_20 = arith.constant dense<0.000000e+00> : vector<2x16x32xf32>
    %51 = tpu.matmul %50, %0, %cst_20 {dimension_numbers = #tpu.dot_dimension_numbers<[2], [1], [1], [2], [0, 0, 0, 1, 1, 2], [0], [0]>} : vector<2x16x16xbf16>, vector<2x16x32xbf16>, vector<2x16x32xf32> -> vector<2x16x32xf32>
    "tpu.trace_stop"() : () -> ()
    %52 = vector.broadcast %45 : vector<2x16x1xf32> to vector<2x16x32xf32>
    %53 = arith.mulf %51, %52 : vector<2x16x32xf32>
    %54 = arith.truncf %49 : vector<2x16x32xf32> to vector<2x16x32xbf16>
    %c0_21 = arith.constant 0 : index
    %c0_22 = arith.constant 0 : index
    %c0_23 = arith.constant 0 : index
    %55 = vector.load %arg5[%c0_21, %c0_22, %c0_23] : memref<2x16x32xbf16, #tpu.memory_space<vmem>>, vector<2x16x32xbf16>
    tpu.vector_store %arg5[%c0_21, %c0_22, %c0_23], %54 {strides = array<i32>} : memref<2x16x32xbf16, #tpu.memory_space<vmem>>, vector<2x16x32xbf16>,
    %56 = arith.truncf %53 : vector<2x16x32xf32> to vector<2x16x32xbf16>
    %c0_24 = arith.constant 0 : index
    %c0_25 = arith.constant 0 : index
    %c0_26 = arith.constant 0 : index
    %57 = vector.load %arg6[%c0_24, %c0_25, %c0_26] : memref<2x16x32xbf16, #tpu.memory_space<vmem>>, vector<2x16x32xbf16>
    tpu.vector_store %arg6[%c0_24, %c0_25, %c0_26], %56 {strides = array<i32>} : memref<2x16x32xbf16, #tpu.memory_space<vmem>>, vector<2x16x32xbf16>,
    return
  }
  func.func @transform_0(%arg0: i32) -> (i32, i32, i32) {
    %c0_i32 = arith.constant 0 : i32
    %c0_i32_0 = arith.constant 0 : i32
    %c0_i32_1 = arith.constant 0 : i32
    return %arg0, %c0_i32, %c0_i32_0 : i32, i32, i32
  }
  func.func @transform_1(%arg0: i32) -> (i32, i32, i32) {
    %c0_i32 = arith.constant 0 : i32
    %c0_i32_0 = arith.constant 0 : i32
    %c0_i32_1 = arith.constant 0 : i32
    return %arg0, %c0_i32, %c0_i32_0 : i32, i32, i32
  }
  func.func @transform_2(%arg0: i32) -> (i32, i32, i32) {
    %c0_i32 = arith.constant 0 : i32
    %c0_i32_0 = arith.constant 0 : i32
    %c0_i32_1 = arith.constant 0 : i32
    return %arg0, %c0_i32, %c0_i32_0 : i32, i32, i32
  }
  func.func @transform_3(%arg0: i32) -> (i32, i32, i32) {
    %c0_i32 = arith.constant 0 : i32
    %c0_i32_0 = arith.constant 0 : i32
    %c0_i32_1 = arith.constant 0 : i32
    return %arg0, %c0_i32, %c0_i32_0 : i32, i32, i32
  }
  func.func @transform_4(%arg0: i32) -> (i32, i32, i32) {
    %c0_i32 = arith.constant 0 : i32
    %c0_i32_0 = arith.constant 0 : i32
    %c0_i32_1 = arith.constant 0 : i32
    return %arg0, %c0_i32, %c0_i32_0 : i32, i32, i32
  }
  func.func @transform_5(%arg0: i32) -> (i32, i32, i32) {
    %c0_i32 = arith.constant 0 : i32
    %c0_i32_0 = arith.constant 0 : i32
    %c0_i32_1 = arith.constant 0 : i32
    return %arg0, %c0_i32, %c0_i32_0 : i32, i32, i32
  }
}

module attributes {stable_mosaic.version = 11 : i64} {
  func.func @kernel(%arg0: i32, %arg1: i32, %arg2: i32, %arg3: memref<64x32xbf16, #tpu.memory_space<vmem>>, %arg4: memref<32x96xbf16, #tpu.memory_space<vmem>>, %arg5: memref<1x96xf32, #tpu.memory_space<vmem>>, %arg6: memref<64x96xbf16, #tpu.memory_space<vmem>>, %arg7: memref<64x96xf32, #tpu.memory_space<vmem>>) attributes {dimension_semantics = [#tpu.dimension_semantics<parallel>, #tpu.dimension_semantics<parallel>, #tpu.dimension_semantics<arbitrary>], iteration_bounds = array<i64: 1, 1, 1>, scalar_prefetch = 0 : i64, scratch_operands = 1 : i64, tpu.core_type = #tpu.core_type<tc>, window_params = [{transform_indices = @transform_0, window_bounds = array<i64: 64, 32>}, {transform_indices = @transform_1, window_bounds = array<i64: 32, 96>}, {transform_indices = @transform_2, window_bounds = array<i64: 1, 96>}, {transform_indices = @transform_3, window_bounds = array<i64: 64, 96>}]} {
    %c0_i32 = arith.constant 0 : i32
    %0 = arith.cmpi eq, %arg2, %c0_i32 : i32
    %1 = arith.extui %0 : i1 to i32
    %c0_i32_0 = arith.constant 0 : i32
    %2 = arith.cmpi ne, %1, %c0_i32_0 : i32
    scf.if %2 {
      %cst_10 = arith.constant 0.000000e+00 : f32
      %12 = vector.broadcast %cst_10 : f32 to vector<64x96xf32>
      %c0_11 = arith.constant 0 : index
      %c0_12 = arith.constant 0 : index
      %13 = vector.load %arg7[%c0_11, %c0_12] : memref<64x96xf32, #tpu.memory_space<vmem>>, vector<64x96xf32>
      tpu.vector_store %arg7[%c0_11, %c0_12], %12 {strides = array<i32>} : memref<64x96xf32, #tpu.memory_space<vmem>>, vector<64x96xf32>,
    } else {
    }
    %c0 = arith.constant 0 : index
    %c0_1 = arith.constant 0 : index
    %3 = vector.load %arg7[%c0, %c0_1] : memref<64x96xf32, #tpu.memory_space<vmem>>, vector<64x96xf32>
    %c0_2 = arith.constant 0 : index
    %c0_3 = arith.constant 0 : index
    %4 = vector.load %arg3[%c0_2, %c0_3] : memref<64x32xbf16, #tpu.memory_space<vmem>>, vector<64x32xbf16>
    %c0_4 = arith.constant 0 : index
    %c0_5 = arith.constant 0 : index
    %5 = vector.load %arg4[%c0_4, %c0_5] : memref<32x96xbf16, #tpu.memory_space<vmem>>, vector<32x96xbf16>
    %cst = arith.constant dense<0.000000e+00> : vector<64x96xf32>
    %6 = tpu.matmul %4, %5, %cst {dimension_numbers = #tpu.dot_dimension_numbers<[1], [0], [0], [1], [0, 0, 1, 1], [], []>} : vector<64x32xbf16>, vector<32x96xbf16>, vector<64x96xf32> -> vector<64x96xf32>
    %7 = arith.addf %3, %6 : vector<64x96xf32>
    %c0_6 = arith.constant 0 : index
    %c0_7 = arith.constant 0 : index
    %8 = vector.load %arg7[%c0_6, %c0_7] : memref<64x96xf32, #tpu.memory_space<vmem>>, vector<64x96xf32>
    tpu.vector_store %arg7[%c0_6, %c0_7], %7 {strides = array<i32>} : memref<64x96xf32, #tpu.memory_space<vmem>>, vector<64x96xf32>,
    %c0_i32_8 = arith.constant 0 : i32
    %9 = arith.cmpi eq, %arg2, %c0_i32_8 : i32
    %10 = arith.extui %9 : i1 to i32
    %c0_i32_9 = arith.constant 0 : i32
    %11 = arith.cmpi ne, %10, %c0_i32_9 : i32
    scf.if %11 {
      %c0_10 = arith.constant 0 : index
      %c0_11 = arith.constant 0 : index
      %12 = vector.load %arg7[%c0_10, %c0_11] : memref<64x96xf32, #tpu.memory_space<vmem>>, vector<64x96xf32>
      %c0_12 = arith.constant 0 : index
      %c0_13 = arith.constant 0 : index
      %13 = vector.load %arg5[%c0_12, %c0_13] : memref<1x96xf32, #tpu.memory_space<vmem>>, vector<1x96xf32>
      %14 = vector.broadcast %13 : vector<1x96xf32> to vector<64x96xf32>
      %15 = arith.addf %12, %14 : vector<64x96xf32>
      %16 = arith.truncf %15 : vector<64x96xf32> to vector<64x96xbf16>
      %c0_14 = arith.constant 0 : index
      %c0_15 = arith.constant 0 : index
      %17 = vector.load %arg6[%c0_14, %c0_15] : memref<64x96xbf16, #tpu.memory_space<vmem>>, vector<64x96xbf16>
      tpu.vector_store %arg6[%c0_14, %c0_15], %16 {strides = array<i32>} : memref<64x96xbf16, #tpu.memory_space<vmem>>, vector<64x96xbf16>,
    } else {
    }
    return
  }
  func.func @transform_0(%arg0: i32, %arg1: i32, %arg2: i32) -> (i32, i32) {
    %c0_i32 = arith.constant 0 : i32
    return %arg0, %arg2 : i32, i32
  }
  func.func @transform_1(%arg0: i32, %arg1: i32, %arg2: i32) -> (i32, i32) {
    %c0_i32 = arith.constant 0 : i32
    return %arg2, %arg1 : i32, i32
  }
  func.func @transform_2(%arg0: i32, %arg1: i32, %arg2: i32) -> (i32, i32) {
    %c0_i32 = arith.constant 0 : i32
    %c0_i32_0 = arith.constant 0 : i32
    return %c0_i32, %arg1 : i32, i32
  }
  func.func @transform_3(%arg0: i32, %arg1: i32, %arg2: i32) -> (i32, i32) {
    %c0_i32 = arith.constant 0 : i32
    return %arg0, %arg1 : i32, i32
  }
}

module attributes {stable_mosaic.version = 11 : i64} {
  func.func @_mha_kernel(%arg0: i32, %arg1: memref<8x16x8xbf16, #tpu.memory_space<vmem>>, %arg2: memref<8x16x8xbf16, #tpu.memory_space<vmem>>, %arg3: memref<8x16x8xbf16, #tpu.memory_space<vmem>>, %arg4: memref<8x16x8xbf16, #tpu.memory_space<vmem>>) attributes {dimension_semantics = [#tpu.dimension_semantics<parallel>], iteration_bounds = array<i64: 2>, scalar_prefetch = 0 : i64, scratch_operands = 0 : i64, tpu.core_type = #tpu.core_type<tc>, window_params = [{transform_indices = @transform_0, window_bounds = array<i64: 8, 16, 8>}, {transform_indices = @transform_1, window_bounds = array<i64: 8, 16, 8>}, {transform_indices = @transform_2, window_bounds = array<i64: 8, 16, 8>}, {transform_indices = @transform_3, window_bounds = array<i64: 8, 16, 8>}]} {
    %c0 = arith.constant 0 : index
    %c0_0 = arith.constant 0 : index
    %c0_1 = arith.constant 0 : index
    %0 = vector.load %arg1[%c0, %c0_0, %c0_1] : memref<8x16x8xbf16, #tpu.memory_space<vmem>>, vector<8x16x8xbf16>
    %c0_2 = arith.constant 0 : index
    %c0_3 = arith.constant 0 : index
    %c0_4 = arith.constant 0 : index
    %1 = vector.load %arg2[%c0_2, %c0_3, %c0_4] : memref<8x16x8xbf16, #tpu.memory_space<vmem>>, vector<8x16x8xbf16>
    %c0_5 = arith.constant 0 : index
    %c0_6 = arith.constant 0 : index
    %c0_7 = arith.constant 0 : index
    %2 = vector.load %arg3[%c0_5, %c0_6, %c0_7] : memref<8x16x8xbf16, #tpu.memory_space<vmem>>, vector<8x16x8xbf16>
    "tpu.trace_start"() <{level = 10 : i32, message = "bqd,bkd->bqk"}> : () -> ()
    %cst = arith.constant dense<0.000000e+00> : vector<8x16x16xf32>
    %3 = tpu.matmul %0, %1, %cst {dimension_numbers = #tpu.dot_dimension_numbers<[2], [2], [1], [1], [0, 0, 0, 1, 1, 1], [0], [0]>} : vector<8x16x8xbf16>, vector<8x16x8xbf16>, vector<8x16x16xf32> -> vector<8x16x16xf32>
    "tpu.trace_stop"() : () -> ()
    %cst_8 = arith.constant dense<0xFF800000> : vector<8x16xf32>
    %4 = vector.multi_reduction <maximumf>, %3, %cst_8 [2] : vector<8x16x16xf32> to vector<8x16xf32>
    %5 = vector.shape_cast %4 : vector<8x16xf32> to vector<8x16x1xf32>
    %6 = vector.broadcast %5 : vector<8x16x1xf32> to vector<8x16x16xf32>
    %7 = arith.subf %3, %6 : vector<8x16x16xf32>
    %8 = math.exp %7 : vector<8x16x16xf32>
    %cst_9 = arith.constant dense<0.000000e+00> : vector<8x16xf32>
    %9 = vector.multi_reduction <add>, %8, %cst_9 [2] : vector<8x16x16xf32> to vector<8x16xf32>
    %10 = vector.shape_cast %9 : vector<8x16xf32> to vector<8x16x1xf32>
    %11 = vector.broadcast %10 : vector<8x16x1xf32> to vector<8x16x16xf32>
    %12 = arith.divf %8, %11 : vector<8x16x16xf32>
    %13 = arith.truncf %12 : vector<8x16x16xf32> to vector<8x16x16xbf16>
    "tpu.trace_start"() <{level = 10 : i32, message = "bqk,bkd->bqd"}> : () -> ()
    %cst_10 = arith.constant dense<0.000000e+00> : vector<8x16x8xf32>
    %14 = tpu.matmul %13, %2, %cst_10 {dimension_numbers = #tpu.dot_dimension_numbers<[2], [1], [1], [2], [0, 0, 0, 1, 1, 2], [0], [0]>} : vector<8x16x16xbf16>, vector<8x16x8xbf16>, vector<8x16x8xf32> -> vector<8x16x8xf32>
    "tpu.trace_stop"() : () -> ()
    %15 = arith.truncf %14 : vector<8x16x8xf32> to vector<8x16x8xbf16>
    %c0_11 = arith.constant 0 : index
    %c0_12 = arith.constant 0 : index
    %c0_13 = arith.constant 0 : index
    %16 = vector.load %arg4[%c0_11, %c0_12, %c0_13] : memref<8x16x8xbf16, #tpu.memory_space<vmem>>, vector<8x16x8xbf16>
    tpu.vector_store %arg4[%c0_11, %c0_12, %c0_13], %15 {strides = array<i32>} : memref<8x16x8xbf16, #tpu.memory_space<vmem>>, vector<8x16x8xbf16>,
    return
  }
  func.func @transform_0(%arg0: i32) -> (i32, i32, i32) {
    %c0_i32 = arith.constant 0 : i32
    %c0_i32_0 = arith.constant 0 : i32
    %c0_i32_1 = arith.constant 0 : i32
    return %arg0, %c0_i32, %c0_i32_0 : i32, i32, i32
  }
  func.func @transform_1(%arg0: i32) -> (i32, i32, i32) {
    %c0_i32 = arith.constant 0 : i32
    %c0_i32_0 = arith.constant 0 : i32
    %c0_i32_1 = arith.constant 0 : i32
    return %arg0, %c0_i32, %c0_i32_0 : i32, i32, i32
  }
  func.func @transform_2(%arg0: i32) -> (i32, i32, i32) {
    %c0_i32 = arith.constant 0 : i32
    %c0_i32_0 = arith.constant 0 : i32
    %c0_i32_1 = arith.constant 0 : i32
    return %arg0, %c0_i32, %c0_i32_0 : i32, i32, i32
  }
  func.func @transform_3(%arg0: i32) -> (i32, i32, i32) {
    %c0_i32 = arith.constant 0 : i32
    %c0_i32_0 = arith.constant 0 : i32
    %c0_i32_1 = arith.constant 0 : i32
    return %arg0, %c0_i32, %c0_i32_0 : i32, i32, i32
  }
}

module attributes {stable_mosaic.version = 11 : i64} {
  func.func @kernel(%arg0: i32, %arg1: i32, %arg2: i32, %arg3: memref<64x32xbf16, #tpu.memory_space<vmem>>, %arg4: memref<32x32xbf16, #tpu.memory_space<vmem>>, %arg5: memref<1x32xf32, #tpu.memory_space<vmem>>, %arg6: memref<64x32xbf16, #tpu.memory_space<vmem>>, %arg7: memref<1x32xf32, #tpu.memory_space<vmem>>, %arg8: memref<1x32xf32, #tpu.memory_space<vmem>>, %arg9: memref<64x32xbf16, #tpu.memory_space<vmem>>, %arg10: memref<64x32xf32, #tpu.memory_space<vmem>>) attributes {dimension_semantics = [#tpu.dimension_semantics<parallel>, #tpu.dimension_semantics<parallel>, #tpu.dimension_semantics<arbitrary>], iteration_bounds = array<i64: 1, 1, 1>, scalar_prefetch = 0 : i64, scratch_operands = 1 : i64, tpu.core_type = #tpu.core_type<tc>, window_params = [{transform_indices = @transform_0, window_bounds = array<i64: 64, 32>}, {transform_indices = @transform_1, window_bounds = array<i64: 32, 32>}, {transform_indices = @transform_2, window_bounds = array<i64: 1, 32>}, {transform_indices = @transform_3, window_bounds = array<i64: 64, 32>}, {transform_indices = @transform_4, window_bounds = array<i64: 1, 32>}, {transform_indices = @transform_5, window_bounds = array<i64: 1, 32>}, {transform_indices = @transform_6, window_bounds = array<i64: 64, 32>}]} {
    %c0_i32 = arith.constant 0 : i32
    %0 = arith.cmpi eq, %arg2, %c0_i32 : i32
    %1 = arith.extui %0 : i1 to i32
    %c0_i32_0 = arith.constant 0 : i32
    %2 = arith.cmpi ne, %1, %c0_i32_0 : i32
    scf.if %2 {
      %cst_10 = arith.constant 0.000000e+00 : f32
      %12 = vector.broadcast %cst_10 : f32 to vector<64x32xf32>
      %c0_11 = arith.constant 0 : index
      %c0_12 = arith.constant 0 : index
      %13 = vector.load %arg10[%c0_11, %c0_12] : memref<64x32xf32, #tpu.memory_space<vmem>>, vector<64x32xf32>
      tpu.vector_store %arg10[%c0_11, %c0_12], %12 {strides = array<i32>} : memref<64x32xf32, #tpu.memory_space<vmem>>, vector<64x32xf32>,
    } else {
    }
    %c0 = arith.constant 0 : index
    %c0_1 = arith.constant 0 : index
    %3 = vector.load %arg10[%c0, %c0_1] : memref<64x32xf32, #tpu.memory_space<vmem>>, vector<64x32xf32>
    %c0_2 = arith.constant 0 : index
    %c0_3 = arith.constant 0 : index
    %4 = vector.load %arg3[%c0_2, %c0_3] : memref<64x32xbf16, #tpu.memory_space<vmem>>, vector<64x32xbf16>
    %c0_4 = arith.constant 0 : index
    %c0_5 = arith.constant 0 : index
    %5 = vector.load %arg4[%c0_4, %c0_5] : memref<32x32xbf16, #tpu.memory_space<vmem>>, vector<32x32xbf16>
    %cst = arith.constant dense<0.000000e+00> : vector<64x32xf32>
    %6 = tpu.matmul %4, %5, %cst {dimension_numbers = #tpu.dot_dimension_numbers<[1], [0], [0], [1], [0, 0, 1, 1], [], []>} : vector<64x32xbf16>, vector<32x32xbf16>, vector<64x32xf32> -> vector<64x32xf32>
    %7 = arith.addf %3, %6 : vector<64x32xf32>
    %c0_6 = arith.constant 0 : index
    %c0_7 = arith.constant 0 : index
    %8 = vector.load %arg10[%c0_6, %c0_7] : memref<64x32xf32, #tpu.memory_space<vmem>>, vector<64x32xf32>
    tpu.vector_store %arg10[%c0_6, %c0_7], %7 {strides = array<i32>} : memref<64x32xf32, #tpu.memory_space<vmem>>, vector<64x32xf32>,
    %c0_i32_8 = arith.constant 0 : i32
    %9 = arith.cmpi eq, %arg2, %c0_i32_8 : i32
    %10 = arith.extui %9 : i1 to i32
    %c0_i32_9 = arith.constant 0 : i32
    %11 = arith.cmpi ne, %10, %c0_i32_9 : i32
    scf.if %11 {
      %c0_10 = arith.constant 0 : index
      %c0_11 = arith.constant 0 : index
      %12 = vector.load %arg10[%c0_10, %c0_11] : memref<64x32xf32, #tpu.memory_space<vmem>>, vector<64x32xf32>
      %c0_12 = arith.constant 0 : index
      %c0_13 = arith.constant 0 : index
      %13 = vector.load %arg5[%c0_12, %c0_13] : memref<1x32xf32, #tpu.memory_space<vmem>>, vector<1x32xf32>
      %14 = vector.broadcast %13 : vector<1x32xf32> to vector<64x32xf32>
      %15 = arith.addf %12, %14 : vector<64x32xf32>
      %c0_14 = arith.constant 0 : index
      %c0_15 = arith.constant 0 : index
      %16 = vector.load %arg6[%c0_14, %c0_15] : memref<64x32xbf16, #tpu.memory_space<vmem>>, vector<64x32xbf16>
      %17 = arith.extf %16 : vector<64x32xbf16> to vector<64x32xf32>
      %18 = arith.addf %15, %17 : vector<64x32xf32>
      %cst_16 = arith.constant dense<0.000000e+00> : vector<64xf32>
      %19 = vector.multi_reduction <add>, %18, %cst_16 [1] : vector<64x32xf32> to vector<64xf32>
      %20 = vector.shape_cast %19 : vector<64xf32> to vector<64x1xf32>
      %cst_17 = arith.constant 3.200000e+01 : f32
      %21 = vector.broadcast %cst_17 : f32 to vector<64x1xf32>
      %22 = arith.divf %20, %21 : vector<64x1xf32>
      %23 = arith.mulf %18, %18 : vector<64x32xf32>
      %cst_18 = arith.constant dense<0.000000e+00> : vector<64xf32>
      %24 = vector.multi_reduction <add>, %23, %cst_18 [1] : vector<64x32xf32> to vector<64xf32>
      %25 = vector.shape_cast %24 : vector<64xf32> to vector<64x1xf32>
      %cst_19 = arith.constant 3.200000e+01 : f32
      %26 = vector.broadcast %cst_19 : f32 to vector<64x1xf32>
      %27 = arith.divf %25, %26 : vector<64x1xf32>
      %28 = arith.mulf %22, %22 : vector<64x1xf32>
      %29 = arith.subf %27, %28 : vector<64x1xf32>
      %30 = vector.broadcast %22 : vector<64x1xf32> to vector<64x32xf32>
      %31 = arith.subf %18, %30 : vector<64x32xf32>
      %cst_20 = arith.constant 9.99999974E-6 : f32
      %32 = vector.broadcast %cst_20 : f32 to vector<64x1xf32>
      %33 = arith.addf %29, %32 : vector<64x1xf32>
      %34 = math.rsqrt %33 : vector<64x1xf32>
      %35 = vector.broadcast %34 : vector<64x1xf32> to vector<64x32xf32>
      %36 = arith.mulf %31, %35 : vector<64x32xf32>
      %c0_21 = arith.constant 0 : index
      %c0_22 = arith.constant 0 : index
      %37 = vector.load %arg7[%c0_21, %c0_22] : memref<1x32xf32, #tpu.memory_space<vmem>>, vector<1x32xf32>
      %38 = vector.broadcast %37 : vector<1x32xf32> to vector<64x32xf32>
      %39 = arith.mulf %36, %38 : vector<64x32xf32>
      %c0_23 = arith.constant 0 : index
      %c0_24 = arith.constant 0 : index
      %40 = vector.load %arg8[%c0_23, %c0_24] : memref<1x32xf32, #tpu.memory_space<vmem>>, vector<1x32xf32>
      %41 = vector.broadcast %40 : vector<1x32xf32> to vector<64x32xf32>
      %42 = arith.addf %39, %41 : vector<64x32xf32>
      %43 = arith.truncf %42 : vector<64x32xf32> to vector<64x32xbf16>
      %c0_25 = arith.constant 0 : index
      %c0_26 = arith.constant 0 : index
      %44 = vector.load %arg9[%c0_25, %c0_26] : memref<64x32xbf16, #tpu.memory_space<vmem>>, vector<64x32xbf16>
      tpu.vector_store %arg9[%c0_25, %c0_26], %43 {strides = array<i32>} : memref<64x32xbf16, #tpu.memory_space<vmem>>, vector<64x32xbf16>,
    } else {
    }
    return
  }
  func.func @transform_0(%arg0: i32, %arg1: i32, %arg2: i32) -> (i32, i32) {
    %c0_i32 = arith.constant 0 : i32
    return %arg0, %arg2 : i32, i32
  }
  func.func @transform_1(%arg0: i32, %arg1: i32, %arg2: i32) -> (i32, i32) {
    %c0_i32 = arith.constant 0 : i32
    return %arg2, %arg1 : i32, i32
  }
  func.func @transform_2(%arg0: i32, %arg1: i32, %arg2: i32) -> (i32, i32) {
    %c0_i32 = arith.constant 0 : i32
    %c0_i32_0 = arith.constant 0 : i32
    return %c0_i32, %arg1 : i32, i32
  }
  func.func @transform_3(%arg0: i32, %arg1: i32, %arg2: i32) -> (i32, i32) {
    %c0_i32 = arith.constant 0 : i32
    return %arg0, %arg1 : i32, i32
  }
  func.func @transform_4(%arg0: i32, %arg1: i32, %arg2: i32) -> (i32, i32) {
    %c0_i32 = arith.constant 0 : i32
    %c0_i32_0 = arith.constant 0 : i32
    return %c0_i32, %arg1 : i32, i32
  }
  func.func @transform_5(%arg0: i32, %arg1: i32, %arg2: i32) -> (i32, i32) {
    %c0_i32 = arith.constant 0 : i32
    %c0_i32_0 = arith.constant 0 : i32
    return %c0_i32, %arg1 : i32, i32
  }
  func.func @transform_6(%arg0: i32, %arg1: i32, %arg2: i32) -> (i32, i32) {
    %c0_i32 = arith.constant 0 : i32
    return %arg0, %arg1 : i32, i32
  }
}

module attributes {stable_mosaic.version = 11 : i64} {
  func.func @_ffn_kernel(%arg0: i32, %arg1: memref<64x32xbf16, #tpu.memory_space<vmem>>, %arg2: memref<32x64xbf16, #tpu.memory_space<vmem>>, %arg3: memref<1x64xf32, #tpu.memory_space<vmem>>, %arg4: memref<64x32xbf16, #tpu.memory_space<vmem>>, %arg5: memref<1x32xf32, #tpu.memory_space<vmem>>, %arg6: memref<1x32xf32, #tpu.memory_space<vmem>>, %arg7: memref<1x32xf32, #tpu.memory_space<vmem>>, %arg8: memref<64x32xbf16, #tpu.memory_space<vmem>>, %arg9: memref<64x32xf32, #tpu.memory_space<vmem>>) attributes {dimension_semantics = [#tpu.dimension_semantics<parallel>], iteration_bounds = array<i64: 1>, scalar_prefetch = 0 : i64, scratch_operands = 1 : i64, tpu.core_type = #tpu.core_type<tc>, window_params = [{transform_indices = @transform_0, window_bounds = array<i64: 64, 32>}, {pipeline_mode = #tpu.pipeline_mode<synchronous>, transform_indices = @transform_1, window_bounds = array<i64: 32, 64>}, {pipeline_mode = #tpu.pipeline_mode<synchronous>, transform_indices = @transform_2, window_bounds = array<i64: 1, 64>}, {pipeline_mode = #tpu.pipeline_mode<synchronous>, transform_indices = @transform_3, window_bounds = array<i64: 64, 32>}, {pipeline_mode = #tpu.pipeline_mode<synchronous>, transform_indices = @transform_4, window_bounds = array<i64: 1, 32>}, {pipeline_mode = #tpu.pipeline_mode<synchronous>, transform_indices = @transform_5, window_bounds = array<i64: 1, 32>}, {pipeline_mode = #tpu.pipeline_mode<synchronous>, transform_indices = @transform_6, window_bounds = array<i64: 1, 32>}, {transform_indices = @transform_7, window_bounds = array<i64: 64, 32>}]} {
    %c0 = arith.constant 0 : index
    %c0_0 = arith.constant 0 : index
    %0 = vector.load %arg1[%c0, %c0_0] : memref<64x32xbf16, #tpu.memory_space<vmem>>, vector<64x32xbf16>
    %cst = arith.constant 0.000000e+00 : f32
    %1 = vector.broadcast %cst : f32 to vector<64x32xf32>
    %c0_1 = arith.constant 0 : index
    %c0_2 = arith.constant 0 : index
    %2 = vector.load %arg9[%c0_1, %c0_2] : memref<64x32xf32, #tpu.memory_space<vmem>>, vector<64x32xf32>
    tpu.vector_store %arg9[%c0_1, %c0_2], %1 {strides = array<i32>} : memref<64x32xf32, #tpu.memory_space<vmem>>, vector<64x32xf32>,
    %c0_3 = arith.constant 0 : index
    %c0_4 = arith.constant 0 : index
    %3 = vector.load %arg2[%c0_3, %c0_4] : memref<32x64xbf16, #tpu.memory_space<vmem>>, vector<32x64xbf16>
    %cst_5 = arith.constant dense<0.000000e+00> : vector<64x64xf32>
    %4 = tpu.matmul %0, %3, %cst_5 {dimension_numbers = #tpu.dot_dimension_numbers<[1], [0], [0], [1], [0, 0, 1, 1], [], []>} : vector<64x32xbf16>, vector<32x64xbf16>, vector<64x64xf32> -> vector<64x64xf32>
    %c0_6 = arith.constant 0 : index
    %c0_7 = arith.constant 0 : index
    %5 = vector.load %arg3[%c0_6, %c0_7] : memref<1x64xf32, #tpu.memory_space<vmem>>, vector<1x64xf32>
    %6 = vector.broadcast %5 : vector<1x64xf32> to vector<64x64xf32>
    %7 = arith.addf %4, %6 : vector<64x64xf32>
    %cst_8 = arith.constant 0.000000e+00 : f32
    %8 = vector.broadcast %cst_8 : f32 to vector<64x64xf32>
    %9 = arith.maximumf %7, %8 : vector<64x64xf32>
    %c0_9 = arith.constant 0 : index
    %c0_10 = arith.constant 0 : index
    %10 = vector.load %arg9[%c0_9, %c0_10] : memref<64x32xf32, #tpu.memory_space<vmem>>, vector<64x32xf32>
    %11 = arith.truncf %9 : vector<64x64xf32> to vector<64x64xbf16>
    %c0_11 = arith.constant 0 : index
    %c0_12 = arith.constant 0 : index
    %12 = vector.load %arg4[%c0_11, %c0_12] : memref<64x32xbf16, #tpu.memory_space<vmem>>, vector<64x32xbf16>
    %cst_13 = arith.constant dense<0.000000e+00> : vector<64x32xf32>
    %13 = tpu.matmul %11, %12, %cst_13 {dimension_numbers = #tpu.dot_dimension_numbers<[1], [0], [0], [1], [0, 0, 1, 1], [], []>} : vector<64x64xbf16>, vector<64x32xbf16>, vector<64x32xf32> -> vector<64x32xf32>
    %14 = arith.addf %10, %13 : vector<64x32xf32>
    %c0_14 = arith.constant 0 : index
    %c0_15 = arith.constant 0 : index
    %15 = vector.load %arg9[%c0_14, %c0_15] : memref<64x32xf32, #tpu.memory_space<vmem>>, vector<64x32xf32>
    tpu.vector_store %arg9[%c0_14, %c0_15], %14 {strides = array<i32>} : memref<64x32xf32, #tpu.memory_space<vmem>>, vector<64x32xf32>,
    %c0_16 = arith.constant 0 : index
    %c0_17 = arith.constant 0 : index
    %16 = vector.load %arg9[%c0_16, %c0_17] : memref<64x32xf32, #tpu.memory_space<vmem>>, vector<64x32xf32>
    %c0_18 = arith.constant 0 : index
    %c0_19 = arith.constant 0 : index
    %17 = vector.load %arg5[%c0_18, %c0_19] : memref<1x32xf32, #tpu.memory_space<vmem>>, vector<1x32xf32>
    %18 = vector.broadcast %17 : vector<1x32xf32> to vector<64x32xf32>
    %19 = arith.addf %16, %18 : vector<64x32xf32>
    %20 = arith.extf %0 : vector<64x32xbf16> to vector<64x32xf32>
    %21 = arith.addf %19, %20 : vector<64x32xf32>
    %cst_20 = arith.constant dense<0.000000e+00> : vector<64xf32>
    %22 = vector.multi_reduction <add>, %21, %cst_20 [1] : vector<64x32xf32> to vector<64xf32>
    %23 = vector.shape_cast %22 : vector<64xf32> to vector<64x1xf32>
    %cst_21 = arith.constant 3.200000e+01 : f32
    %24 = vector.broadcast %cst_21 : f32 to vector<64x1xf32>
    %25 = arith.divf %23, %24 : vector<64x1xf32>
    %26 = arith.mulf %21, %21 : vector<64x32xf32>
    %cst_22 = arith.constant dense<0.000000e+00> : vector<64xf32>
    %27 = vector.multi_reduction <add>, %26, %cst_22 [1] : vector<64x32xf32> to vector<64xf32>
    %28 = vector.shape_cast %27 : vector<64xf32> to vector<64x1xf32>
    %cst_23 = arith.constant 3.200000e+01 : f32
    %29 = vector.broadcast %cst_23 : f32 to vector<64x1xf32>
    %30 = arith.divf %28, %29 : vector<64x1xf32>
    %31 = arith.mulf %25, %25 : vector<64x1xf32>
    %32 = arith.subf %30, %31 : vector<64x1xf32>
    %33 = vector.broadcast %25 : vector<64x1xf32> to vector<64x32xf32>
    %34 = arith.subf %21, %33 : vector<64x32xf32>
    %cst_24 = arith.constant 9.99999974E-6 : f32
    %35 = vector.broadcast %cst_24 : f32 to vector<64x1xf32>
    %36 = arith.addf %32, %35 : vector<64x1xf32>
    %37 = math.rsqrt %36 : vector<64x1xf32>
    %38 = vector.broadcast %37 : vector<64x1xf32> to vector<64x32xf32>
    %39 = arith.mulf %34, %38 : vector<64x32xf32>
    %c0_25 = arith.constant 0 : index
    %c0_26 = arith.constant 0 : index
    %40 = vector.load %arg6[%c0_25, %c0_26] : memref<1x32xf32, #tpu.memory_space<vmem>>, vector<1x32xf32>
    %41 = vector.broadcast %40 : vector<1x32xf32> to vector<64x32xf32>
    %42 = arith.mulf %39, %41 : vector<64x32xf32>
    %c0_27 = arith.constant 0 : index
    %c0_28 = arith.constant 0 : index
    %43 = vector.load %arg7[%c0_27, %c0_28] : memref<1x32xf32, #tpu.memory_space<vmem>>, vector<1x32xf32>
    %44 = vector.broadcast %43 : vector<1x32xf32> to vector<64x32xf32>
    %45 = arith.addf %42, %44 : vector<64x32xf32>
    %46 = arith.truncf %45 : vector<64x32xf32> to vector<64x32xbf16>
    %c0_29 = arith.constant 0 : index
    %c0_30 = arith.constant 0 : index
    %47 = vector.load %arg8[%c0_29, %c0_30] : memref<64x32xbf16, #tpu.memory_space<vmem>>, vector<64x32xbf16>
    tpu.vector_store %arg8[%c0_29, %c0_30], %46 {strides = array<i32>} : memref<64x32xbf16, #tpu.memory_space<vmem>>, vector<64x32xbf16>,
    return
  }
  func.func @transform_0(%arg0: i32) -> (i32, i32) {
    %c0_i32 = arith.constant 0 : i32
    %c0_i32_0 = arith.constant 0 : i32
    return %arg0, %c0_i32 : i32, i32
  }
  func.func @transform_1(%arg0: i32) -> (i32, i32) {
    %c0_i32 = arith.constant 0 : i32
    %c0_i32_0 = arith.constant 0 : i32
    %c0_i32_1 = arith.constant 0 : i32
    return %c0_i32, %c0_i32_0 : i32, i32
  }
  func.func @transform_2(%arg0: i32) -> (i32, i32) {
    %c0_i32 = arith.constant 0 : i32
    %c0_i32_0 = arith.constant 0 : i32
    %c0_i32_1 = arith.constant 0 : i32
    return %c0_i32, %c0_i32_0 : i32, i32
  }
  func.func @transform_3(%arg0: i32) -> (i32, i32) {
    %c0_i32 = arith.constant 0 : i32
    %c0_i32_0 = arith.constant 0 : i32
    %c0_i32_1 = arith.constant 0 : i32
    return %c0_i32, %c0_i32_0 : i32, i32
  }
  func.func @transform_4(%arg0: i32) -> (i32, i32) {
    %c0_i32 = arith.constant 0 : i32
    %c0_i32_0 = arith.constant 0 : i32
    %c0_i32_1 = arith.constant 0 : i32
    return %c0_i32, %c0_i32_0 : i32, i32
  }
  func.func @transform_5(%arg0: i32) -> (i32, i32) {
    %c0_i32 = arith.constant 0 : i32
    %c0_i32_0 = arith.constant 0 : i32
    %c0_i32_1 = arith.constant 0 : i32
    return %c0_i32, %c0_i32_0 : i32, i32
  }
  func.func @transform_6(%arg0: i32) -> (i32, i32) {
    %c0_i32 = arith.constant 0 : i32
    %c0_i32_0 = arith.constant 0 : i32
    %c0_i32_1 = arith.constant 0 : i32
    return %c0_i32, %c0_i32_0 : i32, i32
  }
  func.func @transform_7(%arg0: i32) -> (i32, i32) {
    %c0_i32 = arith.constant 0 : i32
    %c0_i32_0 = arith.constant 0 : i32
    return %arg0, %c0_i32 : i32, i32
  }
}

module attributes {stable_mosaic.version = 11 : i64} {
  func.func @_pool_kernel(%arg0: i32, %arg1: memref<2x16x32xbf16, #tpu.memory_space<vmem>>, %arg2: memref<2x1x16xf32, #tpu.memory_space<vmem>>, %arg3: memref<2x1x32xf32, #tpu.memory_space<vmem>>, %arg4: memref<2x1x32xf32, #tpu.memory_space<vmem>>) attributes {dimension_semantics = [#tpu.dimension_semantics<parallel>], iteration_bounds = array<i64: 1>, scalar_prefetch = 0 : i64, scratch_operands = 0 : i64, tpu.core_type = #tpu.core_type<tc>, window_params = [{transform_indices = @transform_0, window_bounds = array<i64: 2, 16, 32>}, {transform_indices = @transform_1, window_bounds = array<i64: 2, 1, 16>}, {transform_indices = @transform_2, window_bounds = array<i64: 2, 1, 32>}, {transform_indices = @transform_3, window_bounds = array<i64: 2, 1, 32>}]} {
    %c0 = arith.constant 0 : index
    %c0_0 = arith.constant 0 : index
    %c0_1 = arith.constant 0 : index
    %0 = vector.load %arg1[%c0, %c0_0, %c0_1] : memref<2x16x32xbf16, #tpu.memory_space<vmem>>, vector<2x16x32xbf16>
    %1 = arith.extf %0 : vector<2x16x32xbf16> to vector<2x16x32xf32>
    %c0_2 = arith.constant 0 : index
    %c0_3 = arith.constant 0 : index
    %c0_4 = arith.constant 0 : index
    %2 = vector.load %arg2[%c0_2, %c0_3, %c0_4] : memref<2x1x16xf32, #tpu.memory_space<vmem>>, vector<2x1x16xf32>
    %3 = tpu.transpose %2, [0, 2, 1] : vector<2x1x16xf32> -> vector<2x16x1xf32>
    %cst = arith.constant dense<0.000000e+00> : vector<2x1xf32>
    %4 = vector.multi_reduction <add>, %2, %cst [2] : vector<2x1x16xf32> to vector<2x1xf32>
    %5 = vector.shape_cast %4 : vector<2x1xf32> to vector<2x1x1xf32>
    %6 = vector.broadcast %3 : vector<2x16x1xf32> to vector<2x16x32xf32>
    %7 = arith.mulf %1, %6 : vector<2x16x32xf32>
    %cst_5 = arith.constant dense<0.000000e+00> : vector<2x32xf32>
    %8 = vector.multi_reduction <add>, %7, %cst_5 [1] : vector<2x16x32xf32> to vector<2x32xf32>
    %9 = vector.shape_cast %8 : vector<2x32xf32> to vector<2x1x32xf32>
    %10 = vector.broadcast %5 : vector<2x1x1xf32> to vector<2x1x32xf32>
    %11 = arith.divf %9, %10 : vector<2x1x32xf32>
    %c0_6 = arith.constant 0 : index
    %c0_7 = arith.constant 0 : index
    %c0_8 = arith.constant 0 : index
    %12 = vector.load %arg3[%c0_6, %c0_7, %c0_8] : memref<2x1x32xf32, #tpu.memory_space<vmem>>, vector<2x1x32xf32>
    tpu.vector_store %arg3[%c0_6, %c0_7, %c0_8], %11 {strides = array<i32>} : memref<2x1x32xf32, #tpu.memory_space<vmem>>, vector<2x1x32xf32>,
    %13 = vector.broadcast %3 : vector<2x16x1xf32> to vector<2x16x32xf32>
    %14 = arith.mulf %1, %13 : vector<2x16x32xf32>
    %cst_9 = arith.constant 1.000000e+00 : f32
    %15 = vector.broadcast %cst_9 : f32 to vector<2x16x1xf32>
    %16 = arith.subf %15, %3 : vector<2x16x1xf32>
    %cst_10 = arith.constant -1.000000e+07 : f32
    %17 = vector.broadcast %cst_10 : f32 to vector<2x16x1xf32>
    %18 = arith.mulf %16, %17 : vector<2x16x1xf32>
    %19 = vector.broadcast %18 : vector<2x16x1xf32> to vector<2x16x32xf32>
    %20 = arith.addf %14, %19 : vector<2x16x32xf32>
    %cst_11 = arith.constant dense<0xFF800000> : vector<2x32xf32>
    %21 = vector.multi_reduction <maximumf>, %20, %cst_11 [1] : vector<2x16x32xf32> to vector<2x32xf32>
    %22 = vector.shape_cast %21 : vector<2x32xf32> to vector<2x1x32xf32>
    %c0_12 = arith.constant 0 : index
    %c0_13 = arith.constant 0 : index
    %c0_14 = arith.constant 0 : index
    %23 = vector.load %arg4[%c0_12, %c0_13, %c0_14] : memref<2x1x32xf32, #tpu.memory_space<vmem>>, vector<2x1x32xf32>
    tpu.vector_store %arg4[%c0_12, %c0_13, %c0_14], %22 {strides = array<i32>} : memref<2x1x32xf32, #tpu.memory_space<vmem>>, vector<2x1x32xf32>,
    return
  }
  func.func @transform_0(%arg0: i32) -> (i32, i32, i32) {
    %c0_i32 = arith.constant 0 : i32
    %c0_i32_0 = arith.constant 0 : i32
    %c0_i32_1 = arith.constant 0 : i32
    return %arg0, %c0_i32, %c0_i32_0 : i32, i32, i32
  }
  func.func @transform_1(%arg0: i32) -> (i32, i32, i32) {
    %c0_i32 = arith.constant 0 : i32
    %c0_i32_0 = arith.constant 0 : i32
    %c0_i32_1 = arith.constant 0 : i32
    return %arg0, %c0_i32, %c0_i32_0 : i32, i32, i32
  }
  func.func @transform_2(%arg0: i32) -> (i32, i32, i32) {
    %c0_i32 = arith.constant 0 : i32
    %c0_i32_0 = arith.constant 0 : i32
    %c0_i32_1 = arith.constant 0 : i32
    return %arg0, %c0_i32, %c0_i32_0 : i32, i32, i32
  }
  func.func @transform_3(%arg0: i32) -> (i32, i32, i32) {
    %c0_i32 = arith.constant 0 : i32
    %c0_i32_0 = arith.constant 0 : i32
    %c0_i32_1 = arith.constant 0 : i32
    return %arg0, %c0_i32, %c0_i32_0 : i32, i32, i32
  }
}

</mosaic_0001>

<bundles_post_ra>
// kernel: transformer_esim_forward.12
= control target key start
LH: loop header
LB: loop body
LE: loop exit
PB: predicated region body
PF: predicated region fallthrough
CT: control target
= control target key end

     0   :  { %vm19_vm0 = vcmask 785408   ;;  %v302_v1 = vmov 0.0   ;;  %vm80_vm1 = vcmask 261120   ;;  %vm233_vm2 = vcmask 781312   ;;  %s392_s1 = inlined_call_operand.vmem [shape: bf16[32,96], index: 1, kind: input, shape index: {}]   ;;  %s393_s0 = inlined_call_operand.vmem [shape: bf16[64,32], index: 0, kind: input, shape index: {}]   ;;  %s394_s2 = inlined_call_operand.vmem [shape: f32[1,96], index: 2, kind: input, shape index: {}]   ;;  %s395_s3 = inlined_call_operand.vmem [shape: bf16[64,96], index: 3, kind: output, shape index: {}]  }
   0x1   :  { %v296_v0 = vld [vmem:[%s392_s1] sm:$0xff]   ;;  %22 = vst.msk [vmem:[#allocation2 + $0x10] sm:$0xff] %vm19_vm0, %v302_v1  ;;  %20 = vst.msk [vmem:[#allocation2] sm:$0xff] %vm19_vm0, %v302_v1  ;;  %v297_v2 = vld [vmem:[%s392_s1 + $0x8] sm:$0xff]  }
   0x2   :  { %21 = vst.msk [vmem:[#allocation2 + $0x8] sm:$0xff] %vm19_vm0, %v302_v1  ;;  %23 = vst.msk [vmem:[#allocation2 + $0x18] sm:$0xff] %vm19_vm0, %v302_v1  ;;  %279 = vmatprep.subr.bf16.mxu0 %v296_v0  ;;  %291 = vmatprep.subr.bf16.mxu1 %v296_v0  ;;  %v298_v3 = vld [vmem:[%s393_s0] sm:$0xff]   ;;  %v299_v4 = vld [vmem:[%s393_s0 + $0x10] sm:$0xff]  }
   0x3   :  { %24 = vst.msk [vmem:[#allocation2 + $0x20] sm:$0xff] %vm19_vm0, %v302_v1  ;;  %25 = vst.msk [vmem:[#allocation2 + $0x28] sm:$0xff] %vm19_vm0, %v302_v1  ;;  %280 = vmatpush3.bf16.msra.mxu0 %v296_v0  ;;  %293 = vmatpush3.bf16.msra.mxu1 %v296_v0  ;;  %v300_v5 = vld [vmem:[%s393_s0 + $0x8] sm:$0xff]   ;;  %v301_v6 = vld [vmem:[%s393_s0 + $0x18] sm:$0xff]  }
   0x4   :  { %26 = vst.msk [vmem:[#allocation2 + $0x30] sm:$0xff] %vm19_vm0, %v302_v1  ;;  %27 = vst.msk [vmem:[#allocation2 + $0x38] sm:$0xff] %vm19_vm0, %v302_v1  ;;  %281 = vmatprep.subr.bf16.mxu0 %v297_v2  ;;  %292 = vmatprep.subr.bf16.mxu1 %v297_v2  ;;  %v256_v31 = vld [vmem:[%s394_s2] ss:$0 sm:$0xff] }
   0x5   :  { %283 = vmatprep.mubr.msk.bf16.mxu0 %vm80_vm1, %v298_v3  ;;  %287 = vmatprep.mubr.msk.bf16.mxu1 %vm80_vm1, %v299_v4 }
   0x7   :  { %282 = vmatpush3.bf16.msra.mxu0 %v297_v2  ;;  %294 = vmatpush3.bf16.msra.mxu1 %v297_v2 }
   0x8   :  { %v30_v7 = vld [vmem:[#allocation2 + $0x10] sm:$0xff]  ;;  %v28_v9 = vld [vmem:[#allocation2] sm:$0xff] }
   0x9   :  { %v31_v13 = vld [vmem:[#allocation2 + $0x18] sm:$0xff]  ;;  %v29_v19 = vld [vmem:[#allocation2 + $0x8] sm:$0xff] }
   0xa   :  { %284 = vmatmul.mubr.msk.bf16.vlgmr.msra.gmra.mrb[0].mxu0 %vm80_vm1, %v300_v5  ;;  %288 = vmatmul.mubr.msk.bf16.vlgmr.msra.gmra.mrb[0].mxu1 %vm80_vm1, %v301_v6  ;;  %v32_v10 = vld [vmem:[#allocation2 + $0x20] sm:$0xff]  ;;  %v33_v20 = vld [vmem:[#allocation2 + $0x28] sm:$0xff] }
   0xb   :  { %v34_v8 = vld [vmem:[#allocation2 + $0x30] sm:$0xff]  ;;  %v35_v14 = vld [vmem:[#allocation2 + $0x38] sm:$0xff] }
  0xdd   :  { %v285_v11 = vpop.f32.mrb[0].mxu0  ;;  %v289_v12 = vpop.f32.mrb[0].mxu1 }
  0xde   :  { %v160_v15 = vadd.f32 %v285_v11, %v30_v7  ;;  %v164_v16 = vadd.f32 %v289_v12, %v34_v8  ;;  %v127_v17 = vpop.f32.mrb[1].mxu0  ;;  %v143_v18 = vpop.f32.mrb[1].mxu1 }
  0xdf   :  { %v158_v21 = vadd.f32 %v127_v17, %v28_v9  ;;  %v162_v22 = vadd.f32 %v143_v18, %v32_v10  ;;  %v286_v23 = vpop.f32.mrb[2].mxu0  ;;  %v290_v24 = vpop.f32.mrb[2].mxu1 }
  0xe0   :  { %169 = vst.msk [vmem:[#allocation2 + $0x10] sm:$0xff] %vm19_vm0, %v160_v15  ;;  %173 = vst.msk [vmem:[#allocation2 + $0x30] sm:$0xff] %vm19_vm0, %v164_v16  ;;  %v161_v25 = vadd.f32 %v286_v23, %v31_v13  ;;  %v165_v26 = vadd.f32 %v290_v24, %v35_v14  ;;  %v130_v27 = vpop.f32.mrb[3].mxu0  ;;  %v146_v28 = vpop.f32.mrb[3].mxu1 }
  0xe1   :  { %167 = vst.msk [vmem:[#allocation2] sm:$0xff] %vm19_vm0, %v158_v21  ;;  %171 = vst.msk [vmem:[#allocation2 + $0x20] sm:$0xff] %vm19_vm0, %v162_v22  ;;  %v159_v29 = vadd.f32 %v130_v27, %v29_v19  ;;  %v163_v30 = vadd.f32 %v146_v28, %v33_v20 }
  0xe2   :  { %170 = vst.msk [vmem:[#allocation2 + $0x18] sm:$0xff] %vm19_vm0, %v161_v25  ;;  %174 = vst.msk [vmem:[#allocation2 + $0x38] sm:$0xff] %vm19_vm0, %v165_v26 }
  0xe3   :  { %168 = vst.msk [vmem:[#allocation2 + $0x8] sm:$0xff] %vm19_vm0, %v159_v29  ;;  %172 = vst.msk [vmem:[#allocation2 + $0x28] sm:$0xff] %vm19_vm0, %v163_v30 }
  0xe7   :  { %v180_v32 = vld [vmem:[#allocation2 + $0x10] sm:$0xff] }
  0xe8   :  { %v184_v33 = vld [vmem:[#allocation2 + $0x30] sm:$0xff]  ;;  %v195_v34 = vadd.f32 %v256_v31, %v180_v32  ;;  %v178_v36 = vld [vmem:[#allocation2] sm:$0xff] }
  0xe9   :  { %v199_v35 = vadd.f32 %v256_v31, %v184_v33  ;;  %v182_v37 = vld [vmem:[#allocation2 + $0x20] sm:$0xff]  ;;  %v193_v38 = vadd.f32 %v256_v31, %v178_v36  ;;  %v181_v40 = vld [vmem:[#allocation2 + $0x18] sm:$0xff] }
  0xea   :  { %v197_v39 = vadd.f32 %v256_v31, %v182_v37  ;;  %v185_v41 = vld [vmem:[#allocation2 + $0x38] sm:$0xff]  ;;  %v267_v42 = vpack.c.bf16 %v195_v34, %v195_v34  ;;  %v196_v44 = vadd.f32 %v256_v31, %v181_v40  ;;  %v179_v46 = vld [vmem:[#allocation2 + $0x8] sm:$0xff] }
  0xeb   :  { %v271_v43 = vpack.c.bf16 %v199_v35, %v199_v35  ;;  %v200_v45 = vadd.f32 %v256_v31, %v185_v41  ;;  %v183_v47 = vld [vmem:[#allocation2 + $0x28] sm:$0xff]  ;;  %v265_v48 = vpack.c.bf16 %v193_v38, %v193_v38  ;;  %v194_v50 = vadd.f32 %v256_v31, %v179_v46 }
  0xec   :  { %v269_v49 = vpack.c.bf16 %v197_v39, %v197_v39  ;;  %v198_v51 = vadd.f32 %v256_v31, %v183_v47  ;;  %236 = vst.msk [vmem:[%s395_s3 + $0x8] sm:$0xf] %vm233_vm2, %v267_v42  ;;  %v268_v52 = vpack.c.bf16 %v196_v44, %v196_v44 }
  0xed   :  { %240 = vst.msk [vmem:[%s395_s3 + $0x18] sm:$0xf] %vm233_vm2, %v271_v43  ;;  %v272_v53 = vpack.c.bf16 %v200_v45, %v200_v45  ;;  %234 = vst.msk [vmem:[%s395_s3] sm:$0xf] %vm233_vm2, %v265_v48  ;;  %v266_v54 = vpack.c.bf16 %v194_v50, %v194_v50 }
  0xee   :  { %238 = vst.msk [vmem:[%s395_s3 + $0x10] sm:$0xf] %vm233_vm2, %v269_v49  ;;  %v270_v55 = vpack.c.bf16 %v198_v51, %v198_v51  ;;  %237 = vst.msk [vmem:[%s395_s3 + $0xc] sm:$0xf] %vm233_vm2, %v268_v52 }
  0xef   :  { %241 = vst.msk [vmem:[%s395_s3 + $0x1c] sm:$0xf] %vm233_vm2, %v272_v53  ;;  %235 = vst.msk [vmem:[%s395_s3 + $0x4] sm:$0xf] %vm233_vm2, %v266_v54 }
  0xf0   :  { %239 = vst.msk [vmem:[%s395_s3 + $0x14] sm:$0xf] %vm233_vm2, %v270_v55 }

// kernel: transformer_esim_forward.11
= control target key start
LH: loop header
LB: loop body
LE: loop exit
PB: predicated region body
PF: predicated region fallthrough
CT: control target
= control target key end

     0   :  { %vm42_vm0 = vcmask 261120   ;;  %v928_v0 = vmov 0.0   ;;  %vm929_vm1 = vmmov 0   ;;  %v213_v7 = vlaneseq  ;;  %s1131_s1 = inlined_call_operand.vmem [shape: bf16[2,16,32], index: 1, kind: input, shape index: {}]   ;;  %s1132_s0 = inlined_call_operand.vmem [shape: bf16[2,16,32], index: 0, kind: input, shape index: {}]   ;;  %s1133_s3 = inlined_call_operand.vmem [shape: f32[2,1,16], index: 3, kind: input, shape index: {}]   ;;  %s1134_s2 = inlined_call_operand.vmem [shape: f32[2,1,16], index: 2, kind: input, shape index: {}]   ;;  %s1135_s4 = inlined_call_operand.vmem [shape: bf16[2,16,32], index: 4, kind: output, shape index: {0}]   ;;  %s1136_s5 = inlined_call_operand.vmem [shape: bf16[2,16,32], index: 5, kind: output, shape index: {1}]  }
   0x1   :  { %835 = vmatprep.subr.bf16.mxu0 %v928_v0  ;;  %841 = vmatprep.subr.bf16.mxu1 %v928_v0  ;;  %v876_v1 = vld [vmem:[%s1131_s1] sm:$0xff]   ;;  %v877_v2 = vld [vmem:[%s1131_s1 + $0x8] sm:$0xff]   ;;  %vm227_vm2 = vcmask 130048   ;;  %vm764_vm3 = vcmask 257024  }
   0x2   :  { %837 = vmatprep.mubr.msk.bf16.mxu0 %vm929_vm1, %v928_v0  ;;  %843 = vmatprep.mubr.msk.bf16.mxu1 %vm929_vm1, %v928_v0  ;;  %v47_v3 = vsel %vm42_vm0, %v876_v1, 0  ;;  %v104_v4 = vsel %vm42_vm0, %v877_v2, 0  ;;  %v980_v5 = vld [vmem:[%s1132_s0] sm:$0xff]   ;;  %v985_v6 = vld [vmem:[%s1132_s0 + $0x8] sm:$0xff]   ;;  %v214_v8 = vshrl.u32 %v213_v7, 7 }
   0x3   :  { %836 = vmatpush3.bf16.xpose.msra.mxu0 %v47_v3  ;;  %842 = vmatpush3.bf16.xpose.msra.mxu1 %v104_v4  ;;  %v1000_v10 = vld [vmem:[%s1133_s3] sm:$0x1]  ;;  %v1005_v11 = vld [vmem:[%s1133_s3 + $0x1] sm:$0x1] }
   0x4   :  { %847 = vmatprep.subr.bf16.mxu0 %v928_v0  ;;  %853 = vmatprep.subr.bf16.mxu1 %v928_v0  ;;  %v215_v9 = vsub.s32 0, %v214_v8  ;;  %v1024_v33 = vld [vmem:[%s1134_s2] sm:$0x1]  ;;  %v1033_v40 = vld [vmem:[%s1134_s2 + $0x1] sm:$0x1] }
   0x6   :  { %v1008_v12 = vrot.slane %v1000_v10, %v215_v9  ;;  %v1011_v13 = vrot.slane %v1005_v11, %v215_v9  ;;  %v1027_v36 = vrot.slane %v1024_v33, %v215_v9  ;;  %v1037_v43 = vrot.slane %v1033_v40, %v215_v9 }
   0xa   :  { %838 = vmatmul.mubr.msk.bf16.vlgmr.msra.gmra.mrb[0].mxu0 %vm42_vm0, %v980_v5  ;;  %844 = vmatmul.mubr.msk.bf16.vlgmr.msra.gmra.mrb[0].mxu1 %vm42_vm0, %v985_v6 }
   0xb   :  { %848 = vmatpush3.bf16.msra.mxu0 %v876_v1  ;;  %849 = vmatprep.mubr.msk.bf16.mxu0 %vm929_vm1, %v928_v0 }
   0xc   :  { %854 = vmatpush3.bf16.msra.mxu1 %v877_v2  ;;  %855 = vmatprep.mubr.msk.bf16.mxu1 %vm929_vm1, %v928_v0 }
   0xd   :  { %859 = vmatprep.subr.bf16.mxu0 %v928_v0  ;;  %865 = vmatprep.subr.bf16.mxu1 %v928_v0 }
  0xdd   :  { %v83_v14 = vpop.f32.mrb[0].mxu0  ;;  %v140_v15 = vpop.f32.mrb[0].mxu1 }
  0xde   :  { %v839_v16 = vpop.f32.mrb[1].mxu0  ;;  %v223_v17 = vmul.f32 %v1008_v12, %v83_v14  ;;  %v845_v18 = vpop.f32.mrb[1].mxu1  ;;  %v225_v20 = vmul.f32 %v1011_v13, %v140_v15 }
  0xdf   :  { %v86_v19 = vpop.f32.mrb[2].mxu0  ;;  %v143_v21 = vpop.f32.mrb[2].mxu1 }
  0xe0   :  { %v840_v22 = vpop.f32.mrb[3].mxu0  ;;  %v228_v23 = vsel %vm227_vm2, %v223_v17, -inf  ;;  %v846_v24 = vpop.f32.mrb[3].mxu1  ;;  %v234_v25 = vsel %vm227_vm2, %v225_v20, -inf  ;;  %v224_v26 = vmul.f32 %v1008_v12, %v86_v19  ;;  %v226_v27 = vmul.f32 %v1011_v13, %v143_v21 }
  0xe1   :  { %229 = vmax.xlane.f32.xlu0 %v228_v23  ;;  %235 = vmax.xlane.f32.xlu1 %v234_v25 }
  0xe2   :  { %v231_v28 = vsel %vm227_vm2, %v224_v26, -inf  ;;  %v237_v29 = vsel %vm227_vm2, %v226_v27, -inf }
 0x10e   :  { %147 = vxpose.xlu0.b32.start [1/2] (short) (narrow) %v83_v14, 16 }
 0x112   :  { %148 = vxpose.xlu0.b32.end [2/2] (short) (narrow) %v86_v19, 16 }
 0x114   :  { %179 = vxpose.xlu1.b32.start [1/2] (short) (narrow) %v140_v15, 16 }
 0x118   :  { %180 = vxpose.xlu1.b32.end [2/2] (short) (narrow) %v143_v21, 16 }
 0x13f   :  { %232 = vmax.xlane.f32.xlu1 %v231_v28 }
 0x143   :  { %238 = vmax.xlane.f32.xlu1 %v237_v29 }
 0x16e   :  { %v230_v30 = vpop.xlane.xlu0 %229  ;;  %v236_v32 = vpop.xlane.xlu1 %235 }
 0x16f   :  { %v240_v31 = vsub.f32 %v223_v17, %v230_v30  ;;  %v242_v34 = vsub.f32 %v225_v20, %v236_v32 }
 0x171   :  { %v244_v35 = vmul.f32 1.442695, %v240_v31  ;;  %v248_v38 = vmul.f32 1.442695, %v242_v34 }
 0x173   :  { %880 = vpow2.f32 %v244_v35 }
 0x174   :  { %882 = vpow2.f32 %v248_v38 }
 0x17d   :  { %v881_v49 = vpop.eup %880 }
 0x17e   :  { %v252_v52 = vsel %vm227_vm2, %v881_v49, 0.0  ;;  %v883_v54 = vpop.eup %882 }
 0x17f   :  { %v258_v55 = vsel %vm227_vm2, %v883_v54, 0.0 }
 0x18e   :  { %v163_v37 = vpop.trf.xlu0 }
 0x18f   :  { %v312_v39 = vmul.f32 %v1027_v36, %v163_v37 }
 0x191   :  { %v316_v41 = vsel %vm227_vm2, %v312_v39, -inf }
 0x192   :  { %317 = vmax.xlane.f32.xlu0 %v316_v41  ;;  %v164_v42 = vpop.trf.xlu0 }
 0x193   :  { %v313_v44 = vmul.f32 %v1027_v36, %v164_v42 }
 0x194   :  { %v195_v45 = vpop.trf.xlu1 }
 0x195   :  { %v319_v46 = vsel %vm227_vm2, %v313_v44, -inf  ;;  %v314_v47 = vmul.f32 %v1037_v43, %v195_v45 }
 0x196   :  { %320 = vmax.xlane.f32.xlu1 %v319_v46 }
 0x197   :  { %v322_v48 = vsel %vm227_vm2, %v314_v47, -inf }
 0x198   :  { %v196_v50 = vpop.trf.xlu1  ;;  %323 = vmax.xlane.f32.xlu0 %v322_v48 }
 0x199   :  { %v315_v51 = vmul.f32 %v1037_v43, %v196_v50 }
 0x19b   :  { %v325_v53 = vsel %vm227_vm2, %v315_v51, -inf }
 0x19c   :  { %253 = vadd.xlane.f32.xlu0 %v252_v52  ;;  %326 = vmax.xlane.f32.xlu1 %v325_v53 }
 0x1a0   :  { %259 = vadd.xlane.f32.xlu0 %v258_v55 }
 0x1cc   :  { %v233_v56 = vpop.xlane.xlu1 %232 }
 0x1cd   :  { %v241_v57 = vsub.f32 %v224_v26, %v233_v56 }
 0x1cf   :  { %v246_v58 = vmul.f32 1.442695, %v241_v57 }
 0x1d0   :  { %v239_v59 = vpop.xlane.xlu1 %238 }
 0x1d1   :  { %884 = vpow2.f32 %v246_v58  ;;  %v243_v60 = vsub.f32 %v226_v27, %v239_v59 }
 0x1d3   :  { %v250_v61 = vmul.f32 1.442695, %v243_v60 }
 0x1d5   :  { %886 = vpow2.f32 %v250_v61 }
 0x1db   :  { %v885_v62 = vpop.eup %884 }
 0x1dc   :  { %v255_v63 = vsel %vm227_vm2, %v885_v62, 0.0 }
 0x1dd   :  { %256 = vadd.xlane.f32.xlu1 %v255_v63 }
 0x1df   :  { %v887_v1 = vpop.eup %886 }
 0x1e0   :  { %v261_v2 = vsel %vm227_vm2, %v887_v1, 0.0 }
 0x1e1   :  { %262 = vadd.xlane.f32.xlu1 %v261_v2 }
 0x21f   :  { %v318_v3 = vpop.xlane.xlu0 %317 }
 0x220   :  { %v328_v4 = vsub.f32 %v312_v39, %v318_v3 }
 0x222   :  { %v332_v7 = vmul.f32 1.442695, %v328_v4 }
 0x223   :  { %v321_v8 = vpop.xlane.xlu1 %320 }
 0x224   :  { %888 = vpow2.f32 %v332_v7  ;;  %v329_v9 = vsub.f32 %v313_v44, %v321_v8 }
 0x225   :  { %v324_v15 = vpop.xlane.xlu0 %323 }
 0x226   :  { %v334_v14 = vmul.f32 1.442695, %v329_v9  ;;  %v330_v16 = vsub.f32 %v314_v47, %v324_v15 }
 0x228   :  { %890 = vpow2.f32 %v334_v14  ;;  %v336_v17 = vmul.f32 1.442695, %v330_v16 }
 0x229   :  { %v254_v18 = vpop.xlane.xlu0 %253  ;;  %v327_v19 = vpop.xlane.xlu1 %326 }
 0x22a   :  { %892 = vpow2.f32 %v336_v17  ;;  %v331_v20 = vsub.f32 %v315_v51, %v327_v19 }
 0x22b   :  { %894 = vrcp.f32 %v254_v18 }
 0x22c   :  { %v338_v21 = vmul.f32 1.442695, %v331_v20 }
 0x22d   :  { %v260_v23 = vpop.xlane.xlu0 %259 }
 0x22e   :  { %v889_v22 = vpop.eup %888  ;;  %896 = vpow2.f32 %v338_v21 }
 0x22f   :  { %v340_v24 = vsel %vm227_vm2, %v889_v22, 0.0  ;;  %898 = vrcp.f32 %v260_v23 }
 0x230   :  { %341 = vadd.xlane.f32.xlu0 %v340_v24 }
 0x232   :  { %v891_v25 = vpop.eup %890 }
 0x233   :  { %v343_v26 = vsel %vm227_vm2, %v891_v25, 0.0 }
 0x234   :  { %344 = vadd.xlane.f32.xlu1 %v343_v26  ;;  %v893_v27 = vpop.eup %892 }
 0x235   :  { %v895_v28 = vpop.eup %894  ;;  %v346_v29 = vsel %vm227_vm2, %v893_v27, 0.0 }
 0x236   :  { %347 = vadd.xlane.f32.xlu0 %v346_v29  ;;  %v265_v30 = vmul.f32 %v895_v28, %v881_v49 }
 0x238   :  { %v897_v31 = vpop.eup %896  ;;  %v1053_v32 = vmul.f32 %v265_v30, %v1008_v12 }
 0x239   :  { %v899_v34 = vpop.eup %898  ;;  %v349_v35 = vsel %vm227_vm2, %v897_v31, 0.0 }
 0x23a   :  { %v276_v37 = vsel %vm227_vm2, %v1053_v32, 0.0  ;;  %350 = vadd.xlane.f32.xlu1 %v349_v35  ;;  %v269_v38 = vmul.f32 %v899_v34, %v883_v54 }
 0x23b   :  { %277 = vadd.xlane.f32.xlu0 %v276_v37 }
 0x23c   :  { %v1059_v39 = vmul.f32 %v269_v38, %v1011_v13 }
 0x23e   :  { %v282_v41 = vsel %vm227_vm2, %v1059_v39, 0.0 }
 0x23f   :  { %283 = vadd.xlane.f32.xlu0 %v282_v41 }
 0x26a   :  { %v257_v42 = vpop.xlane.xlu1 %256 }
 0x26b   :  { %900 = vrcp.f32 %v257_v42 }
 0x26e   :  { %v263_v44 = vpop.xlane.xlu1 %262 }
 0x26f   :  { %902 = vrcp.f32 %v263_v44 }
 0x275   :  { %v901_v45 = vpop.eup %900 }
 0x276   :  { %v267_v46 = vmul.f32 %v901_v45, %v885_v62 }
 0x278   :  { %v273_v47 = vmul.f32 %v267_v46, %v1008_v12 }
 0x279   :  { %v903_v48 = vpop.eup %902 }
 0x27a   :  { %v279_v49 = vsel %vm227_vm2, %v273_v47, 0.0  ;;  %v271_v50 = vmul.f32 %v903_v48, %v887_v1 }
 0x27b   :  { %280 = vadd.xlane.f32.xlu1 %v279_v49 }
 0x27c   :  { %v275_v51 = vmul.f32 %v271_v50, %v1011_v13 }
 0x27e   :  { %v285_v52 = vsel %vm227_vm2, %v275_v51, 0.0 }
 0x27f   :  { %286 = vadd.xlane.f32.xlu1 %v285_v52 }
 0x2bd   :  { %v342_v53 = vpop.xlane.xlu0 %341 }
 0x2be   :  { %904 = vrcp.f32 %v342_v53 }
 0x2c1   :  { %v345_v54 = vpop.xlane.xlu1 %344 }
 0x2c2   :  { %906 = vrcp.f32 %v345_v54 }
 0x2c3   :  { %v348_v55 = vpop.xlane.xlu0 %347 }
 0x2c4   :  { %908 = vrcp.f32 %v348_v55 }
 0x2c7   :  { %v351_v57 = vpop.xlane.xlu1 %350 }
 0x2c8   :  { %v905_v56 = vpop.eup %904  ;;  %910 = vrcp.f32 %v351_v57  ;;  %v278_v14 = vpop.xlane.xlu0 %277 }
 0x2c9   :  { %v353_v12 = vmul.f32 %v905_v56, %v889_v22 }
 0x2cb   :  { %v1068_v58 = vmul.f32 %v353_v12, %v1027_v36 }
 0x2cc   :  { %v907_v59 = vpop.eup %906  ;;  %v284_v15 = vpop.xlane.xlu0 %283 }
 0x2cd   :  { %v364_v13 = vsel %vm227_vm2, %v1068_v58, 0.0  ;;  %v355_v60 = vmul.f32 %v907_v59, %v891_v25  ;;  %v290_v17 = vadd.f32 1e-13, %v284_v15 }
 0x2ce   :  { %365 = vadd.xlane.f32.xlu0 %v364_v13  ;;  %v909_v61 = vpop.eup %908 }
 0x2cf   :  { %v361_v62 = vmul.f32 %v355_v60, %v1027_v36  ;;  %v357_v63 = vmul.f32 %v909_v61, %v893_v27  ;;  %v288_v36 = vadd.f32 1e-13, %v278_v14 }
 0x2d1   :  { %v367_v1 = vsel %vm227_vm2, %v361_v62, 0.0  ;;  %v1075_v2 = vmul.f32 %v357_v63, %v1037_v43  ;;  %912 = vrcp.f32 %v288_v36 }
 0x2d2   :  { %368 = vadd.xlane.f32.xlu1 %v367_v1  ;;  %v911_v3 = vpop.eup %910 }
 0x2d3   :  { %v370_v4 = vsel %vm227_vm2, %v1075_v2, 0.0  ;;  %v359_v7 = vmul.f32 %v911_v3, %v897_v31 }
 0x2d4   :  { %371 = vadd.xlane.f32.xlu0 %v370_v4 }
 0x2d5   :  { %v363_v8 = vmul.f32 %v359_v7, %v1037_v43 }
 0x2d7   :  { %v373_v9 = vsel %vm227_vm2, %v363_v8, 0.0 }
 0x2d8   :  { %374 = vadd.xlane.f32.xlu1 %v373_v9 }
 0x2db   :  { %v913_v20 = vpop.eup %912 }
 0x301   :  { %388 = vxpose.xlu0.b32.start.end [1/1] (short) (narrow) %v1024_v33, 16  ;;  %v293_v33 = vmul.f32 %v913_v20, %v1053_v32 }
 0x306   :  { %452 = vxpose.xlu0.b32.start.end [1/1] (short) (narrow) %v1000_v10, 16 }
 0x308   :  { %v281_v16 = vpop.xlane.xlu1 %280 }
 0x309   :  { %v289_v18 = vadd.f32 1e-13, %v281_v16 }
 0x30b   :  { %914 = vrcp.f32 %v289_v18  ;;  %420 = vxpose.xlu1.b32.start.end [1/1] (short) (narrow) %v1033_v40, 16  ;;  %484 = vxpose.xlu0.b32.start.end [1/1] (short) (narrow) %v1005_v11, 16  ;;  %v930_v40 = vmov 0  }
 0x30c   :  { %v287_v43 = vpop.xlane.xlu1 %286  ;;  %916 = vrcp.f32 %v290_v17 }
 0x30d   :  { %v291_v19 = vadd.f32 1e-13, %v287_v43 }
 0x30f   :  { %918 = vrcp.f32 %v291_v19 }
 0x315   :  { %v915_v21 = vpop.eup %914 }
 0x316   :  { %v295_v22 = vmul.f32 %v915_v21, %v273_v47  ;;  %v917_v23 = vpop.eup %916 }
 0x317   :  { %v297_v25 = vmul.f32 %v917_v23, %v1059_v39 }
 0x318   :  { %v516_v10 = vpack.c.bf16 %v295_v22, %v293_v33 }
 0x319   :  { %v919_v24 = vpop.eup %918 }
 0x31a   :  { %v299_v26 = vmul.f32 %v919_v24, %v275_v51  ;;  %850 = vmatmul.mubr.msk.bf16.vlgmr.msra.gmra.mrb[4].mxu0 %vm227_vm2, %v516_v10 }
 0x31b   :  { %860 = vmatpush3.bf16.msra.mxu0 %v980_v5  ;;  %861 = vmatprep.mubr.msk.bf16.mxu0 %vm929_vm1, %v928_v0 }
 0x31c   :  { %v517_v11 = vpack.c.bf16 %v299_v26, %v297_v25 }
 0x31e   :  { %856 = vmatmul.mubr.msk.bf16.vlgmr.msra.gmra.mrb[4].mxu1 %vm227_vm2, %v517_v11 }
 0x31f   :  { %866 = vmatpush3.bf16.msra.mxu1 %v985_v6  ;;  %867 = vmatprep.mubr.msk.bf16.mxu1 %vm929_vm1, %v928_v0 }
 0x329   :  { %874 = vset.pattern.permute.xlu1 %v930_v40 }
 0x334   :  { %875 = vset.pattern.permute.xlu0 %v930_v40 }
 0x35b   :  { %v366_v27 = vpop.xlane.xlu0 %365 }
 0x35c   :  { %v376_v28 = vadd.f32 1e-13, %v366_v27 }
 0x35e   :  { %920 = vrcp.f32 %v376_v28 }
 0x35f   :  { %v369_v29 = vpop.xlane.xlu1 %368 }
 0x360   :  { %v377_v30 = vadd.f32 1e-13, %v369_v29 }
 0x361   :  { %v372_v5 = vpop.xlane.xlu0 %371 }
 0x362   :  { %922 = vrcp.f32 %v377_v30  ;;  %v378_v31 = vadd.f32 1e-13, %v372_v5 }
 0x364   :  { %924 = vrcp.f32 %v378_v31 }
 0x365   :  { %v375_v32 = vpop.xlane.xlu1 %374 }
 0x366   :  { %v379_v34 = vadd.f32 1e-13, %v375_v32 }
 0x368   :  { %926 = vrcp.f32 %v379_v34  ;;  %v921_v35 = vpop.eup %920 }
 0x369   :  { %v381_v37 = vmul.f32 %v921_v35, %v1068_v58 }
 0x36c   :  { %v923_v6 = vpop.eup %922 }
 0x36d   :  { %v383_v0 = vmul.f32 %v923_v6, %v361_v62 }
 0x36e   :  { %v925_v39 = vpop.eup %924 }
 0x36f   :  { %v632_v38 = vpack.c.bf16 %v383_v0, %v381_v37  ;;  %v385_v42 = vmul.f32 %v925_v39, %v1075_v2 }
 0x371   :  { %862 = vmatmul.mubr.msk.bf16.vlgmr.msra.gmra.mrb[8].mxu0 %vm227_vm2, %v632_v38 }
 0x372   :  { %v927_v41 = vpop.eup %926 }
 0x373   :  { %v387_v44 = vmul.f32 %v927_v41, %v363_v8 }
 0x375   :  { %v633_v45 = vpack.c.bf16 %v387_v44, %v385_v42 }
 0x377   :  { %868 = vmatmul.mubr.msk.bf16.vlgmr.msra.gmra.mrb[8].mxu1 %vm227_vm2, %v633_v45 }
 0x381   :  { %v404_v46 = vpop.trf.xlu0 }
 0x382   :  { %610 = vperm.xlu1 %874, %v404_v46  }
 0x385   :  { %v405_v47 = vpop.trf.xlu0 }
 0x386   :  { %615 = vperm.xlu0 %875, %v405_v47  }
 0x389   :  { %v468_v48 = vpop.trf.xlu0 }
 0x38b   :  { %v436_v49 = vpop.trf.xlu1 }
 0x38c   :  { %620 = vperm.xlu1 %874, %v436_v49  }
 0x38d   :  { %v469_v50 = vpop.trf.xlu0 }
 0x38f   :  { %v437_v51 = vpop.trf.xlu1 }
 0x390   :  { %625 = vperm.xlu1 %874, %v437_v51  }
 0x391   :  { %v500_v52 = vpop.trf.xlu0 }
 0x392   :  { %736 = vperm.xlu0 %875, %v500_v52  }
 0x394   :  { %726 = vperm.xlu1 %874, %v468_v48  }
 0x395   :  { %v501_v53 = vpop.trf.xlu0 }
 0x398   :  { %731 = vperm.xlu1 %874, %v469_v50  }
 0x39c   :  { %741 = vperm.xlu1 %874, %v501_v53  }
 0x3ed   :  { %v556_v54 = vpop.f32.mrb[4].mxu0 }
 0x3ee   :  { %v851_v55 = vpop.f32.mrb[5].mxu0 }
 0x3ef   :  { %v559_v56 = vpop.f32.mrb[6].mxu0 }
 0x3f0   :  { %v852_v57 = vpop.f32.mrb[7].mxu0 }
 0x3f1   :  { %v601_v12 = vpop.f32.mrb[4].mxu1 }
 0x3f2   :  { %v857_v58 = vpop.f32.mrb[5].mxu1 }
 0x3f3   :  { %v604_v59 = vpop.f32.mrb[6].mxu1 }
 0x3f4   :  { %v858_v13 = vpop.f32.mrb[7].mxu1 }
 0x401   :  { %v611_v60 = vpop.permute.xlu1 %610 }
 0x402   :  { %v628_v61 = vmul.f32 %v611_v60, %v556_v54 }
 0x404   :  { %v815_v62 = vpack.c.bf16 %v628_v61, %v628_v61 }
 0x405   :  { %v616_v63 = vpop.permute.xlu0 %615 }
 0x406   :  { %765 = vst.msk [vmem:[%s1135_s4] sm:$0xf] %vm764_vm3, %v815_v62  ;;  %v629_v1 = vmul.f32 %v616_v63, %v559_v56 }
 0x408   :  { %v816_v2 = vpack.c.bf16 %v629_v1, %v629_v1 }
 0x40a   :  { %766 = vst.msk [vmem:[%s1135_s4 + $0x4] sm:$0xf] %vm764_vm3, %v816_v2 }
 0x40b   :  { %v621_v3 = vpop.permute.xlu1 %620 }
 0x40c   :  { %v630_v4 = vmul.f32 %v621_v3, %v601_v12 }
 0x40e   :  { %v817_v7 = vpack.c.bf16 %v630_v4, %v630_v4 }
 0x40f   :  { %v626_v8 = vpop.permute.xlu1 %625 }
 0x410   :  { %767 = vst.msk [vmem:[%s1135_s4 + $0x8] sm:$0xf] %vm764_vm3, %v817_v7  ;;  %v631_v9 = vmul.f32 %v626_v8, %v604_v59 }
 0x411   :  { %v737_v22 = vpop.permute.xlu0 %736 }
 0x412   :  { %v818_v14 = vpack.c.bf16 %v631_v9, %v631_v9 }
 0x413   :  { %v727_v36 = vpop.permute.xlu1 %726 }
 0x414   :  { %768 = vst.msk [vmem:[%s1135_s4 + $0xc] sm:$0xf] %vm764_vm3, %v818_v14 }
 0x417   :  { %v732_v18 = vpop.permute.xlu1 %731 }
 0x41b   :  { %v742_v25 = vpop.permute.xlu1 %741 }
 0x444   :  { %v672_v15 = vpop.f32.mrb[8].mxu0 }
 0x445   :  { %v744_v16 = vmul.f32 %v727_v36, %v672_v15  ;;  %v863_v17 = vpop.f32.mrb[9].mxu0 }
 0x446   :  { %v675_v43 = vpop.f32.mrb[10].mxu0 }
 0x447   :  { %v819_v19 = vpack.c.bf16 %v744_v16, %v744_v16  ;;  %v745_v20 = vmul.f32 %v732_v18, %v675_v43  ;;  %v864_v21 = vpop.f32.mrb[11].mxu0 }
 0x449   :  { %785 = vst.msk [vmem:[%s1136_s5] sm:$0xf] %vm764_vm3, %v819_v19  ;;  %v820_v33 = vpack.c.bf16 %v745_v20, %v745_v20 }
 0x44a   :  { %v717_v23 = vpop.f32.mrb[8].mxu1 }
 0x44b   :  { %786 = vst.msk [vmem:[%s1136_s5 + $0x4] sm:$0xf] %vm764_vm3, %v820_v33  ;;  %v746_v10 = vmul.f32 %v737_v22, %v717_v23  ;;  %v869_v24 = vpop.f32.mrb[9].mxu1 }
 0x44c   :  { %v720_v26 = vpop.f32.mrb[10].mxu1 }
 0x44d   :  { %v821_v11 = vpack.c.bf16 %v746_v10, %v746_v10  ;;  %v747_v40 = vmul.f32 %v742_v25, %v720_v26  ;;  %v870_v27 = vpop.f32.mrb[11].mxu1 }
 0x44f   :  { %787 = vst.msk [vmem:[%s1136_s5 + $0x8] sm:$0xf] %vm764_vm3, %v821_v11  ;;  %v822_v28 = vpack.c.bf16 %v747_v40, %v747_v40 }
 0x451   :  { %788 = vst.msk [vmem:[%s1136_s5 + $0xc] sm:$0xf] %vm764_vm3, %v822_v28 }

// kernel: transformer_esim_forward.13
= control target key start
LH: loop header
LB: loop body
LE: loop exit
PB: predicated region body
PF: predicated region fallthrough
CT: control target
= control target key end

     0   :  { %s1834_s12 = smov 0   ;;  %s2159_s0 = inlined_call_operand.vmem [shape: bf16[16,16,8], index: 0, kind: input, shape index: {}]   ;;  %s2160_s1 = inlined_call_operand.vmem [shape: bf16[16,16,8], index: 1, kind: input, shape index: {}]   ;;  %s2161_s2 = inlined_call_operand.vmem [shape: bf16[16,16,8], index: 2, kind: input, shape index: {}]   ;;  %s2162_s3 = inlined_call_operand.vmem [shape: bf16[16,16,8], index: 3, kind: output, shape index: {}]  }
   0x1 LB: > { %s1483_s13 = sadd.s32 4294967295, %s1810_s12   ;;  %p1487_p0 = scmp.ge.s32.totalorder %s1810_s12, 1  ;;  %s1810_s12 = sphi %s1834_s12, %s13_s12  }
   0x2   : > { %p163_p1 = scmp.lt.s32.totalorder %s1810_s12, 3 }
   0x4   : > { %p164_p2 = pnand %p1487_p0, %p163_p1 }
   0x5   : > { %s1488_s14 = sshll.u32 (!%p164_p2), %s1483_s13, 3  ;;  %v1812_v0 = vmov (!%p164_p2), 0.0   ;;  %vm1813_vm0 = vmmov (!%p164_p2), 0   ;;  %vm288_vm1 = vcmask (!%p164_p2), 64512   ;;  %vm735_vm2 = vcmask (!%p164_p2), 130048  }
   0x6   : > { %167 = sbr.rel (%p164_p2) target bundleno = 802 (0x322), region = 32  ;;  %1610 = vmatprep.subr.bf16.mxu0 (!%p164_p2), %v1812_v0  ;;  %1616 = vmatprep.subr.bf16.mxu1 (!%p164_p2), %v1812_v0  ;;  %p202_p3 = scmp.lt.s32.totalorder (!%p164_p2), %s1488_s14, 15  ;;  %vm1384_vm3 = vcmask (!%p164_p2), 60416  }
   0x7   : > { %1612 = vmatprep.mubr.msk.bf16.mxu0 (!%p164_p2), %vm1813_vm0, %v1812_v0  ;;  %1618 = vmatprep.mubr.msk.bf16.mxu1 (!%p164_p2), %vm1813_vm0, %v1812_v0 }
   0xd   : > { %s2164_s14 = smov (!%p202_p3, %s1488_s14), 15 }
   0xe   : > { %s1848_s15 = sshll.u32 %s2164_s14, 3 }
   0xf   : > { %s1854_s18 = scalar_lea.vmem %s2160_s1, %s1848_s15  ;;  %s1862_s21 = scalar_lea.vmem %s2159_s0, %s1848_s15 }
  0x10   : > { %v1716_v1 = vld [vmem:[%s1854_s18] sm:$0xff]   ;;  %v1717_v2 = vld [vmem:[%s1854_s18 + $0x8] sm:$0xff]   ;;  %v1720_v5 = vld [vmem:[%s1854_s18 + $0x10] sm:$0xff]   ;;  %s2064_s24 = scalar_lea.vmem %s2161_s2, %s1848_s15  ;;  %s2122_s27 = scalar_lea.vmem %s2162_s3, %s1848_s15 }
  0x11   : > { %v293_v3 = vsel %vm288_vm1, %v1716_v1, 0  ;;  %v350_v4 = vsel %vm288_vm1, %v1717_v2, 0  ;;  %v1721_v6 = vld [vmem:[%s1854_s18 + $0x18] sm:$0xff]   ;;  %v1718_v7 = vld [vmem:[%s1862_s21] sm:$0xff]   ;;  %v1719_v8 = vld [vmem:[%s1862_s21 + $0x8] sm:$0xff]   ;;  %v407_v9 = vsel %vm288_vm1, %v1720_v5, 0 }
  0x12   : > { %1611 = vmatpush3.bf16.xpose.msra.mxu0 %v293_v3  ;;  %1617 = vmatpush3.bf16.xpose.msra.mxu1 %v350_v4  ;;  %v464_v10 = vsel %vm288_vm1, %v1721_v6, 0  ;;  %v1723_v11 = vld [vmem:[%s1854_s18 + $0x20] sm:$0xff]   ;;  %v1725_v12 = vld [vmem:[%s1854_s18 + $0x28] sm:$0xff]   ;;  %v1722_v13 = vld [vmem:[%s1862_s21 + $0x10] sm:$0xff]  }
  0x13   : > { %1622 = vmatprep.subr.bf16.mxu0 %v1812_v0  ;;  %1628 = vmatprep.subr.bf16.mxu1 %v1812_v0  ;;  %v1724_v14 = vld [vmem:[%s1862_s21 + $0x18] sm:$0xff]   ;;  %v521_v15 = vsel %vm288_vm1, %v1723_v11, 0  ;;  %v578_v16 = vsel %vm288_vm1, %v1725_v12, 0  ;;  %v1727_v17 = vld [vmem:[%s1854_s18 + $0x30] sm:$0xff]   ;;  %v1726_v19 = vld [vmem:[%s1862_s21 + $0x20] sm:$0xff]  }
  0x14   : > { %v1729_v18 = vld [vmem:[%s1854_s18 + $0x38] sm:$0xff]   ;;  %v1728_v20 = vld [vmem:[%s1862_s21 + $0x28] sm:$0xff]   ;;  %v635_v21 = vsel %vm288_vm1, %v1727_v17, 0  ;;  %v1730_v23 = vld [vmem:[%s1862_s21 + $0x30] sm:$0xff]  }
  0x15   : > { %v692_v22 = vsel %vm288_vm1, %v1729_v18, 0  ;;  %v1731_v24 = vld [vmem:[%s1862_s21 + $0x38] sm:$0xff]  }
  0x19   : > { %1613 = vmatmul.mubr.msk.bf16.vlgmr.msra.gmra.mrb[0].mxu0 %vm288_vm1, %v1718_v7  ;;  %1619 = vmatmul.mubr.msk.bf16.vlgmr.msra.gmra.mrb[0].mxu1 %vm288_vm1, %v1719_v8 }
  0x1a   : > { %1623 = vmatpush3.bf16.xpose.msra.mxu0 %v407_v9  ;;  %1629 = vmatpush3.bf16.xpose.msra.mxu1 %v464_v10 }
  0x1b   : > { %1624 = vmatprep.mubr.msk.bf16.mxu0 %vm1813_vm0, %v1812_v0  ;;  %1634 = vmatprep.subr.bf16.mxu0 %v1812_v0 }
  0x1c   : > { %1630 = vmatprep.mubr.msk.bf16.mxu1 %vm1813_vm0, %v1812_v0  ;;  %1640 = vmatprep.subr.bf16.mxu1 %v1812_v0 }
  0x21   : > { %1625 = vmatmul.mubr.msk.bf16.vlgmr.msra.gmra.mrb[4].mxu0 %vm288_vm1, %v1722_v13  ;;  %1631 = vmatmul.mubr.msk.bf16.vlgmr.msra.gmra.mrb[4].mxu1 %vm288_vm1, %v1724_v14 }
  0x22   : > { %1635 = vmatpush3.bf16.xpose.msra.mxu0 %v521_v15  ;;  %1641 = vmatpush3.bf16.xpose.msra.mxu1 %v578_v16 }
  0x23   : > { %1636 = vmatprep.mubr.msk.bf16.mxu0 %vm1813_vm0, %v1812_v0  ;;  %1646 = vmatprep.subr.bf16.mxu0 %v1812_v0 }
  0x24   : > { %1642 = vmatprep.mubr.msk.bf16.mxu1 %vm1813_vm0, %v1812_v0  ;;  %1652 = vmatprep.subr.bf16.mxu1 %v1812_v0 }
  0x29   : > { %1637 = vmatmul.mubr.msk.bf16.vlgmr.msra.gmra.mrb[8].mxu0 %vm288_vm1, %v1726_v19  ;;  %1643 = vmatmul.mubr.msk.bf16.vlgmr.msra.gmra.mrb[8].mxu1 %vm288_vm1, %v1728_v20 }
  0x2a   : > { %1647 = vmatpush3.bf16.xpose.msra.mxu0 %v635_v21  ;;  %1653 = vmatpush3.bf16.xpose.msra.mxu1 %v692_v22 }
  0x2b   : > { %1648 = vmatprep.mubr.msk.bf16.mxu0 %vm1813_vm0, %v1812_v0  ;;  %1654 = vmatprep.mubr.msk.bf16.mxu1 %vm1813_vm0, %v1812_v0 }
  0x2c   : > { %1658 = vmatprep.subr.bf16.mxu0 %v1812_v0  ;;  %1664 = vmatprep.subr.bf16.mxu1 %v1812_v0 }
  0x31   : > { %1649 = vmatmul.mubr.msk.bf16.vlgmr.msra.gmra.mrb[12].mxu0 %vm288_vm1, %v1730_v23  ;;  %1655 = vmatmul.mubr.msk.bf16.vlgmr.msra.gmra.mrb[12].mxu1 %vm288_vm1, %v1731_v24 }
  0x32   : > { %1660 = vmatprep.mubr.msk.bf16.mxu0 %vm1813_vm0, %v1812_v0  ;;  %1666 = vmatprep.mubr.msk.bf16.mxu1 %vm1813_vm0, %v1812_v0 }
  0xec   : > { %v1918_v25 = vpop.f32.mrb[0].mxu0  ;;  %v1920_v26 = vpop.f32.mrb[0].mxu1 }
  0xed   : > { %v1614_v27 = vpop.f32.mrb[1].mxu0  ;;  %v736_v28 = vsel %vm735_vm2, %v1918_v25, -inf  ;;  %v742_v29 = vsel %vm735_vm2, %v1920_v26, -inf  ;;  %v1620_v30 = vpop.f32.mrb[1].mxu1 }
  0xee   : > { %737 = vmax.xlane.f32.xlu0 %v736_v28  ;;  %v1926_v31 = vpop.f32.mrb[2].mxu0  ;;  %743 = vmax.xlane.f32.xlu1 %v742_v29  ;;  %v1928_v33 = vpop.f32.mrb[2].mxu1 }
  0xef   : > { %v1615_v32 = vpop.f32.mrb[3].mxu0  ;;  %v1621_v34 = vpop.f32.mrb[3].mxu1  ;;  %v745_v35 = vsel %vm735_vm2, %v1928_v33, -inf  ;;  %v739_v36 = vsel %vm735_vm2, %v1926_v31, -inf }
  0xf2   : > { %740 = vmax.xlane.f32.xlu0 %v739_v36  ;;  %746 = vmax.xlane.f32.xlu1 %v745_v35 }
  0xf4   : > { %v1934_v37 = vpop.f32.mrb[4].mxu0  ;;  %v1938_v40 = vpop.f32.mrb[4].mxu1 }
  0xf5   : > { %v1626_v38 = vpop.f32.mrb[5].mxu0  ;;  %v748_v39 = vsel %vm735_vm2, %v1934_v37, -inf  ;;  %v1632_v42 = vpop.f32.mrb[5].mxu1  ;;  %v754_v46 = vsel %vm735_vm2, %v1938_v40, -inf }
  0xf6   : > { %749 = vmax.xlane.f32.xlu0 %v748_v39  ;;  %v1940_v41 = vpop.f32.mrb[6].mxu0  ;;  %v1944_v45 = vpop.f32.mrb[6].mxu1 }
  0xf7   : > { %v1627_v43 = vpop.f32.mrb[7].mxu0  ;;  %v751_v44 = vsel %vm735_vm2, %v1940_v41, -inf  ;;  %v1633_v47 = vpop.f32.mrb[7].mxu1  ;;  %v757_v48 = vsel %vm735_vm2, %v1944_v45, -inf }
  0xf8   : > { %752 = vmax.xlane.f32.xlu1 %v751_v44 }
  0xfa   : > { %755 = vmax.xlane.f32.xlu0 %v754_v46 }
  0xfc   : > { %758 = vmax.xlane.f32.xlu1 %v757_v48  ;;  %v1950_v49 = vpop.f32.mrb[8].mxu0  ;;  %v1954_v52 = vpop.f32.mrb[8].mxu1 }
  0xfd   : > { %v1638_v50 = vpop.f32.mrb[9].mxu0  ;;  %v760_v51 = vsel %vm735_vm2, %v1950_v49, -inf  ;;  %v1644_v54 = vpop.f32.mrb[9].mxu1  ;;  %v766_v58 = vsel %vm735_vm2, %v1954_v52, -inf }
  0xfe   : > { %761 = vmax.xlane.f32.xlu0 %v760_v51  ;;  %v1956_v53 = vpop.f32.mrb[10].mxu0  ;;  %v1960_v57 = vpop.f32.mrb[10].mxu1 }
  0xff   : > { %v1639_v55 = vpop.f32.mrb[11].mxu0  ;;  %v763_v56 = vsel %vm735_vm2, %v1956_v53, -inf  ;;  %v1645_v59 = vpop.f32.mrb[11].mxu1  ;;  %v769_v60 = vsel %vm735_vm2, %v1960_v57, -inf }
 0x100   : > { %764 = vmax.xlane.f32.xlu1 %v763_v56 }
 0x102   : > { %767 = vmax.xlane.f32.xlu0 %v766_v58 }
 0x104   : > { %770 = vmax.xlane.f32.xlu1 %v769_v60  ;;  %v1966_v61 = vpop.f32.mrb[12].mxu0  ;;  %v1970_v1 = vpop.f32.mrb[12].mxu1 }
 0x105   : > { %v1650_v62 = vpop.f32.mrb[13].mxu0  ;;  %v772_v63 = vsel %vm735_vm2, %v1966_v61, -inf  ;;  %v1656_v3 = vpop.f32.mrb[13].mxu1  ;;  %v778_v7 = vsel %vm735_vm2, %v1970_v1, -inf }
 0x106   : > { %773 = vmax.xlane.f32.xlu0 %v772_v63  ;;  %v1972_v2 = vpop.f32.mrb[14].mxu0  ;;  %v1976_v6 = vpop.f32.mrb[14].mxu1 }
 0x107   : > { %v1651_v4 = vpop.f32.mrb[15].mxu0  ;;  %v775_v5 = vsel %vm735_vm2, %v1972_v2, -inf  ;;  %v1657_v8 = vpop.f32.mrb[15].mxu1  ;;  %v781_v9 = vsel %vm735_vm2, %v1976_v6, -inf }
 0x108   : > { %776 = vmax.xlane.f32.xlu1 %v775_v5 }
 0x10a   : > { %779 = vmax.xlane.f32.xlu0 %v778_v7 }
 0x10c   : > { %782 = vmax.xlane.f32.xlu1 %v781_v9 }
 0x17b   : > { %v738_v10 = vpop.xlane.xlu0 %737  ;;  %v744_v11 = vpop.xlane.xlu1 %743 }
 0x17c   : > { %v784_v12 = vsub.f32 %v1918_v25, %v738_v10  ;;  %v786_v13 = vsub.f32 %v1920_v26, %v744_v11 }
 0x17e   : > { %v800_v14 = vmul.f32 1.442695, %v784_v12  ;;  %v804_v15 = vmul.f32 1.442695, %v786_v13 }
 0x17f   : > { %v741_v16 = vpop.xlane.xlu0 %740  ;;  %v747_v17 = vpop.xlane.xlu1 %746 }
 0x180   : > { %1740 = vpow2.f32 %v800_v14  ;;  %v785_v18 = vsub.f32 %v1926_v31, %v741_v16  ;;  %v787_v19 = vsub.f32 %v1928_v33, %v747_v17 }
 0x181   : > { %1742 = vpow2.f32 %v804_v15 }
 0x182   : > { %v802_v20 = vmul.f32 1.442695, %v785_v18  ;;  %v806_v21 = vmul.f32 1.442695, %v787_v19 }
 0x183   : > { %v750_v22 = vpop.xlane.xlu0 %749 }
 0x184   : > { %1744 = vpow2.f32 %v802_v20  ;;  %v788_v23 = vsub.f32 %v1934_v37, %v750_v22 }
 0x185   : > { %v753_v24 = vpop.xlane.xlu1 %752  ;;  %1746 = vpow2.f32 %v806_v21 }
 0x186   : > { %v808_v25 = vmul.f32 1.442695, %v788_v23  ;;  %v789_v26 = vsub.f32 %v1940_v41, %v753_v24 }
 0x187   : > { %v756_v27 = vpop.xlane.xlu0 %755 }
 0x188   : > { %1748 = vpow2.f32 %v808_v25  ;;  %v810_v28 = vmul.f32 1.442695, %v789_v26  ;;  %v790_v29 = vsub.f32 %v1938_v40, %v756_v27  ;;  %v1732_v27 = vld [vmem:[%s2064_s24] sm:$0xff]  }
 0x189   : > { %v759_v30 = vpop.xlane.xlu1 %758  ;;  %1659 = vmatpush3.bf16.msra.mxu0 %v1732_v27 }
 0x18a   : > { %v1989_v31 = vpop.eup %1740  ;;  %1750 = vpow2.f32 %v810_v28  ;;  %v812_v32 = vmul.f32 1.442695, %v790_v29  ;;  %v791_v33 = vsub.f32 %v1944_v45, %v759_v30  ;;  %1670 = vmatprep.subr.bf16.mxu0 %v1812_v0  ;;  %v1733_v28 = vld [vmem:[%s2064_s24 + $0x8] sm:$0xff]  }
 0x18b   : > { %v762_v34 = vpop.xlane.xlu0 %761  ;;  %v832_v35 = vsel %vm735_vm2, %v1989_v31, 0.0  ;;  %v1994_v36 = vpop.eup %1742  ;;  %1665 = vmatpush3.bf16.msra.mxu1 %v1733_v28 }
 0x18c   : > { %1752 = vpow2.f32 %v812_v32  ;;  %v814_v37 = vmul.f32 1.442695, %v791_v33  ;;  %v792_v38 = vsub.f32 %v1950_v49, %v762_v34  ;;  %833 = vadd.xlane.f32.xlu0 %v832_v35  ;;  %v838_v44 = vsel %vm735_vm2, %v1994_v36, 0.0  ;;  %1676 = vmatprep.subr.bf16.mxu1 %v1812_v0 }
 0x18d   : > { %v765_v39 = vpop.xlane.xlu1 %764 }
 0x18e   : > { %v1997_v40 = vpop.eup %1744  ;;  %1754 = vpow2.f32 %v814_v37  ;;  %v816_v41 = vmul.f32 1.442695, %v792_v38  ;;  %v793_v42 = vsub.f32 %v1956_v53, %v765_v39 }
 0x18f   : > { %v768_v43 = vpop.xlane.xlu0 %767  ;;  %v835_v45 = vsel %vm735_vm2, %v1997_v40, 0.0  ;;  %v2004_v46 = vpop.eup %1746 }
 0x190   : > { %1756 = vpow2.f32 %v816_v41  ;;  %v818_v47 = vmul.f32 1.442695, %v793_v42  ;;  %v794_v48 = vsub.f32 %v1954_v52, %v768_v43  ;;  %839 = vadd.xlane.f32.xlu0 %v838_v44  ;;  %836 = vadd.xlane.f32.xlu1 %v835_v45  ;;  %v841_v56 = vsel %vm735_vm2, %v2004_v46, 0.0 }
 0x191   : > { %v771_v49 = vpop.xlane.xlu1 %770 }
 0x192   : > { %v2007_v50 = vpop.eup %1748  ;;  %1758 = vpow2.f32 %v818_v47  ;;  %v820_v51 = vmul.f32 1.442695, %v794_v48  ;;  %v795_v53 = vsub.f32 %v1960_v57, %v771_v49  ;;  %v1734_v47 = vld [vmem:[%s2064_s24 + $0x10] sm:$0xff]  }
 0x193   : > { %v774_v54 = vpop.xlane.xlu0 %773  ;;  %v844_v55 = vsel %vm735_vm2, %v2007_v50, 0.0 }
 0x194   : > { %v2014_v58 = vpop.eup %1750  ;;  %1760 = vpow2.f32 %v820_v51  ;;  %v822_v52 = vmul.f32 1.442695, %v795_v53  ;;  %v796_v59 = vsub.f32 %v1966_v61, %v774_v54  ;;  %845 = vadd.xlane.f32.xlu0 %v844_v55  ;;  %842 = vadd.xlane.f32.xlu1 %v841_v56 }
 0x195   : > { %v777_v60 = vpop.xlane.xlu1 %776  ;;  %v847_v5 = vsel %vm735_vm2, %v2014_v58, 0.0 }
 0x196   : > { %v2017_v62 = vpop.eup %1752  ;;  %1762 = vpow2.f32 %v822_v52  ;;  %v824_v57 = vmul.f32 1.442695, %v796_v59  ;;  %v797_v63 = vsub.f32 %v1972_v2, %v777_v60 }
 0x197   : > { %v780_v3 = vpop.xlane.xlu0 %779  ;;  %v850_v4 = vsel %vm735_vm2, %v2017_v62, 0.0 }
 0x198   : > { %v2024_v7 = vpop.eup %1754  ;;  %1764 = vpow2.f32 %v824_v57  ;;  %v826_v61 = vmul.f32 1.442695, %v797_v63  ;;  %v798_v8 = vsub.f32 %v1970_v1, %v780_v3  ;;  %851 = vadd.xlane.f32.xlu0 %v850_v4  ;;  %848 = vadd.xlane.f32.xlu1 %v847_v5  ;;  %v1736_v63 = vld [vmem:[%s2064_s24 + $0x20] sm:$0xff]  }
 0x199   : > { %v783_v9 = vpop.xlane.xlu1 %782  ;;  %v853_v13 = vsel %vm735_vm2, %v2024_v7, 0.0 }
 0x19a   : > { %v2027_v10 = vpop.eup %1756  ;;  %1766 = vpow2.f32 %v826_v61  ;;  %v828_v2 = vmul.f32 1.442695, %v798_v8  ;;  %v799_v11 = vsub.f32 %v1976_v6, %v783_v9  ;;  %v1737_v9 = vld [vmem:[%s2064_s24 + $0x28] sm:$0xff]  }
 0x19b   : > { %v856_v12 = vsel %vm735_vm2, %v2027_v10, 0.0 }
 0x19c   : > { %v2034_v14 = vpop.eup %1758  ;;  %1768 = vpow2.f32 %v828_v2  ;;  %v830_v15 = vmul.f32 1.442695, %v799_v11  ;;  %857 = vadd.xlane.f32.xlu0 %v856_v12  ;;  %854 = vadd.xlane.f32.xlu1 %v853_v13 }
 0x19d   : > { %v859_v6 = vsel %vm735_vm2, %v2034_v14, 0.0 }
 0x19e   : > { %v2036_v1 = vpop.eup %1760  ;;  %1770 = vpow2.f32 %v830_v15  ;;  %v1738_v15 = vld [vmem:[%s2064_s24 + $0x30] sm:$0xff]  }
 0x19f   : > { %v862_v16 = vsel %vm735_vm2, %v2036_v1, 0.0 }
 0x1a0   : > { %v2042_v17 = vpop.eup %1762  ;;  %863 = vadd.xlane.f32.xlu0 %v862_v16  ;;  %860 = vadd.xlane.f32.xlu1 %v859_v6 }
 0x1a1   : > { %v865_v20 = vsel %vm735_vm2, %v2042_v17, 0.0 }
 0x1a2   : > { %v2044_v18 = vpop.eup %1764 }
 0x1a3   : > { %v868_v19 = vsel %vm735_vm2, %v2044_v18, 0.0 }
 0x1a4   : > { %v2050_v21 = vpop.eup %1766  ;;  %869 = vadd.xlane.f32.xlu0 %v868_v19  ;;  %866 = vadd.xlane.f32.xlu1 %v865_v20  ;;  %v1739_v20 = vld [vmem:[%s2064_s24 + $0x38] sm:$0xff]  }
 0x1a5   : > { %v871_v24 = vsel %vm735_vm2, %v2050_v21, 0.0 }
 0x1a6   : > { %v2052_v22 = vpop.eup %1768 }
 0x1a7   : > { %v874_v23 = vsel %vm735_vm2, %v2052_v22, 0.0 }
 0x1a8   : > { %v2058_v25 = vpop.eup %1770  ;;  %875 = vadd.xlane.f32.xlu0 %v874_v23  ;;  %872 = vadd.xlane.f32.xlu1 %v871_v24 }
 0x1a9   : > { %v877_v26 = vsel %vm735_vm2, %v2058_v25, 0.0 }
 0x1ac   : > { %878 = vadd.xlane.f32.xlu1 %v877_v26 }
 0x219   : > { %v834_v29 = vpop.xlane.xlu0 %833 }
 0x21a   : > { %1772 = vrcp.f32 %v834_v29 }
 0x21d   : > { %v840_v30 = vpop.xlane.xlu0 %839  ;;  %v837_v32 = vpop.xlane.xlu1 %836 }
 0x21e   : > { %1774 = vrcp.f32 %v837_v32 }
 0x21f   : > { %1776 = vrcp.f32 %v840_v30 }
 0x221   : > { %v846_v33 = vpop.xlane.xlu0 %845  ;;  %v843_v34 = vpop.xlane.xlu1 %842 }
 0x222   : > { %1778 = vrcp.f32 %v843_v34 }
 0x223   : > { %1780 = vrcp.f32 %v846_v33 }
 0x224   : > { %v1773_v38 = vpop.eup %1772 }
 0x225   : > { %v852_v35 = vpop.xlane.xlu0 %851  ;;  %v849_v37 = vpop.xlane.xlu1 %848  ;;  %v881_v43 = vmul.f32 %v1773_v38, %v1989_v31  ;;  %v1735_v31 = vld [vmem:[%s2064_s24 + $0x18] sm:$0xff]  }
 0x226   : > { %1782 = vrcp.f32 %v849_v37 }
 0x227   : > { %1784 = vrcp.f32 %v852_v35 }
 0x228   : > { %v1775_v39 = vpop.eup %1774 }
 0x229   : > { %v858_v41 = vpop.xlane.xlu0 %857  ;;  %v855_v42 = vpop.xlane.xlu1 %854  ;;  %v883_v44 = vmul.f32 %v1775_v39, %v1997_v40 }
 0x22a   : > { %v1777_v45 = vpop.eup %1776  ;;  %1786 = vrcp.f32 %v855_v42 }
 0x22b   : > { %v912_v48 = vpack.c.bf16 %v883_v44, %v881_v43  ;;  %1788 = vrcp.f32 %v858_v41  ;;  %v885_v54 = vmul.f32 %v1777_v45, %v1994_v36 }
 0x22c   : > { %v1779_v49 = vpop.eup %1778 }
 0x22d   : > { %v864_v51 = vpop.xlane.xlu0 %863  ;;  %v861_v53 = vpop.xlane.xlu1 %860  ;;  %v887_v55 = vmul.f32 %v1779_v49, %v2004_v46  ;;  %1661 = vmatmul.mubr.msk.bf16.vlgmr.msra.gmra.mrb[16].mxu0 %vm735_vm2, %v912_v48 }
 0x22e   : > { %v1781_v56 = vpop.eup %1780  ;;  %1790 = vrcp.f32 %v861_v53  ;;  %1671 = vmatpush3.bf16.msra.mxu0 %v1734_v47  ;;  %1672 = vmatprep.mubr.msk.bf16.mxu0 %vm1813_vm0, %v1812_v0 }
 0x22f   : > { %v913_v40 = vpack.c.bf16 %v887_v55, %v885_v54  ;;  %1682 = vmatprep.subr.bf16.mxu0 %v1812_v0  ;;  %1792 = vrcp.f32 %v864_v51  ;;  %v889_v36 = vmul.f32 %v1781_v56, %v2007_v50 }
 0x230   : > { %v1783_v52 = vpop.eup %1782 }
 0x231   : > { %v870_v59 = vpop.xlane.xlu0 %869  ;;  %v867_v60 = vpop.xlane.xlu1 %866  ;;  %v891_v46 = vmul.f32 %v1783_v52, %v2014_v58  ;;  %1667 = vmatmul.mubr.msk.bf16.vlgmr.msra.gmra.mrb[16].mxu1 %vm735_vm2, %v913_v40 }
 0x232   : > { %v1785_v57 = vpop.eup %1784  ;;  %1677 = vmatpush3.bf16.msra.mxu1 %v1735_v31  ;;  %1794 = vrcp.f32 %v867_v60  ;;  %1678 = vmatprep.mubr.msk.bf16.mxu1 %vm1813_vm0, %v1812_v0 }
 0x233   : > { %v914_v3 = vpack.c.bf16 %v891_v46, %v889_v36  ;;  %1688 = vmatprep.subr.bf16.mxu1 %v1812_v0  ;;  %1796 = vrcp.f32 %v870_v59  ;;  %v893_v50 = vmul.f32 %v1785_v57, %v2017_v62 }
 0x234   : > { %v1787_v4 = vpop.eup %1786 }
 0x235   : > { %v876_v5 = vpop.xlane.xlu0 %875  ;;  %v873_v61 = vpop.xlane.xlu1 %872  ;;  %v895_v58 = vmul.f32 %v1787_v4, %v2024_v7  ;;  %1673 = vmatmul.mubr.msk.bf16.vlgmr.msra.gmra.mrb[20].mxu0 %vm735_vm2, %v914_v3 }
 0x236   : > { %v1789_v8 = vpop.eup %1788  ;;  %1798 = vrcp.f32 %v873_v61  ;;  %1683 = vmatpush3.bf16.msra.mxu0 %v1736_v63  ;;  %1684 = vmatprep.mubr.msk.bf16.mxu0 %vm1813_vm0, %v1812_v0 }
 0x237   : > { %1800 = vrcp.f32 %v876_v5  ;;  %v915_v2 = vpack.c.bf16 %v895_v58, %v893_v50  ;;  %1694 = vmatprep.subr.bf16.mxu0 %v1812_v0  ;;  %v897_v62 = vmul.f32 %v1789_v8, %v2027_v10 }
 0x238   : > { %v1791_v11 = vpop.eup %1790 }
 0x239   : > { %v879_v12 = vpop.xlane.xlu1 %878  ;;  %v899_v7 = vmul.f32 %v1791_v11, %v2034_v14  ;;  %1679 = vmatmul.mubr.msk.bf16.vlgmr.msra.gmra.mrb[20].mxu1 %vm735_vm2, %v915_v2  ;;  %v1793_v13 = vpop.eup %1792 }
 0x23a   : > { %1802 = vrcp.f32 %v879_v12  ;;  %1689 = vmatpush3.bf16.msra.mxu1 %v1737_v9  ;;  %1690 = vmatprep.mubr.msk.bf16.mxu1 %vm1813_vm0, %v1812_v0  ;;  %v901_v19 = vmul.f32 %v1793_v13, %v2036_v1 }
 0x23b   : > { %v916_v16 = vpack.c.bf16 %v899_v7, %v897_v62  ;;  %1700 = vmatprep.subr.bf16.mxu1 %v1812_v0 }
 0x23c   : > { %v1795_v6 = vpop.eup %1794 }
 0x23d   : > { %v903_v10 = vmul.f32 %v1795_v6, %v2042_v17  ;;  %1685 = vmatmul.mubr.msk.bf16.vlgmr.msra.gmra.mrb[24].mxu0 %vm735_vm2, %v916_v16  ;;  %v1797_v14 = vpop.eup %1796 }
 0x23e   : > { %1695 = vmatpush3.bf16.msra.mxu0 %v1738_v15  ;;  %1696 = vmatprep.mubr.msk.bf16.mxu0 %vm1813_vm0, %v1812_v0  ;;  %v905_v27 = vmul.f32 %v1797_v14, %v2044_v18 }
 0x23f   : > { %v917_v23 = vpack.c.bf16 %v903_v10, %v901_v19 }
 0x240   : > { %v1799_v24 = vpop.eup %1798 }
 0x241   : > { %v1801_v26 = vpop.eup %1800  ;;  %v907_v28 = vmul.f32 %v1799_v24, %v2050_v21  ;;  %1691 = vmatmul.mubr.msk.bf16.vlgmr.msra.gmra.mrb[24].mxu1 %vm735_vm2, %v917_v23 }
 0x242   : > { %1701 = vmatpush3.bf16.msra.mxu1 %v1739_v20  ;;  %1702 = vmatprep.mubr.msk.bf16.mxu1 %vm1813_vm0, %v1812_v0  ;;  %v909_v29 = vmul.f32 %v1801_v26, %v2052_v22 }
 0x243   : > { %v918_v17 = vpack.c.bf16 %v907_v28, %v905_v27 }
 0x244   : > { %v1803_v1 = vpop.eup %1802 }
 0x245   : > { %v911_v30 = vmul.f32 %v1803_v1, %v2058_v25  ;;  %1697 = vmatmul.mubr.msk.bf16.vlgmr.msra.gmra.mrb[28].mxu0 %vm735_vm2, %v918_v17 }
 0x247   : > { %v919_v32 = vpack.c.bf16 %v911_v30, %v909_v29 }
 0x249   : > { %1703 = vmatmul.mubr.msk.bf16.vlgmr.msra.gmra.mrb[28].mxu1 %vm735_vm2, %v919_v32 }
 0x300   : > { %v963_v0 = vpop.f32.mrb[16].mxu0 }
 0x301   : > { %v1562_v18 = vpack.c.bf16 %v963_v0, %v963_v0  ;;  %v1662_v21 = vpop.f32.mrb[17].mxu0 }
 0x302   : > { %v966_v22 = vpop.f32.mrb[18].mxu0 }
 0x303   : > { %1385 = vst.msk [vmem:[%s2122_s27] sm:$0xf] %vm1384_vm3, %v1562_v18  ;;  %v1563_v25 = vpack.c.bf16 %v966_v22, %v966_v22  ;;  %v1663_v33 = vpop.f32.mrb[19].mxu0 }
 0x304   : > { %v1013_v34 = vpop.f32.mrb[16].mxu1 }
 0x305   : > { %1386 = vst.msk [vmem:[%s2122_s27 + $0x4] sm:$0xf] %vm1384_vm3, %v1563_v25  ;;  %v1564_v35 = vpack.c.bf16 %v1013_v34, %v1013_v34  ;;  %v1668_v37 = vpop.f32.mrb[17].mxu1 }
 0x306   : > { %v1016_v38 = vpop.f32.mrb[18].mxu1 }
 0x307   : > { %1387 = vst.msk [vmem:[%s2122_s27 + $0x8] sm:$0xf] %vm1384_vm3, %v1564_v35  ;;  %v1565_v39 = vpack.c.bf16 %v1016_v38, %v1016_v38  ;;  %v1669_v41 = vpop.f32.mrb[19].mxu1 }
 0x308   : > { %v1063_v42 = vpop.f32.mrb[20].mxu0 }
 0x309   : > { %1388 = vst.msk [vmem:[%s2122_s27 + $0xc] sm:$0xf] %vm1384_vm3, %v1565_v39  ;;  %v1566_v43 = vpack.c.bf16 %v1063_v42, %v1063_v42  ;;  %v1674_v44 = vpop.f32.mrb[21].mxu0 }
 0x30a   : > { %v1066_v45 = vpop.f32.mrb[22].mxu0 }
 0x30b   : > { %1389 = vst.msk [vmem:[%s2122_s27 + $0x10] sm:$0xf] %vm1384_vm3, %v1566_v43  ;;  %v1567_v47 = vpack.c.bf16 %v1066_v45, %v1066_v45  ;;  %v1675_v48 = vpop.f32.mrb[23].mxu0 }
 0x30c   : > { %v1113_v49 = vpop.f32.mrb[20].mxu1 }
 0x30d   : > { %1390 = vst.msk [vmem:[%s2122_s27 + $0x14] sm:$0xf] %vm1384_vm3, %v1567_v47  ;;  %v1568_v51 = vpack.c.bf16 %v1113_v49, %v1113_v49  ;;  %v1680_v53 = vpop.f32.mrb[21].mxu1 }
 0x30e   : > { %v1116_v54 = vpop.f32.mrb[22].mxu1 }
 0x30f   : > { %1391 = vst.msk [vmem:[%s2122_s27 + $0x18] sm:$0xf] %vm1384_vm3, %v1568_v51  ;;  %v1569_v55 = vpack.c.bf16 %v1116_v54, %v1116_v54  ;;  %v1681_v56 = vpop.f32.mrb[23].mxu1 }
 0x310   : > { %v1163_v31 = vpop.f32.mrb[24].mxu0 }
 0x311   : > { %1392 = vst.msk [vmem:[%s2122_s27 + $0x1c] sm:$0xf] %vm1384_vm3, %v1569_v55  ;;  %v1570_v40 = vpack.c.bf16 %v1163_v31, %v1163_v31  ;;  %v1686_v52 = vpop.f32.mrb[25].mxu0 }
 0x312   : > { %v1166_v59 = vpop.f32.mrb[26].mxu0 }
 0x313   : > { %1393 = vst.msk [vmem:[%s2122_s27 + $0x20] sm:$0xf] %vm1384_vm3, %v1570_v40  ;;  %v1571_v60 = vpack.c.bf16 %v1166_v59, %v1166_v59  ;;  %v1687_v36 = vpop.f32.mrb[27].mxu0 }
 0x314   : > { %v1213_v46 = vpop.f32.mrb[24].mxu1 }
 0x315   : > { %1394 = vst.msk [vmem:[%s2122_s27 + $0x24] sm:$0xf] %vm1384_vm3, %v1571_v60  ;;  %v1572_v57 = vpack.c.bf16 %v1213_v46, %v1213_v46  ;;  %v1692_v63 = vpop.f32.mrb[25].mxu1 }
 0x316   : > { %v1216_v3 = vpop.f32.mrb[26].mxu1 }
 0x317   : > { %1395 = vst.msk [vmem:[%s2122_s27 + $0x28] sm:$0xf] %vm1384_vm3, %v1572_v57  ;;  %v1573_v4 = vpack.c.bf16 %v1216_v3, %v1216_v3  ;;  %v1693_v5 = vpop.f32.mrb[27].mxu1 }
 0x318   : > { %v1263_v61 = vpop.f32.mrb[28].mxu0 }
 0x319   : > { %1396 = vst.msk [vmem:[%s2122_s27 + $0x2c] sm:$0xf] %vm1384_vm3, %v1573_v4  ;;  %v1574_v50 = vpack.c.bf16 %v1263_v61, %v1263_v61  ;;  %v1698_v58 = vpop.f32.mrb[29].mxu0 }
 0x31a   : > { %v1266_v8 = vpop.f32.mrb[30].mxu0 }
 0x31b   : > { %1397 = vst.msk [vmem:[%s2122_s27 + $0x30] sm:$0xf] %vm1384_vm3, %v1574_v50  ;;  %v1575_v9 = vpack.c.bf16 %v1266_v8, %v1266_v8  ;;  %v1699_v2 = vpop.f32.mrb[31].mxu0 }
 0x31c   : > { %v1313_v11 = vpop.f32.mrb[28].mxu1 }
 0x31d   : > { %1398 = vst.msk [vmem:[%s2122_s27 + $0x34] sm:$0xf] %vm1384_vm3, %v1575_v9  ;;  %v1576_v12 = vpack.c.bf16 %v1313_v11, %v1313_v11  ;;  %v1704_v62 = vpop.f32.mrb[29].mxu1 }
 0x31e   : > { %v1316_v7 = vpop.f32.mrb[30].mxu1 }
 0x31f   : > { %1399 = vst.msk [vmem:[%s2122_s27 + $0x38] sm:$0xf] %vm1384_vm3, %v1576_v12  ;;  %v1577_v13 = vpack.c.bf16 %v1316_v7, %v1316_v7  ;;  %v1705_v15 = vpop.f32.mrb[31].mxu1 }
 0x321   : > { %1400 = vst.msk [vmem:[%s2122_s27 + $0x3c] sm:$0xf] %vm1384_vm3, %v1577_v13 }
 0x322 PF: > { %s13_s12 = sadd.s32 1, %s1810_s12  }
 0x323   : > { %p10_p4 = scmp.ge.s32.totalorder %s13_s12, 4  }
 0x325   :  { %12 = sbr.rel (!%p10_p4) target bundleno = 1 (0x1), region = 68 }

// kernel: transformer_esim_forward.21
= control target key start
LH: loop header
LB: loop body
LE: loop exit
PB: predicated region body
PF: predicated region fallthrough
CT: control target
= control target key end

     0   :  { %vm87_vm0 = vcmask 122880   ;;  %v221_v1 = vmov 0   ;;  %vm118_vm1 = vcmask 261120   ;;  %vm141_vm2 = vcmask 253952   ;;  %s278_s1 = inlined_call_operand.vmem [shape: f32[2,1,16], index: 1, kind: input, shape index: {}]   ;;  %s279_s0 = inlined_call_operand.vmem [shape: bf16[2,16,32], index: 0, kind: input, shape index: {}]   ;;  %s280_s2 = inlined_call_operand.vmem [shape: f32[2,1,32], index: 2, kind: output, shape index: {0}]   ;;  %s281_s3 = inlined_call_operand.vmem [shape: f32[2,1,32], index: 3, kind: output, shape index: {1}]  }
   0x1   :  { %v21_v0 = vld [vmem:[%s278_s1] sm:$0x1]  ;;  %215 = vset.pattern.permute.xlu1 %v221_v1  ;;  %v22_v3 = vld [vmem:[%s278_s1 + $0x1] sm:$0x1]  ;;  %v212_v25 = vld [vmem:[%s279_s0 + $0x8] sm:$0xff]  }
   0x2   :  { %23 = vxpose.xlu0.b32.start.end [1/1] (short) (narrow) %v21_v0, 16  ;;  %v88_v2 = vsel %vm87_vm0, %v21_v0, 0.0  ;;  %v91_v4 = vsel %vm87_vm0, %v22_v3, 0.0  ;;  %v205_v19 = vld [vmem:[%s279_s0] sm:$0xff]   ;;  %v210_v29 = vunpack.c.l.bf16 %v212_v25  ;;  %v211_v32 = vunpack.c.h.bf16 %v212_v25 }
   0x3   :  { %89 = vadd.xlane.f32.xlu1 %v88_v2  ;;  %v206_v20 = vunpack.c.l.bf16 %v205_v19  ;;  %v207_v22 = vunpack.c.h.bf16 %v205_v19 }
   0x7   :  { %55 = vxpose.xlu0.b32.start.end [1/1] (short) (narrow) %v22_v3, 16  ;;  %92 = vadd.xlane.f32.xlu1 %v91_v4 }
  0x30   :  { %216 = vset.pattern.permute.xlu0 %v221_v1 }
  0x82   :  { %v39_v5 = vpop.trf.xlu0 }
  0x83   :  { %96 = vperm.xlu1 %215, %v39_v5   ;;  %v144_v8 = vsub.f32 1.0, %v39_v5 }
  0x85   :  { %v148_v10 = vmul.f32 -10000000.0, %v144_v8 }
  0x86   :  { %v40_v6 = vpop.trf.xlu0 }
  0x87   :  { %101 = vperm.xlu0 %216, %v40_v6   ;;  %v145_v12 = vsub.f32 1.0, %v40_v6 }
  0x89   :  { %v149_v14 = vmul.f32 -10000000.0, %v145_v12 }
  0x8a   :  { %v71_v7 = vpop.trf.xlu0 }
  0x8b   :  { %106 = vperm.xlu1 %215, %v71_v7   ;;  %v146_v11 = vsub.f32 1.0, %v71_v7 }
  0x8d   :  { %v150_v13 = vmul.f32 -10000000.0, %v146_v11 }
  0x8e   :  { %v72_v9 = vpop.trf.xlu0 }
  0x8f   :  { %111 = vperm.xlu1 %215, %v72_v9   ;;  %v147_v15 = vsub.f32 1.0, %v72_v9 }
  0x90   :  { %v90_v17 = vpop.xlane.xlu1 %89 }
  0x91   :  { %v151_v16 = vmul.f32 -10000000.0, %v147_v15  ;;  %217 = vrcp.f32 %v90_v17 }
  0x93   :  { %154 = vperm.xlu1 %215, %v148_v10  }
  0x94   :  { %v93_v18 = vpop.xlane.xlu1 %92 }
  0x95   :  { %219 = vrcp.f32 %v93_v18 }
  0x97   :  { %164 = vperm.xlu1 %215, %v150_v13  }
  0x9b   :  { %159 = vperm.xlu1 %215, %v149_v14   ;;  %v218_v49 = vpop.eup %217 }
  0x9f   :  { %169 = vperm.xlu1 %215, %v151_v16   ;;  %v220_v63 = vpop.eup %219 }
 0x102   :  { %v97_v21 = vpop.permute.xlu1 %96 }
 0x103   :  { %v114_v23 = vmul.f32 %v206_v20, %v97_v21 }
 0x105   :  { %v119_v27 = vsel %vm118_vm1, %v114_v23, 0.0 }
 0x106   :  { %v102_v24 = vpop.permute.xlu0 %101 }
 0x107   :  { %v115_v26 = vmul.f32 %v207_v22, %v102_v24 }
 0x109   :  { %v120_v28 = vsel %vm118_vm1, %v115_v26, 0.0 }
 0x10a   :  { %v121_v30 = vadd.f32 %v120_v28, %v119_v27  ;;  %v107_v31 = vpop.permute.xlu1 %106 }
 0x10b   :  { %v116_v34 = vmul.f32 %v210_v29, %v107_v31 }
 0x10c   :  { %v122_v33 = vrot.slane %v121_v30, 4 }
 0x10d   :  { %v128_v39 = vsel %vm118_vm1, %v116_v34, 0.0 }
 0x10e   :  { %v123_v35 = vadd.f32 %v122_v33, %v121_v30  ;;  %v112_v36 = vpop.permute.xlu1 %111 }
 0x10f   :  { %v117_v37 = vmul.f32 %v211_v32, %v112_v36 }
 0x110   :  { %v124_v38 = vrot.slane %v123_v35, 2 }
 0x111   :  { %v129_v40 = vsel %vm118_vm1, %v117_v37, 0.0 }
 0x112   :  { %v125_v41 = vadd.f32 %v124_v38, %v123_v35  ;;  %v130_v42 = vadd.f32 %v129_v40, %v128_v39  ;;  %v155_v43 = vpop.permute.xlu1 %154 }
 0x113   :  { %v172_v52 = vadd.f32 %v155_v43, %v114_v23 }
 0x114   :  { %v126_v44 = vrot.slane %v125_v41, 1  ;;  %v131_v45 = vrot.slane %v130_v42, 4 }
 0x115   :  { %v176_v57 = vsel %vm118_vm1, %v172_v52, -inf }
 0x116   :  { %v127_v46 = vadd.f32 %v126_v44, %v125_v41  ;;  %v132_v47 = vadd.f32 %v131_v45, %v130_v42  ;;  %v165_v48 = vpop.permute.xlu1 %164 }
 0x117   :  { %v174_v58 = vadd.f32 %v165_v48, %v116_v34 }
 0x118   :  { %v138_v50 = vmul.f32 %v218_v49, %v127_v46  ;;  %v133_v51 = vrot.slane %v132_v47, 2 }
 0x119   :  { %v185_v3 = vsel %vm118_vm1, %v174_v58, -inf }
 0x11a   :  { %142 = vst.msk [vmem:[%s280_s2] sm:$0x1] %vm141_vm2, %v138_v50  ;;  %v134_v53 = vadd.f32 %v133_v51, %v132_v47  ;;  %v160_v54 = vpop.permute.xlu1 %159 }
 0x11b   :  { %v173_v55 = vadd.f32 %v160_v54, %v115_v26 }
 0x11c   :  { %v135_v56 = vrot.slane %v134_v53, 1 }
 0x11d   :  { %v177_v59 = vsel %vm118_vm1, %v173_v55, -inf }
 0x11e   :  { %v136_v60 = vadd.f32 %v135_v56, %v134_v53  ;;  %v178_v61 = vmax.f32 %v176_v57, %v177_v59  ;;  %v170_v62 = vpop.permute.xlu1 %169 }
 0x11f   :  { %v175_v0 = vadd.f32 %v170_v62, %v117_v37 }
 0x120   :  { %v140_v1 = vmul.f32 %v220_v63, %v136_v60  ;;  %v179_v2 = vrot.slane %v178_v61, 4 }
 0x121   :  { %v186_v4 = vsel %vm118_vm1, %v175_v0, -inf }
 0x122   :  { %143 = vst.msk [vmem:[%s280_s2 + $0x1] sm:$0x1] %vm141_vm2, %v140_v1  ;;  %v180_v5 = vmax.f32 %v178_v61, %v179_v2  ;;  %v187_v6 = vmax.f32 %v185_v3, %v186_v4 }
 0x124   :  { %v181_v7 = vrot.slane %v180_v5, 2  ;;  %v188_v8 = vrot.slane %v187_v6, 4 }
 0x126   :  { %v182_v9 = vmax.f32 %v180_v5, %v181_v7  ;;  %v189_v10 = vmax.f32 %v187_v6, %v188_v8 }
 0x128   :  { %v183_v11 = vrot.slane %v182_v9, 1  ;;  %v190_v12 = vrot.slane %v189_v10, 2 }
 0x12a   :  { %v184_v13 = vmax.f32 %v182_v9, %v183_v11  ;;  %v191_v14 = vmax.f32 %v189_v10, %v190_v12 }
 0x12c   :  { %194 = vst.msk [vmem:[%s281_s3] sm:$0x1] %vm141_vm2, %v184_v13  ;;  %v192_v15 = vrot.slane %v191_v14, 1 }
 0x12e   :  { %v193_v16 = vmax.f32 %v191_v14, %v192_v15 }
 0x130   :  { %195 = vst.msk [vmem:[%s281_s3 + $0x1] sm:$0x1] %vm141_vm2, %v193_v16 }

// kernel: transformer_esim_forward.14
= control target key start
LH: loop header
LB: loop body
LE: loop exit
PB: predicated region body
PF: predicated region fallthrough
CT: control target
= control target key end

     0   :  { %vm28_vm0 = vcmask 261120   ;;  %v522_v1 = vmov 0.0   ;;  %vm416_vm1 = vcmask 257024   ;;  %s758_s1 = inlined_call_operand.vmem [shape: bf16[32,32], index: 1, kind: input, shape index: {}]   ;;  %s759_s0 = inlined_call_operand.vmem [shape: bf16[64,32], index: 0, kind: input, shape index: {}]   ;;  %s760_s3 = inlined_call_operand.vmem [shape: bf16[64,32], index: 3, kind: input, shape index: {}]   ;;  %s761_s2 = inlined_call_operand.vmem [shape: f32[1,32], index: 2, kind: input, shape index: {}]   ;;  %s762_s4 = inlined_call_operand.vmem [shape: f32[1,32], index: 4, kind: input, shape index: {}]   ;;  %s763_s5 = inlined_call_operand.vmem [shape: f32[1,32], index: 5, kind: input, shape index: {}]   ;;  %s764_s6 = inlined_call_operand.vmem [shape: bf16[64,32], index: 6, kind: output, shape index: {}]  }
   0x1   :  { %v500_v0 = vld [vmem:[%s758_s1] sm:$0xff]   ;;  %31 = vst.msk [vmem:[#allocation2 + $0x10] sm:$0xff] %vm28_vm0, %v522_v1  ;;  %29 = vst.msk [vmem:[#allocation2] sm:$0xff] %vm28_vm0, %v522_v1  ;;  %v501_v2 = vld [vmem:[%s758_s1 + $0x8] sm:$0xff]  }
   0x2   :  { %30 = vst.msk [vmem:[#allocation2 + $0x8] sm:$0xff] %vm28_vm0, %v522_v1  ;;  %32 = vst.msk [vmem:[#allocation2 + $0x18] sm:$0xff] %vm28_vm0, %v522_v1  ;;  %483 = vmatprep.subr.bf16.mxu0 %v500_v0  ;;  %495 = vmatprep.subr.bf16.mxu1 %v500_v0  ;;  %v502_v3 = vld [vmem:[%s759_s0] sm:$0xff]   ;;  %v503_v4 = vld [vmem:[%s759_s0 + $0x10] sm:$0xff]  }
   0x3   :  { %33 = vst.msk [vmem:[#allocation2 + $0x20] sm:$0xff] %vm28_vm0, %v522_v1  ;;  %34 = vst.msk [vmem:[#allocation2 + $0x28] sm:$0xff] %vm28_vm0, %v522_v1  ;;  %484 = vmatpush3.bf16.msra.mxu0 %v500_v0  ;;  %497 = vmatpush3.bf16.msra.mxu1 %v500_v0  ;;  %v504_v5 = vld [vmem:[%s759_s0 + $0x8] sm:$0xff]   ;;  %v505_v6 = vld [vmem:[%s759_s0 + $0x18] sm:$0xff]  }
   0x4   :  { %35 = vst.msk [vmem:[#allocation2 + $0x30] sm:$0xff] %vm28_vm0, %v522_v1  ;;  %36 = vst.msk [vmem:[#allocation2 + $0x38] sm:$0xff] %vm28_vm0, %v522_v1  ;;  %485 = vmatprep.subr.bf16.mxu0 %v501_v2  ;;  %496 = vmatprep.subr.bf16.mxu1 %v501_v2  ;;  %v476_v31 = vld [vmem:[%s760_s3 + $0x18] sm:$0xff]   ;;  %v474_v32 = vld [vmem:[%s760_s3 + $0x8] sm:$0xff]  }
   0x5   :  { %487 = vmatprep.mubr.msk.bf16.mxu0 %vm28_vm0, %v502_v3  ;;  %491 = vmatprep.mubr.msk.bf16.mxu1 %vm28_vm0, %v503_v4  ;;  %v439_v33 = vld [vmem:[%s761_s2] ss:$0 sm:$0xff]  ;;  %v472_v35 = vunpack.c.l.bf16 %v476_v31  ;;  %v464_v36 = vunpack.c.l.bf16 %v474_v32  ;;  %v465_v43 = vunpack.c.h.bf16 %v474_v32  ;;  %v475_v45 = vld [vmem:[%s760_s3 + $0x10] sm:$0xff]   ;;  %v473_v55 = vunpack.c.h.bf16 %v476_v31 }
   0x6   :  { %v459_v34 = vld [vmem:[%s760_s3] sm:$0xff]   ;;  %v468_v53 = vunpack.c.l.bf16 %v475_v45  ;;  %v469_v62 = vunpack.c.h.bf16 %v475_v45 }
   0x7   :  { %486 = vmatpush3.bf16.msra.mxu0 %v501_v2  ;;  %498 = vmatpush3.bf16.msra.mxu1 %v501_v2  ;;  %v460_v42 = vunpack.c.l.bf16 %v459_v34 }
   0x8   :  { %v39_v7 = vld [vmem:[#allocation2 + $0x10] sm:$0xff]  ;;  %v37_v9 = vld [vmem:[#allocation2] sm:$0xff] }
   0x9   :  { %v40_v13 = vld [vmem:[#allocation2 + $0x18] sm:$0xff]  ;;  %v38_v19 = vld [vmem:[#allocation2 + $0x8] sm:$0xff] }
   0xa   :  { %488 = vmatmul.mubr.msk.bf16.vlgmr.msra.gmra.mrb[0].mxu0 %vm28_vm0, %v504_v5  ;;  %492 = vmatmul.mubr.msk.bf16.vlgmr.msra.gmra.mrb[0].mxu1 %vm28_vm0, %v505_v6  ;;  %v41_v10 = vld [vmem:[#allocation2 + $0x20] sm:$0xff]  ;;  %v42_v20 = vld [vmem:[#allocation2 + $0x28] sm:$0xff]  ;;  %v461_v5 = vunpack.c.h.bf16 %v459_v34 }
   0xb   :  { %v43_v8 = vld [vmem:[#allocation2 + $0x30] sm:$0xff]  ;;  %v44_v14 = vld [vmem:[#allocation2 + $0x38] sm:$0xff] }
  0xdd   :  { %v489_v11 = vpop.f32.mrb[0].mxu0  ;;  %v493_v12 = vpop.f32.mrb[0].mxu1 }
  0xde   :  { %v169_v15 = vadd.f32 %v489_v11, %v39_v7  ;;  %v173_v16 = vadd.f32 %v493_v12, %v43_v8  ;;  %v136_v17 = vpop.f32.mrb[1].mxu0  ;;  %v152_v18 = vpop.f32.mrb[1].mxu1 }
  0xdf   :  { %v167_v21 = vadd.f32 %v136_v17, %v37_v9  ;;  %v171_v22 = vadd.f32 %v152_v18, %v41_v10  ;;  %v490_v23 = vpop.f32.mrb[2].mxu0  ;;  %v494_v24 = vpop.f32.mrb[2].mxu1 }
  0xe0   :  { %177 = vst.msk [vmem:[#allocation2 + $0x10] sm:$0xff] %vm28_vm0, %v169_v15  ;;  %181 = vst.msk [vmem:[#allocation2 + $0x30] sm:$0xff] %vm28_vm0, %v173_v16  ;;  %v170_v25 = vadd.f32 %v490_v23, %v40_v13  ;;  %v174_v26 = vadd.f32 %v494_v24, %v44_v14  ;;  %v139_v27 = vpop.f32.mrb[3].mxu0  ;;  %v155_v28 = vpop.f32.mrb[3].mxu1 }
  0xe1   :  { %175 = vst.msk [vmem:[#allocation2] sm:$0xff] %vm28_vm0, %v167_v21  ;;  %179 = vst.msk [vmem:[#allocation2 + $0x20] sm:$0xff] %vm28_vm0, %v171_v22  ;;  %v168_v29 = vadd.f32 %v139_v27, %v38_v19  ;;  %v172_v30 = vadd.f32 %v155_v28, %v42_v20 }
  0xe2   :  { %178 = vst.msk [vmem:[#allocation2 + $0x18] sm:$0xff] %vm28_vm0, %v170_v25  ;;  %182 = vst.msk [vmem:[#allocation2 + $0x38] sm:$0xff] %vm28_vm0, %v174_v26 }
  0xe3   :  { %176 = vst.msk [vmem:[#allocation2 + $0x8] sm:$0xff] %vm28_vm0, %v168_v29  ;;  %180 = vst.msk [vmem:[#allocation2 + $0x28] sm:$0xff] %vm28_vm0, %v172_v30 }
  0xe7   :  { %v192_v37 = vld [vmem:[#allocation2 + $0x30] sm:$0xff] }
  0xe8   :  { %v188_v38 = vld [vmem:[#allocation2 + $0x10] sm:$0xff]  ;;  %v207_v39 = vadd.f32 %v439_v33, %v192_v37  ;;  %v186_v41 = vld [vmem:[#allocation2] sm:$0xff] }
  0xe9   :  { %v203_v40 = vadd.f32 %v439_v33, %v188_v38  ;;  %v190_v44 = vld [vmem:[#allocation2 + $0x20] sm:$0xff]  ;;  %v201_v46 = vadd.f32 %v439_v33, %v186_v41  ;;  %v189_v47 = vld [vmem:[#allocation2 + $0x18] sm:$0xff] }
  0xea   :  { %v193_v48 = vld [vmem:[#allocation2 + $0x38] sm:$0xff]  ;;  %v611_v49 = vadd.f32 %v472_v35, %v207_v39  ;;  %v204_v51 = vadd.f32 %v439_v33, %v189_v47  ;;  %v205_v52 = vadd.f32 %v439_v33, %v190_v44  ;;  %v191_v60 = vld [vmem:[#allocation2 + $0x28] sm:$0xff] }
  0xeb   :  { %v613_v50 = vadd.f32 %v464_v36, %v203_v40  ;;  %v208_v54 = vadd.f32 %v439_v33, %v193_v48  ;;  %v619_v58 = vadd.f32 %v460_v42, %v201_v46  ;;  %v206_v2 = vadd.f32 %v439_v33, %v191_v60  ;;  %v187_v3 = vld [vmem:[#allocation2 + $0x8] sm:$0xff] }
  0xec   :  { %v251_v56 = vsel %vm28_vm0, %v611_v49, 0.0  ;;  %v621_v59 = vadd.f32 %v465_v43, %v204_v51  ;;  %v623_v61 = vadd.f32 %v468_v53, %v205_v52  ;;  %v202_v4 = vadd.f32 %v439_v33, %v187_v3 }
  0xed   :  { %v239_v57 = vsel %vm28_vm0, %v613_v50, 0.0  ;;  %252 = vadd.xlane.f32.xlu0 %v251_v56  ;;  %v233_v63 = vsel %vm28_vm0, %v619_v58, 0.0  ;;  %v629_v1 = vadd.f32 %v473_v55, %v208_v54  ;;  %v268_v8 = vmul.f32 %v613_v50, %v613_v50 }
  0xee   :  { %240 = vadd.xlane.f32.xlu1 %v239_v57  ;;  %v242_v0 = vsel %vm28_vm0, %v621_v59, 0.0  ;;  %v245_v6 = vsel %vm28_vm0, %v623_v61, 0.0  ;;  %v637_v9 = vadd.f32 %v469_v62, %v206_v2  ;;  %v269_v12 = vmul.f32 %v621_v59, %v621_v59 }
  0xef   :  { %v254_v7 = vsel %vm28_vm0, %v629_v1, 0.0  ;;  %v280_v10 = vsel %vm28_vm0, %v268_v8, 0.0  ;;  %v644_v13 = vadd.f32 %v461_v5, %v202_v4  ;;  %v266_v17 = vmul.f32 %v619_v58, %v619_v58 }
  0xf0   :  { %v248_v11 = vsel %vm28_vm0, %v637_v9, 0.0  ;;  %v283_v14 = vsel %vm28_vm0, %v269_v12, 0.0  ;;  %v271_v20 = vmul.f32 %v637_v9, %v637_v9  ;;  %v270_v21 = vmul.f32 %v623_v61, %v623_v61 }
  0xf1   :  { %234 = vadd.xlane.f32.xlu0 %v233_v63  ;;  %v236_v15 = vsel %vm28_vm0, %v644_v13, 0.0  ;;  %v267_v16 = vmul.f32 %v644_v13, %v644_v13  ;;  %v274_v19 = vsel %vm28_vm0, %v266_v17, 0.0  ;;  %v273_v24 = vmul.f32 %v629_v1, %v629_v1 }
  0xf2   :  { %243 = vadd.xlane.f32.xlu1 %v242_v0  ;;  %v289_v22 = vsel %vm28_vm0, %v271_v20, 0.0  ;;  %v286_v23 = vsel %vm28_vm0, %v270_v21, 0.0  ;;  %v272_v25 = vmul.f32 %v611_v49, %v611_v49 }
  0xf3   :  { %v277_v18 = vsel %vm28_vm0, %v267_v16, 0.0  ;;  %v295_v26 = vsel %vm28_vm0, %v273_v24, 0.0 }
  0xf4   :  { %v292_v27 = vsel %vm28_vm0, %v272_v25, 0.0 }
  0xf5   :  { %246 = vadd.xlane.f32.xlu0 %v245_v6 }
  0xf6   :  { %255 = vadd.xlane.f32.xlu1 %v254_v7 }
  0xf9   :  { %281 = vadd.xlane.f32.xlu0 %v280_v10 }
  0xfa   :  { %249 = vadd.xlane.f32.xlu1 %v248_v11 }
  0xfd   :  { %237 = vadd.xlane.f32.xlu0 %v236_v15 }
  0xfe   :  { %284 = vadd.xlane.f32.xlu1 %v283_v14 }
 0x101   :  { %275 = vadd.xlane.f32.xlu0 %v274_v19  ;;  %v699_v19 = vld [vmem:[%s762_s4] ss:$0 sm:$0xff] }
 0x102   :  { %278 = vadd.xlane.f32.xlu1 %v277_v18 }
 0x105   :  { %287 = vadd.xlane.f32.xlu0 %v286_v23 }
 0x106   :  { %290 = vadd.xlane.f32.xlu1 %v289_v22 }
 0x109   :  { %293 = vadd.xlane.f32.xlu0 %v292_v27 }
 0x10a   :  { %296 = vadd.xlane.f32.xlu1 %v295_v26 }
 0x17a   :  { %v253_v28 = vpop.xlane.xlu0 %252 }
 0x17b   :  { %v241_v29 = vpop.xlane.xlu1 %240  ;;  %v683_v2 = vmul.f32 0.03125, %v253_v28 }
 0x17c   :  { %v260_v34 = vmul.f32 0.03125, %v241_v29 }
 0x17d   :  { %v312_v16 = vmul.f32 %v683_v2, %v683_v2 }
 0x17e   :  { %v235_v30 = vpop.xlane.xlu0 %234  ;;  %v308_v37 = vmul.f32 %v260_v34, %v260_v34  ;;  %v324_v17 = vsub.f32 %v613_v50, %v260_v34  ;;  %v441_v50 = vld [vmem:[%s763_s5] ss:$0 sm:$0xff] }
 0x17f   :  { %v244_v31 = vpop.xlane.xlu1 %243  ;;  %v669_v41 = vmul.f32 0.03125, %v235_v30 }
 0x180   :  { %v667_v38 = vmul.f32 0.03125, %v244_v31 }
 0x181   :  { %v306_v51 = vmul.f32 %v669_v41, %v669_v41 }
 0x182   :  { %v247_v32 = vpop.xlane.xlu0 %246  ;;  %v309_v44 = vmul.f32 %v667_v38, %v667_v38  ;;  %v325_v30 = vsub.f32 %v621_v59, %v667_v38  ;;  %v322_v59 = vsub.f32 %v619_v58, %v669_v41 }
 0x183   :  { %v256_v33 = vpop.xlane.xlu1 %255  ;;  %v677_v52 = vmul.f32 0.03125, %v247_v32 }
 0x184   :  { %v687_v4 = vmul.f32 0.03125, %v256_v33 }
 0x185   :  { %v310_v3 = vmul.f32 %v677_v52, %v677_v52 }
 0x186   :  { %v282_v35 = vpop.xlane.xlu0 %281  ;;  %v313_v18 = vmul.f32 %v687_v4, %v687_v4 }
 0x187   :  { %v250_v36 = vpop.xlane.xlu1 %249  ;;  %v300_v39 = vmul.f32 0.03125, %v282_v35 }
 0x188   :  { %v679_v53 = vmul.f32 0.03125, %v250_v36 }
 0x189   :  { %v316_v40 = vsub.f32 %v300_v39, %v308_v37 }
 0x18a   :  { %v238_v43 = vpop.xlane.xlu0 %237  ;;  %v311_v5 = vmul.f32 %v679_v53, %v679_v53 }
 0x18b   :  { %v285_v42 = vpop.xlane.xlu1 %284  ;;  %v332_v45 = vadd.f32 1e-05, %v316_v40  ;;  %v673_v47 = vmul.f32 0.03125, %v238_v43 }
 0x18c   :  { %v301_v46 = vmul.f32 0.03125, %v285_v42 }
 0x18d   :  { %506 = vrsqrt.f32 %v332_v45  ;;  %v307_v57 = vmul.f32 %v673_v47, %v673_v47  ;;  %v323_v40 = vsub.f32 %v644_v13, %v673_v47 }
 0x18e   :  { %v317_v48 = vsub.f32 %v301_v46, %v309_v44  ;;  %v276_v55 = vpop.xlane.xlu0 %275  ;;  %v327_v46 = vsub.f32 %v637_v9, %v679_v53  ;;  %v329_v9 = vsub.f32 %v629_v1, %v687_v4 }
 0x18f   :  { %v279_v54 = vpop.xlane.xlu1 %278  ;;  %v298_v62 = vmul.f32 0.03125, %v276_v55 }
 0x190   :  { %v333_v56 = vadd.f32 1e-05, %v317_v48  ;;  %v299_v60 = vmul.f32 0.03125, %v279_v54 }
 0x191   :  { %v314_v0 = vsub.f32 %v298_v62, %v306_v51  ;;  %v326_v51 = vsub.f32 %v623_v61, %v677_v52  ;;  %v328_v61 = vsub.f32 %v611_v49, %v683_v2 }
 0x192   :  { %508 = vrsqrt.f32 %v333_v56  ;;  %v315_v63 = vsub.f32 %v299_v60, %v307_v57  ;;  %v288_v7 = vpop.xlane.xlu0 %287 }
 0x193   :  { %v291_v6 = vpop.xlane.xlu1 %290  ;;  %v330_v10 = vadd.f32 1e-05, %v314_v0  ;;  %v302_v12 = vmul.f32 0.03125, %v288_v7 }
 0x194   :  { %v331_v8 = vadd.f32 1e-05, %v315_v63  ;;  %v303_v11 = vmul.f32 0.03125, %v291_v6 }
 0x195   :  { %v318_v15 = vsub.f32 %v302_v12, %v310_v3 }
 0x196   :  { %510 = vrsqrt.f32 %v331_v8  ;;  %v319_v14 = vsub.f32 %v303_v11, %v311_v5  ;;  %v294_v21 = vpop.xlane.xlu0 %293 }
 0x197   :  { %512 = vrsqrt.f32 %v330_v10  ;;  %v297_v20 = vpop.xlane.xlu1 %296  ;;  %v507_v22 = vpop.eup %506  ;;  %v334_v24 = vadd.f32 1e-05, %v318_v15  ;;  %v304_v26 = vmul.f32 0.03125, %v294_v21 }
 0x198   :  { %v335_v23 = vadd.f32 1e-05, %v319_v14  ;;  %v305_v25 = vmul.f32 0.03125, %v297_v20  ;;  %v348_v27 = vmul.f32 %v507_v22, %v324_v17 }
 0x199   :  { %v320_v29 = vsub.f32 %v304_v26, %v312_v16 }
 0x19a   :  { %514 = vrsqrt.f32 %v335_v23  ;;  %v321_v28 = vsub.f32 %v305_v25, %v313_v18  ;;  %v363_v31 = vmul.f32 %v699_v19, %v348_v27 }
 0x19b   :  { %516 = vrsqrt.f32 %v334_v24  ;;  %v336_v34 = vadd.f32 1e-05, %v320_v29 }
 0x19c   :  { %v509_v32 = vpop.eup %508  ;;  %v337_v33 = vadd.f32 1e-05, %v321_v28  ;;  %v378_v35 = vadd.f32 %v441_v50, %v363_v31 }
 0x19d   :  { %v349_v36 = vmul.f32 %v509_v32, %v325_v30 }
 0x19e   :  { %518 = vrsqrt.f32 %v337_v33  ;;  %v452_v37 = vpack.c.bf16 %v378_v35, %v378_v35 }
 0x19f   :  { %v364_v39 = vmul.f32 %v699_v19, %v349_v36  ;;  %520 = vrsqrt.f32 %v336_v34 }
 0x1a0   :  { %v511_v42 = vpop.eup %510  ;;  %419 = vst.msk [vmem:[%s764_s6 + $0x8] sm:$0xf] %vm416_vm1, %v452_v37 }
 0x1a1   :  { %v513_v38 = vpop.eup %512  ;;  %v379_v43 = vadd.f32 %v441_v50, %v364_v39  ;;  %v347_v44 = vmul.f32 %v511_v42, %v323_v40 }
 0x1a2   :  { %v346_v45 = vmul.f32 %v513_v38, %v322_v59 }
 0x1a3   :  { %v453_v48 = vpack.c.bf16 %v379_v43, %v379_v43  ;;  %v362_v13 = vmul.f32 %v699_v19, %v347_v44 }
 0x1a4   :  { %v515_v47 = vpop.eup %514  ;;  %v361_v58 = vmul.f32 %v699_v19, %v346_v45 }
 0x1a5   :  { %v517_v41 = vpop.eup %516  ;;  %420 = vst.msk [vmem:[%s764_s6 + $0xc] sm:$0xf] %vm416_vm1, %v453_v48  ;;  %v377_v54 = vadd.f32 %v441_v50, %v362_v13  ;;  %v351_v55 = vmul.f32 %v515_v47, %v327_v46 }
 0x1a6   :  { %v376_v56 = vadd.f32 %v441_v50, %v361_v58  ;;  %v350_v57 = vmul.f32 %v517_v41, %v326_v51 }
 0x1a7   :  { %v451_v53 = vpack.c.bf16 %v377_v54, %v377_v54  ;;  %v366_v60 = vmul.f32 %v699_v19, %v351_v55 }
 0x1a8   :  { %v519_v62 = vpop.eup %518  ;;  %v450_v52 = vpack.c.bf16 %v376_v56, %v376_v56  ;;  %v365_v63 = vmul.f32 %v699_v19, %v350_v57 }
 0x1a9   :  { %v521_v0 = vpop.eup %520  ;;  %418 = vst.msk [vmem:[%s764_s6 + $0x4] sm:$0xf] %vm416_vm1, %v451_v53  ;;  %v381_v3 = vadd.f32 %v441_v50, %v366_v60  ;;  %v353_v5 = vmul.f32 %v519_v62, %v329_v9 }
 0x1aa   :  { %417 = vst.msk [vmem:[%s764_s6] sm:$0xf] %vm416_vm1, %v450_v52  ;;  %v380_v1 = vadd.f32 %v441_v50, %v365_v63  ;;  %v352_v4 = vmul.f32 %v521_v0, %v328_v61 }
 0x1ab   :  { %v455_v6 = vpack.c.bf16 %v381_v3, %v381_v3  ;;  %v368_v49 = vmul.f32 %v699_v19, %v353_v5 }
 0x1ac   :  { %v454_v2 = vpack.c.bf16 %v380_v1, %v380_v1  ;;  %v367_v7 = vmul.f32 %v699_v19, %v352_v4 }
 0x1ad   :  { %422 = vst.msk [vmem:[%s764_s6 + $0x14] sm:$0xf] %vm416_vm1, %v455_v6  ;;  %v383_v8 = vadd.f32 %v441_v50, %v368_v49 }
 0x1ae   :  { %421 = vst.msk [vmem:[%s764_s6 + $0x10] sm:$0xf] %vm416_vm1, %v454_v2  ;;  %v382_v10 = vadd.f32 %v441_v50, %v367_v7 }
 0x1af   :  { %v457_v11 = vpack.c.bf16 %v383_v8, %v383_v8 }
 0x1b0   :  { %v456_v12 = vpack.c.bf16 %v382_v10, %v382_v10 }
 0x1b1   :  { %424 = vst.msk [vmem:[%s764_s6 + $0x1c] sm:$0xf] %vm416_vm1, %v457_v11 }
 0x1b2   :  { %423 = vst.msk [vmem:[%s764_s6 + $0x18] sm:$0xf] %vm416_vm1, %v456_v12 }

// kernel: transformer_esim_forward.15
= control target key start
LH: loop header
LB: loop body
LE: loop exit
PB: predicated region body
PF: predicated region fallthrough
CT: control target
= control target key end

     0   :  { %vm35_vm0 = vcmask 261120   ;;  %v656_v10 = vmov 0.0   ;;  %vm216_vm1 = vcmask 523264   ;;  %vm532_vm2 = vcmask 257024   ;;  %s919_s1 = inlined_call_operand.vmem [shape: bf16[32,64], index: 1, kind: input, shape index: {}]   ;;  %s920_s0 = inlined_call_operand.vmem [shape: bf16[64,32], index: 0, kind: input, shape index: {}]   ;;  %s921_s3 = inlined_call_operand.vmem [shape: bf16[64,32], index: 3, kind: input, shape index: {}]   ;;  %s922_s2 = inlined_call_operand.vmem [shape: f32[1,64], index: 2, kind: input, shape index: {}]   ;;  %s923_s4 = inlined_call_operand.vmem [shape: f32[1,32], index: 4, kind: input, shape index: {}]   ;;  %s924_s5 = inlined_call_operand.vmem [shape: f32[1,32], index: 5, kind: input, shape index: {}]   ;;  %s925_s6 = inlined_call_operand.vmem [shape: f32[1,32], index: 6, kind: input, shape index: {}]   ;;  %s926_s7 = inlined_call_operand.vmem [shape: bf16[64,32], index: 7, kind: output, shape index: {}]  }
   0x1   :  { %v626_v0 = vld [vmem:[%s919_s1] sm:$0xff]   ;;  %v627_v1 = vld [vmem:[%s919_s1 + $0x8] sm:$0xff]   ;;  %v716_v4 = vld [vmem:[%s920_s0 + $0x10] sm:$0xff]   ;;  %38 = vst.msk [vmem:[#allocation2 + $0x10] sm:$0xff] %vm35_vm0, %v656_v10 }
   0x2   :  { %597 = vmatprep.subr.bf16.mxu0 %v626_v0  ;;  %v706_v2 = vld [vmem:[%s920_s0] sm:$0xff]   ;;  %v711_v3 = vld [vmem:[%s920_s0 + $0x8] sm:$0xff]   ;;  %v733_v7 = vld [vmem:[%s920_s0 + $0x18] sm:$0xff]   ;;  %36 = vst.msk [vmem:[#allocation2] sm:$0xff] %vm35_vm0, %v656_v10 }
   0x3   :  { %598 = vmatpush3.bf16.msra.mxu0 %v626_v0  ;;  %v632_v5 = vld [vmem:[%s921_s3] sm:$0xff]   ;;  %601 = vmatprep.mubr.msk.bf16.mxu0 %vm35_vm0, %v706_v2  ;;  %v633_v6 = vld [vmem:[%s921_s3 + $0x8] sm:$0xff]   ;;  %v634_v8 = vld [vmem:[%s921_s3 + $0x10] sm:$0xff]   ;;  %37 = vst.msk [vmem:[#allocation2 + $0x8] sm:$0xff] %vm35_vm0, %v656_v10  ;;  %v335_v60 = vunpack.c.l.bf16 %v711_v3  ;;  %v333_v61 = vunpack.c.l.bf16 %v706_v2 }
   0x4   :  { %599 = vmatprep.subr.bf16.mxu0 %v627_v1  ;;  %609 = vmatprep.subr.bf16.mxu1 %v632_v5  ;;  %v635_v9 = vld [vmem:[%s921_s3 + $0x18] sm:$0xff]   ;;  %39 = vst.msk [vmem:[#allocation2 + $0x18] sm:$0xff] %vm35_vm0, %v656_v10  ;;  %40 = vst.msk [vmem:[#allocation2 + $0x20] sm:$0xff] %vm35_vm0, %v656_v10  ;;  %v545_v11 = vld [vmem:[%s922_s2] ss:$0 sm:$0xff] }
   0x5   :  { %610 = vmatpush3.bf16.msra.mxu1 %v632_v5  ;;  %41 = vst.msk [vmem:[#allocation2 + $0x28] sm:$0xff] %vm35_vm0, %v656_v10  ;;  %42 = vst.msk [vmem:[#allocation2 + $0x30] sm:$0xff] %vm35_vm0, %v656_v10  ;;  %v564_v56 = vld [vmem:[%s923_s4] ss:$0 sm:$0xff] }
   0x6   :  { %611 = vmatprep.subr.bf16.mxu1 %v633_v6  ;;  %43 = vst.msk [vmem:[#allocation2 + $0x38] sm:$0xff] %vm35_vm0, %v656_v10 }
   0x7   :  { %600 = vmatpush3.bf16.msra.mxu0 %v627_v1 }
   0x8   :  { %v174_v40 = vld [vmem:[#allocation2 + $0x10] sm:$0xff] }
   0x9   :  { %612 = vmatpush3.bf16.msra.mxu1 %v633_v6  ;;  %v172_v41 = vld [vmem:[#allocation2] sm:$0xff] }
   0xa   :  { %602 = vmatmul.mubr.msk.bf16.vlgmr.msra.gmra.mrb[0].mxu0 %vm35_vm0, %v711_v3  ;;  %613 = vmatprep.subr.bf16.mxu1 %v634_v8  ;;  %v173_v46 = vld [vmem:[#allocation2 + $0x8] sm:$0xff] }
   0xb   :  { %605 = vmatprep.mubr.msk.bf16.mxu0 %vm35_vm0, %v716_v4  ;;  %v175_v43 = vld [vmem:[#allocation2 + $0x18] sm:$0xff]  ;;  %v176_v53 = vld [vmem:[#allocation2 + $0x20] sm:$0xff] }
   0xc   :  { %v178_v52 = vld [vmem:[#allocation2 + $0x30] sm:$0xff]  ;;  %v177_v59 = vld [vmem:[#allocation2 + $0x28] sm:$0xff] }
   0xd   :  { %614 = vmatpush3.bf16.msra.mxu1 %v634_v8  ;;  %v179_v55 = vld [vmem:[#allocation2 + $0x38] sm:$0xff] }
   0xe   :  { %615 = vmatprep.subr.bf16.mxu1 %v635_v9 }
  0x11   :  { %616 = vmatpush3.bf16.msra.mxu1 %v635_v9  ;;  %v336_v9 = vunpack.c.h.bf16 %v711_v3 }
  0x12   :  { %606 = vmatmul.mubr.msk.bf16.gmra.mrb[4].mxu0 %vm35_vm0, %v733_v7 }
  0xdd   :  { %v603_v12 = vpop.f32.mrb[0].mxu0 }
  0xde   :  { %v142_v13 = vadd.f32 %v603_v12, %v545_v11  ;;  %v133_v14 = vpop.f32.mrb[1].mxu0 }
  0xdf   :  { %v134_v15 = vadd.f32 %v545_v11, %v133_v14  ;;  %v604_v16 = vpop.f32.mrb[2].mxu0 }
  0xe0   :  { %v145_v17 = vadd.f32 %v604_v16, %v545_v11  ;;  %v136_v18 = vpop.f32.mrb[3].mxu0  ;;  %v166_v20 = vmax.f32 %v142_v13, 0.0 }
  0xe1   :  { %v137_v19 = vadd.f32 %v545_v11, %v136_v18  ;;  %v164_v22 = vmax.f32 %v134_v15, 0.0 }
  0xe2   :  { %v167_v21 = vmax.f32 %v145_v17, 0.0  ;;  %v334_v17 = vunpack.c.h.bf16 %v706_v2 }
  0xe3   :  { %v165_v23 = vmax.f32 %v137_v19, 0.0 }
  0xe4   :  { %v181_v24 = vpack.c.bf16 %v167_v21, %v166_v20 }
  0xe5   :  { %v607_v25 = vpop.f32.mrb[4].mxu0  ;;  %v180_v26 = vpack.c.bf16 %v165_v23, %v164_v22 }
  0xe6   :  { %v158_v27 = vadd.f32 %v607_v25, %v545_v11  ;;  %v149_v28 = vpop.f32.mrb[5].mxu0 }
  0xe7   :  { %v150_v29 = vadd.f32 %v545_v11, %v149_v28  ;;  %v608_v30 = vpop.f32.mrb[6].mxu0  ;;  %617 = vmatprep.mubr.msk.bf16.mxu1 %vm216_vm1, %v180_v26 }
  0xe8   :  { %v170_v31 = vmax.f32 %v158_v27, 0.0  ;;  %v161_v32 = vadd.f32 %v608_v30, %v545_v11  ;;  %v152_v33 = vpop.f32.mrb[7].mxu0  ;;  %618 = vmatmul.mubr.msk.bf16.vlgmr.msra.gmra.mrb[0].mxu1 %vm216_vm1, %v181_v24  ;;  %v340_v30 = vunpack.c.h.bf16 %v733_v7 }
  0xe9   :  { %v168_v34 = vmax.f32 %v150_v29, 0.0  ;;  %v153_v35 = vadd.f32 %v545_v11, %v152_v33 }
  0xea   :  { %v171_v36 = vmax.f32 %v161_v32, 0.0 }
  0xeb   :  { %v169_v37 = vmax.f32 %v153_v35, 0.0 }
  0xec   :  { %v183_v38 = vpack.c.bf16 %v171_v36, %v170_v31 }
  0xed   :  { %v182_v39 = vpack.c.bf16 %v169_v37, %v168_v34  ;;  %v339_v34 = vunpack.c.l.bf16 %v733_v7 }
  0xef   :  { %621 = vmatprep.mubr.msk.bf16.mxu1 %vm216_vm1, %v182_v39 }
  0xf0   :  { %622 = vmatmul.mubr.msk.bf16.gmra.mrb[4].mxu1 %vm216_vm1, %v183_v38 }
 0x1bb   :  { %v619_v42 = vpop.f32.mrb[0].mxu1 }
 0x1bc   :  { %v296_v44 = vadd.f32 %v619_v42, %v174_v40  ;;  %v263_v45 = vpop.f32.mrb[1].mxu1  ;;  %v338_v40 = vunpack.c.h.bf16 %v716_v4 }
 0x1bd   :  { %v294_v47 = vadd.f32 %v263_v45, %v172_v41  ;;  %v620_v48 = vpop.f32.mrb[2].mxu1 }
 0x1be   :  { %304 = vst.msk [vmem:[#allocation2 + $0x10] sm:$0xff] %vm35_vm0, %v296_v44  ;;  %v297_v49 = vadd.f32 %v620_v48, %v175_v43  ;;  %v266_v50 = vpop.f32.mrb[3].mxu1  ;;  %v337_v44 = vunpack.c.l.bf16 %v716_v4 }
 0x1bf   :  { %302 = vst.msk [vmem:[#allocation2] sm:$0xff] %vm35_vm0, %v294_v47  ;;  %v295_v51 = vadd.f32 %v266_v50, %v173_v46 }
 0x1c0   :  { %305 = vst.msk [vmem:[#allocation2 + $0x18] sm:$0xff] %vm35_vm0, %v297_v49 }
 0x1c1   :  { %303 = vst.msk [vmem:[#allocation2 + $0x8] sm:$0xff] %vm35_vm0, %v295_v51 }
 0x1c3   :  { %v623_v54 = vpop.f32.mrb[4].mxu1 }
 0x1c4   :  { %v300_v57 = vadd.f32 %v623_v54, %v178_v52  ;;  %v279_v58 = vpop.f32.mrb[5].mxu1 }
 0x1c5   :  { %v298_v62 = vadd.f32 %v279_v58, %v176_v53  ;;  %v624_v63 = vpop.f32.mrb[6].mxu1  ;;  %v312_v0 = vld [vmem:[#allocation2 + $0x10] sm:$0xff] }
 0x1c6   :  { %308 = vst.msk [vmem:[#allocation2 + $0x30] sm:$0xff] %vm35_vm0, %v300_v57  ;;  %v301_v1 = vadd.f32 %v624_v63, %v179_v55  ;;  %v282_v5 = vpop.f32.mrb[7].mxu1  ;;  %v327_v6 = vadd.f32 %v564_v56, %v312_v0  ;;  %v310_v8 = vld [vmem:[#allocation2] sm:$0xff] }
 0x1c7   :  { %306 = vst.msk [vmem:[#allocation2 + $0x20] sm:$0xff] %vm35_vm0, %v298_v62  ;;  %v299_v10 = vadd.f32 %v282_v5, %v177_v59  ;;  %v325_v11 = vadd.f32 %v564_v56, %v310_v8  ;;  %v313_v12 = vld [vmem:[#allocation2 + $0x18] sm:$0xff] }
 0x1c8   :  { %309 = vst.msk [vmem:[#allocation2 + $0x38] sm:$0xff] %vm35_vm0, %v301_v1  ;;  %v771_v13 = vadd.f32 %v335_v60, %v327_v6  ;;  %v328_v14 = vadd.f32 %v564_v56, %v313_v12  ;;  %v311_v15 = vld [vmem:[#allocation2 + $0x8] sm:$0xff] }
 0x1c9   :  { %307 = vst.msk [vmem:[#allocation2 + $0x28] sm:$0xff] %vm35_vm0, %v299_v10  ;;  %v774_v16 = vadd.f32 %v333_v61, %v325_v11  ;;  %v326_v19 = vadd.f32 %v564_v56, %v311_v15 }
 0x1ca   :  { %v355_v3 = vsel %vm35_vm0, %v771_v13, 0.0  ;;  %v779_v18 = vadd.f32 %v336_v9, %v328_v14  ;;  %v384_v21 = vmul.f32 %v771_v13, %v771_v13 }
 0x1cb   :  { %356 = vadd.xlane.f32.xlu1 %v355_v3  ;;  %v349_v20 = vsel %vm35_vm0, %v774_v16, 0.0  ;;  %v789_v23 = vadd.f32 %v334_v17, %v326_v19  ;;  %v382_v32 = vmul.f32 %v774_v16, %v774_v16 }
 0x1cc   :  { %350 = vadd.xlane.f32.xlu0 %v349_v20  ;;  %v358_v22 = vsel %vm35_vm0, %v779_v18, 0.0  ;;  %v385_v2 = vmul.f32 %v779_v18, %v779_v18  ;;  %v396_v24 = vsel %vm35_vm0, %v384_v21, 0.0 }
 0x1cd   :  { %v316_v26 = vld [vmem:[#allocation2 + $0x30] sm:$0xff]  ;;  %v383_v28 = vmul.f32 %v789_v23, %v789_v23  ;;  %v352_v31 = vsel %vm35_vm0, %v789_v23, 0.0  ;;  %v390_v41 = vsel %vm35_vm0, %v382_v32, 0.0 }
 0x1ce   :  { %v399_v27 = vsel %vm35_vm0, %v385_v2, 0.0  ;;  %v331_v33 = vadd.f32 %v564_v56, %v316_v26  ;;  %v314_v36 = vld [vmem:[#allocation2 + $0x20] sm:$0xff] }
 0x1cf   :  { %359 = vadd.xlane.f32.xlu1 %v358_v22  ;;  %v317_v25 = vld [vmem:[#allocation2 + $0x38] sm:$0xff]  ;;  %v393_v37 = vsel %vm35_vm0, %v383_v28, 0.0  ;;  %v329_v43 = vadd.f32 %v564_v56, %v314_v36 }
 0x1d0   :  { %397 = vadd.xlane.f32.xlu0 %v396_v24  ;;  %v332_v29 = vadd.f32 %v564_v56, %v317_v25  ;;  %v315_v35 = vld [vmem:[#allocation2 + $0x28] sm:$0xff]  ;;  %v806_v42 = vadd.f32 %v339_v34, %v331_v33  ;;  %v843_v34 = vld [vmem:[%s924_s5] ss:$0 sm:$0xff] }
 0x1d1   :  { %v330_v39 = vadd.f32 %v564_v56, %v315_v35  ;;  %v815_v47 = vadd.f32 %v337_v44, %v329_v43 }
 0x1d2   :  { %v802_v38 = vadd.f32 %v340_v30, %v332_v29  ;;  %v367_v46 = vsel %vm35_vm0, %v806_v42, 0.0  ;;  %v388_v54 = vmul.f32 %v806_v42, %v806_v42 }
 0x1d3   :  { %400 = vadd.xlane.f32.xlu1 %v399_v27  ;;  %v811_v45 = vadd.f32 %v338_v40, %v330_v39  ;;  %v361_v4 = vsel %vm35_vm0, %v815_v47, 0.0  ;;  %v386_v50 = vmul.f32 %v815_v47, %v815_v47  ;;  %v849_v39 = vld [vmem:[%s925_s6] ss:$0 sm:$0xff] }
 0x1d4   :  { %353 = vadd.xlane.f32.xlu0 %v352_v31  ;;  %v370_v7 = vsel %vm35_vm0, %v802_v38, 0.0  ;;  %v389_v52 = vmul.f32 %v802_v38, %v802_v38  ;;  %v408_v56 = vsel %vm35_vm0, %v388_v54, 0.0 }
 0x1d5   :  { %v364_v48 = vsel %vm35_vm0, %v811_v45, 0.0  ;;  %v387_v49 = vmul.f32 %v811_v45, %v811_v45  ;;  %v402_v53 = vsel %vm35_vm0, %v386_v50, 0.0 }
 0x1d6   :  { %v411_v55 = vsel %vm35_vm0, %v389_v52, 0.0 }
 0x1d7   :  { %394 = vadd.xlane.f32.xlu1 %v393_v37  ;;  %v405_v51 = vsel %vm35_vm0, %v387_v49, 0.0 }
 0x1d8   :  { %391 = vadd.xlane.f32.xlu0 %v390_v41 }
 0x1db   :  { %371 = vadd.xlane.f32.xlu1 %v370_v7 }
 0x1dc   :  { %368 = vadd.xlane.f32.xlu0 %v367_v46 }
 0x1df   :  { %365 = vadd.xlane.f32.xlu1 %v364_v48 }
 0x1e0   :  { %362 = vadd.xlane.f32.xlu0 %v361_v4 }
 0x1e3   :  { %406 = vadd.xlane.f32.xlu1 %v405_v51 }
 0x1e4   :  { %403 = vadd.xlane.f32.xlu0 %v402_v53 }
 0x1e7   :  { %412 = vadd.xlane.f32.xlu1 %v411_v55 }
 0x1e8   :  { %409 = vadd.xlane.f32.xlu0 %v408_v56 }
 0x258   :  { %v357_v57 = vpop.xlane.xlu1 %356 }
 0x259   :  { %v351_v58 = vpop.xlane.xlu0 %350  ;;  %v376_v59 = vmul.f32 0.03125, %v357_v57 }
 0x25a   :  { %v833_v10 = vmul.f32 0.03125, %v351_v58 }
 0x25b   :  { %v424_v63 = vmul.f32 %v376_v59, %v376_v59  ;;  %v440_v30 = vsub.f32 %v771_v13, %v376_v59 }
 0x25c   :  { %v360_v60 = vpop.xlane.xlu1 %359  ;;  %v422_v21 = vmul.f32 %v833_v10, %v833_v10  ;;  %v438_v50 = vsub.f32 %v774_v16, %v833_v10 }
 0x25d   :  { %v377_v61 = vmul.f32 0.03125, %v360_v60  ;;  %v398_v62 = vpop.xlane.xlu0 %397 }
 0x25e   :  { %v416_v0 = vmul.f32 0.03125, %v398_v62 }
 0x25f   :  { %v425_v6 = vmul.f32 %v377_v61, %v377_v61  ;;  %v441_v37 = vsub.f32 %v779_v18, %v377_v61 }
 0x260   :  { %v432_v1 = vsub.f32 %v416_v0, %v424_v63  ;;  %v401_v5 = vpop.xlane.xlu1 %400 }
 0x261   :  { %v417_v8 = vmul.f32 0.03125, %v401_v5  ;;  %v354_v9 = vpop.xlane.xlu0 %353 }
 0x262   :  { %v448_v11 = vadd.f32 1e-05, %v432_v1  ;;  %v375_v12 = vmul.f32 0.03125, %v354_v9 }
 0x263   :  { %v433_v14 = vsub.f32 %v417_v8, %v425_v6 }
 0x264   :  { %640 = vrsqrt.f32 %v448_v11  ;;  %v423_v15 = vmul.f32 %v375_v12, %v375_v12  ;;  %v395_v17 = vpop.xlane.xlu1 %394  ;;  %v439_v54 = vsub.f32 %v789_v23, %v375_v12 }
 0x265   :  { %v449_v3 = vadd.f32 1e-05, %v433_v14  ;;  %v415_v19 = vmul.f32 0.03125, %v395_v17  ;;  %v392_v20 = vpop.xlane.xlu0 %391 }
 0x266   :  { %v414_v22 = vmul.f32 0.03125, %v392_v20 }
 0x267   :  { %642 = vrsqrt.f32 %v449_v3  ;;  %v431_v2 = vsub.f32 %v415_v19, %v423_v15 }
 0x268   :  { %v430_v24 = vsub.f32 %v414_v22, %v422_v21  ;;  %v372_v25 = vpop.xlane.xlu1 %371 }
 0x269   :  { %v447_v26 = vadd.f32 1e-05, %v431_v2  ;;  %v369_v27 = vpop.xlane.xlu0 %368  ;;  %v851_v40 = vmul.f32 0.03125, %v372_v25 }
 0x26a   :  { %v446_v28 = vadd.f32 1e-05, %v430_v24  ;;  %v854_v44 = vmul.f32 0.03125, %v369_v27 }
 0x26b   :  { %644 = vrsqrt.f32 %v447_v26  ;;  %v429_v55 = vmul.f32 %v851_v40, %v851_v40  ;;  %v445_v27 = vsub.f32 %v802_v38, %v851_v40 }
 0x26c   :  { %646 = vrsqrt.f32 %v446_v28  ;;  %v366_v29 = vpop.xlane.xlu1 %365  ;;  %v428_v60 = vmul.f32 %v854_v44, %v854_v44 }
 0x26d   :  { %v838_v31 = vmul.f32 0.03125, %v366_v29  ;;  %v363_v32 = vpop.xlane.xlu0 %362 }
 0x26e   :  { %v641_v33 = vpop.eup %640  ;;  %v378_v35 = vmul.f32 0.03125, %v363_v32 }
 0x26f   :  { %v464_v36 = vmul.f32 %v641_v33, %v440_v30  ;;  %v427_v7 = vmul.f32 %v838_v31, %v838_v31  ;;  %v443_v21 = vsub.f32 %v811_v45, %v838_v31  ;;  %v444_v30 = vsub.f32 %v806_v42, %v854_v44 }
 0x270   :  { %v407_v13 = vpop.xlane.xlu1 %406  ;;  %v426_v18 = vmul.f32 %v378_v35, %v378_v35  ;;  %v442_v2 = vsub.f32 %v815_v47, %v378_v35 }
 0x271   :  { %v643_v41 = vpop.eup %642  ;;  %v479_v43 = vmul.f32 %v843_v34, %v464_v36  ;;  %v419_v46 = vmul.f32 0.03125, %v407_v13  ;;  %v404_v48 = vpop.xlane.xlu0 %403 }
 0x272   :  { %v465_v49 = vmul.f32 %v643_v41, %v441_v37  ;;  %v418_v4 = vmul.f32 0.03125, %v404_v48 }
 0x273   :  { %v494_v51 = vadd.f32 %v849_v39, %v479_v43  ;;  %v435_v52 = vsub.f32 %v419_v46, %v427_v7 }
 0x274   :  { %v480_v53 = vmul.f32 %v843_v34, %v465_v49  ;;  %v434_v56 = vsub.f32 %v418_v4, %v426_v18  ;;  %v413_v57 = vpop.xlane.xlu1 %412 }
 0x275   :  { %v645_v58 = vpop.eup %644  ;;  %v577_v59 = vpack.c.bf16 %v494_v51, %v494_v51  ;;  %v451_v61 = vadd.f32 1e-05, %v435_v52  ;;  %v421_v16 = vmul.f32 0.03125, %v413_v57  ;;  %v410_v62 = vpop.xlane.xlu0 %409 }
 0x276   :  { %v647_v63 = vpop.eup %646  ;;  %v495_v0 = vadd.f32 %v849_v39, %v480_v53  ;;  %v463_v1 = vmul.f32 %v645_v58, %v439_v54  ;;  %v450_v5 = vadd.f32 1e-05, %v434_v56  ;;  %v420_v6 = vmul.f32 0.03125, %v410_v62 }
 0x277   :  { %535 = vst.msk [vmem:[%s926_s7 + $0x8] sm:$0xf] %vm532_vm2, %v577_v59  ;;  %v462_v23 = vmul.f32 %v647_v63, %v438_v50  ;;  %648 = vrsqrt.f32 %v451_v61  ;;  %v437_v8 = vsub.f32 %v421_v16, %v429_v55 }
 0x278   :  { %v578_v9 = vpack.c.bf16 %v495_v0, %v495_v0  ;;  %v478_v10 = vmul.f32 %v843_v34, %v463_v1  ;;  %650 = vrsqrt.f32 %v450_v5  ;;  %v436_v11 = vsub.f32 %v420_v6, %v428_v60 }
 0x279   :  { %v477_v12 = vmul.f32 %v843_v34, %v462_v23  ;;  %v453_v14 = vadd.f32 1e-05, %v437_v8 }
 0x27a   :  { %536 = vst.msk [vmem:[%s926_s7 + $0xc] sm:$0xf] %vm532_vm2, %v578_v9  ;;  %v493_v15 = vadd.f32 %v849_v39, %v478_v10  ;;  %v452_v17 = vadd.f32 1e-05, %v436_v11 }
 0x27b   :  { %v492_v3 = vadd.f32 %v849_v39, %v477_v12  ;;  %652 = vrsqrt.f32 %v453_v14 }
 0x27c   :  { %v576_v19 = vpack.c.bf16 %v493_v15, %v493_v15  ;;  %654 = vrsqrt.f32 %v452_v17 }
 0x27d   :  { %v575_v20 = vpack.c.bf16 %v492_v3, %v492_v3 }
 0x27e   :  { %534 = vst.msk [vmem:[%s926_s7 + $0x4] sm:$0xf] %vm532_vm2, %v576_v19 }
 0x27f   :  { %533 = vst.msk [vmem:[%s926_s7] sm:$0xf] %vm532_vm2, %v575_v20 }
 0x281   :  { %v649_v22 = vpop.eup %648 }
 0x282   :  { %v651_v24 = vpop.eup %650  ;;  %v467_v25 = vmul.f32 %v649_v22, %v443_v21 }
 0x283   :  { %v466_v26 = vmul.f32 %v651_v24, %v442_v2 }
 0x284   :  { %v482_v28 = vmul.f32 %v843_v34, %v467_v25 }
 0x285   :  { %v653_v29 = vpop.eup %652  ;;  %v481_v32 = vmul.f32 %v843_v34, %v466_v26 }
 0x286   :  { %v655_v33 = vpop.eup %654  ;;  %v497_v45 = vadd.f32 %v849_v39, %v482_v28  ;;  %v469_v31 = vmul.f32 %v653_v29, %v445_v27 }
 0x287   :  { %v496_v47 = vadd.f32 %v849_v39, %v481_v32  ;;  %v468_v35 = vmul.f32 %v655_v33, %v444_v30 }
 0x288   :  { %v580_v36 = vpack.c.bf16 %v497_v45, %v497_v45  ;;  %v484_v37 = vmul.f32 %v843_v34, %v469_v31 }
 0x289   :  { %v579_v13 = vpack.c.bf16 %v496_v47, %v496_v47  ;;  %v483_v38 = vmul.f32 %v843_v34, %v468_v35 }
 0x28a   :  { %538 = vst.msk [vmem:[%s926_s7 + $0x14] sm:$0xf] %vm532_vm2, %v580_v36  ;;  %v499_v42 = vadd.f32 %v849_v39, %v484_v37 }
 0x28b   :  { %537 = vst.msk [vmem:[%s926_s7 + $0x10] sm:$0xf] %vm532_vm2, %v579_v13  ;;  %v498_v40 = vadd.f32 %v849_v39, %v483_v38 }
 0x28c   :  { %v582_v41 = vpack.c.bf16 %v499_v42, %v499_v42 }
 0x28d   :  { %v581_v43 = vpack.c.bf16 %v498_v40, %v498_v40 }
 0x28e   :  { %540 = vst.msk [vmem:[%s926_s7 + $0x1c] sm:$0xf] %vm532_vm2, %v582_v41 }
 0x28f   :  { %539 = vst.msk [vmem:[%s926_s7 + $0x18] sm:$0xf] %vm532_vm2, %v581_v43 }

</bundles_post_ra>
